<compile_context>
chip_gen: v7x
topology: tpu7x:2x2x1
jax: 0.10.0
libtpu: 0.0.40
codegen_flags: <defaults>
</compile_context>

<pallas_src>
import math

import jax
import jax.numpy as jnp
from jax.experimental import pallas as pl
from jax.experimental.pallas import tpu as pltpu


def _round_up(x, m):
    return ((x + m - 1) // m) * m


def _vmem_capacity_bytes():
    """Best-effort per-TensorCore VMEM capacity in bytes (conservative fallback)."""
    try:
        return int(pltpu.get_tpu_info().vmem_capacity_bytes)
    except Exception:
        pass
    try:
        kind = jax.local_devices()[0].device_kind.lower()
        if "v5 lite" in kind or "v5e" in kind or "v6" in kind:
            return 128 * 1024 * 1024
    except Exception:
        pass
    return 64 * 1024 * 1024      # v7x-safe fallback


def _num_tensorcores():
    """Best-effort TensorCores per chip (2 on v7x); fallback 1."""
    try:
        info = pltpu.get_tpu_info()
        for name in ("num_tensorcores", "tensorcore_count", "num_cores",
                     "core_count", "num_tensor_cores"):
            v = getattr(info, name, None)
            if v:
                return int(v)
    except Exception:
        pass
    try:
        return max(1, int(getattr(jax.local_devices()[0], "num_cores", 1)))
    except Exception:
        return 1


def _make_lstm_kernel(seq_len, chunk, hp, needs_mask, matmul_dtype, unroll):
    G4 = 4 * hp

    def kernel(x_ref, w_ref, u_ref, b_ref, hseq_ref, h_ref, c_ref,
               xz_sc, hbuf_sc):
        t_chunk = pl.program_id(1)

        # Final-state output blocks (constant block index along the time axis
        # => VMEM-resident) double as the recurrent carry.  Zero them at the
        # start of each batch-block's time sweep.
        @pl.when(t_chunk == 0)
        def _():
            h_ref[...] = jnp.zeros_like(h_ref)
            c_ref[...] = jnp.zeros_like(c_ref)

        bb = x_ref.shape[0]
        isz = x_ref.shape[2]

        # Input contribution of all 4 gates for the whole chunk: ONE
        # (chunk*bb, I) @ (I, 4Hp) matmul (+ fused bias) per grid step.
        # x is transposed to time-major (chunk, bb, I) once (XLU, off the
        # serial critical path) so the per-step read below is a dense,
        # (8,128)-aligned slab xz_sc[k] -> (bb, 4Hp).
        x_tm = jnp.swapaxes(x_ref[...], 0, 1)                 # (chunk, bb, I)
        x_flat = x_tm.reshape(chunk * bb, isz).astype(matmul_dtype)
        xz = jnp.dot(x_flat, w_ref[...], preferred_element_type=jnp.float32)
        xz = xz + b_ref[...].astype(jnp.float32)              # fused bias add
        xz_sc[...] = xz.reshape(chunk, bb, G4)

        u = u_ref[...]                                        # (Hp, 4Hp), invariant
        base = t_chunk * chunk

        def step(k, carry):
            h, c = carry
            z = xz_sc[k]                                      # dense (bb, 4Hp) load
            z = z + jnp.dot(h.astype(matmul_dtype), u,
                            preferred_element_type=jnp.float32)
            sig = jax.nn.sigmoid(z[:, : 3 * hp])              # [i|f|o] in one EUP pass
            i_t = sig[:, :hp]
            f_t = sig[:, hp: 2 * hp]
            o_t = sig[:, 2 * hp: 3 * hp]
            g_t = jnp.tanh(z[:, 3 * hp:])
            # Exact (non-standard) recurrence of the reference module.
            c_new = f_t * o_t + i_t * g_t
            h_new = o_t * jnp.tanh(c_new)
            hbuf_sc[k] = h_new                                # time-major scratch
            if needs_mask:
                # The last chunk may run past the real sequence end: freeze
                # the carry for padded timesteps.  The hbuf/hseq values for
                # those timesteps land in the out-of-bounds tail of the
                # output block, which Pallas masks out of the HBM writeback
                # (explicit reliance on partial-block output masking).
                valid = (base + k) < seq_len
                h_new = jnp.where(valid, h_new, h)
                c_new = jnp.where(valid, c_new, c)
            return h_new, c_new

        h_f, c_f = jax.lax.fori_loop(0, chunk, step, (h_ref[...], c_ref[...]),
                                     unroll=unroll)
        h_ref[...] = h_f
        c_ref[...] = c_f
        # One lane/sublane-dense store of the whole chunk's hidden states
        # (single XLU transpose per chunk instead of `chunk` masked stores).
        hseq_ref[...] = jnp.swapaxes(hbuf_sc[...], 0, 1).astype(hseq_ref.dtype)

    return kernel


def naive_custom_lstm_forward(x, params, *, chunk=None, batch_block=None,
                              matmul_dtype=jnp.float32,
                              hseq_dtype=jnp.float32):
    """x: (batch, seq, input) float32.  Returns (hidden_seq, (h_t, c_t)),
    matching NaiveCustomLSTM.forward with init_states=None.

    matmul_dtype=jnp.bfloat16 halves weight VMEM/DMA and uses the single-pass
    MXU path (f32 accumulation and f32 h/c carry are kept); expect ~1e-2
    drift vs. an f32 reference.  hseq_dtype=jnp.bfloat16 halves the
    hidden_seq HBM writeback.
    """
    # TODO(synk): optional init_states (non-zero initial h/c) not plumbed through.
    # TODO(synk): v7x-only MRB path (matmul_push_rhs/acc_lhs holding U_all) not used.
    B, S, I = x.shape
    H = params["W_i"].shape[1]

    # --- pad the per-gate hidden dim to a lane multiple so gate slices, tanh
    # --- and the h/c stores are full-128-lane dense vector ops ---------------
    Hp = _round_up(H, 128)
    G4 = 4 * Hp
    padw = Hp - H

    def pw(w):   # (I, H) -> (I, Hp)
        return jnp.pad(w, ((0, 0), (0, padw)))

    def pu(u):   # (H, H) -> (Hp, Hp); zero rows keep padded h columns inert
        return jnp.pad(u, ((0, padw), (0, padw)))

    def pb(b):   # (H,) -> (Hp,)
        return jnp.pad(b, (0, padw))

    # Fused gate weights, column order [i | f | o | g].
    W_all = jnp.concatenate([pw(params["W_i"]), pw(params["W_f"]),
                             pw(params["W_o"]), pw(params["W_c"])],
                            axis=1).astype(matmul_dtype)
    U_all = jnp.concatenate([pu(params["U_i"]), pu(params["U_f"]),
                             pu(params["U_o"]), pu(params["U_c"])],
                            axis=1).astype(matmul_dtype)
    b_all = jnp.concatenate([pb(params["b_i"]), pb(params["b_f"]),
                             pb(params["b_o"]), pb(params["b_c"])],
                            axis=0).astype(jnp.float32).reshape(1, G4)

    # --- pad batch to a multiple of 8 sublanes -------------------------------
    B_pad = _round_up(B, 8)
    x_p = x if B_pad == B else jnp.pad(x, ((0, B_pad - B), (0, 0), (0, 0)))

    # --- batch block: shard across TensorCores when the chip has >1 (v7x) ----
    if batch_block is None:
        n_tc = _num_tensorcores()
        target = max(8, _round_up(-(-B_pad // n_tc), 8))
        batch_block = max(b for b in range(8, B_pad + 1, 8)
                          if B_pad % b == 0 and b <= target)
    assert batch_block % 8 == 0 and B_pad % batch_block == 0

    # --- generation-aware VMEM budget ----------------------------------------
    f32b = 4
    wbytes = jnp.dtype(matmul_dtype).itemsize
    hbytes = jnp.dtype(hseq_dtype).itemsize
    cap = _vmem_capacity_bytes()
    budget = max(16 * 1024 * 1024, cap - 16 * 1024 * 1024)

    def need_bytes(bb, ck, wbuf):
        return (2 * bb * ck * I * f32b                       # x blocks (2 bufs)
                + 2 * bb * ck * Hp * hbytes                  # hseq out blocks
                + wbuf * ((I + Hp) * G4 * wbytes + G4 * f32b)  # weights + bias
                + 4 * bb * Hp * f32b                         # resident h/c blocks
                + bb * ck * G4 * f32b                        # xz scratch
                + bb * ck * Hp * f32b)                       # hbuf scratch
    # TODO(synk): store xz_sc in bf16 if a config is still VMEM-bound.

    # --- time chunking: as big as the budget allows --------------------------
    if chunk is None:
        chunk = min(S, 128)
    chunk = min(chunk, S)
    if chunk != S:
        chunk = max(8, (chunk // 8) * 8)     # second-to-last block dim: 8-aligned
    while chunk > 8 and need_bytes(batch_block, chunk, 1) > budget:
        chunk = max(8, ((chunk // 2) // 8) * 8)
    while batch_block > 8 and need_bytes(batch_block, chunk, 1) > budget:
        batch_block = max(b for b in range(8, batch_block, 8) if B_pad % b == 0)
    n_chunks = pl.cdiv(S, chunk)
    needs_mask = (S % chunk) != 0
    unroll = max(u for u in (8, 4, 2, 1) if chunk % u == 0)

    kernel = _make_lstm_kernel(S, chunk, Hp, needs_mask, matmul_dtype, unroll)

    def build_and_run(single_buffer_weights):
        wbuf = 1 if single_buffer_weights else 2
        need = need_bytes(batch_block, chunk, wbuf)
        # Clamp to the chip's real per-TC capacity (v7x: 64 MiB) minus headroom.
        vmem_limit = int(min(max(2 * need, 32 * 1024 * 1024),
                             cap - 8 * 1024 * 1024))
        vmem_limit = int(min(max(vmem_limit, need + 2 * 1024 * 1024),
                             cap - 4 * 1024 * 1024))

        def const2(shape):
            if single_buffer_weights:
                # Loop-invariant weights/bias: single-buffer to halve their VMEM.
                return pl.BlockSpec(shape, lambda b, t: (0, 0),
                                    pipeline_mode=pl.Buffered(1))
            return pl.BlockSpec(shape, lambda b, t: (0, 0))

        grid_spec = pltpu.PrefetchScalarGridSpec(
            num_scalar_prefetch=0,
            grid=(B_pad // batch_block, n_chunks),
            in_specs=[
                pl.BlockSpec((batch_block, chunk, I), lambda b, t: (b, t, 0)),
                const2((I, G4)),
                const2((Hp, G4)),
                const2((1, G4)),
            ],
            out_specs=(
                pl.BlockSpec((batch_block, chunk, Hp), lambda b, t: (b, t, 0)),
                # Constant index along t => VMEM-resident; doubles as the
                # recurrent carry across time chunks.
                pl.BlockSpec((batch_block, Hp), lambda b, t: (b, 0)),
                pl.BlockSpec((batch_block, Hp), lambda b, t: (b, 0)),
            ),
            scratch_shapes=[
                pltpu.VMEM((chunk, batch_block, G4), jnp.float32),  # xz, time-major
                pltpu.VMEM((chunk, batch_block, Hp), jnp.float32),  # h buffer
            ],
        )

        return pl.pallas_call(
            kernel,
            grid_spec=grid_spec,
            out_shape=(
                jax.ShapeDtypeStruct((B_pad, S, Hp), hseq_dtype),   # hidden_seq
                jax.ShapeDtypeStruct((B_pad, Hp), jnp.float32),     # final h
                jax.ShapeDtypeStruct((B_pad, Hp), jnp.float32),     # final c
            ),
            compiler_params=pltpu.CompilerParams(
                # Batch blocks are independent; time is strictly sequential.
                dimension_semantics=("parallel", "arbitrary"),
                vmem_limit_bytes=vmem_limit,
            ),
        )(x_p, W_all, U_all, b_all)

    try:
        hseq, h_t, c_t = build_and_run(True)
    except Exception:
        # Fallback if this JAX build rejects pl.Buffered(1) single-buffering.
        hseq, h_t, c_t = build_and_run(False)

    return hseq[:B, :, :H], (h_t[:B, :H], c_t[:B, :H])


def init_params(key, input_sz, hidden_sz):
    stdv = 1.0 / math.sqrt(hidden_sz)
    names = []
    for g in ("i", "f", "o", "c"):
        names += [f"W_{g}", f"U_{g}", f"b_{g}"]
    keys = jax.random.split(key, len(names))
    shapes = {}
    for g in ("i", "f", "o", "c"):
        shapes[f"W_{g}"] = (input_sz, hidden_sz)
        shapes[f"U_{g}"] = (hidden_sz, hidden_sz)
        shapes[f"b_{g}"] = (hidden_sz,)
    return {
        n: jax.random.uniform(k, shapes[n], jnp.float32, -stdv, stdv)
        for n, k in zip(names, keys)
    }


def reference_forward(x, params):
    """Pure-JAX reference mirroring the PyTorch loop, for validation."""
    B, S, I = x.shape
    H = params["W_i"].shape[1]
    h = jnp.zeros((B, H), jnp.float32)
    c = jnp.zeros((B, H), jnp.float32)
    outs = []
    for t in range(S):
        xt = x[:, t, :]
        i_t = jax.nn.sigmoid(xt @ params["W_i"] + h @ params["U_i"] + params["b_i"])
        f_t = jax.nn.sigmoid(xt @ params["W_f"] + h @ params["U_f"] + params["b_f"])
        g_t = jnp.tanh(xt @ params["W_c"] + h @ params["U_c"] + params["b_c"])
        o_t = jax.nn.sigmoid(xt @ params["W_o"] + h @ params["U_o"] + params["b_o"])
        c = f_t * o_t + i_t * g_t
        h = o_t * jnp.tanh(c)
        outs.append(h)
    return jnp.stack(outs, axis=1), (h, c)


if __name__ == "__main__":
    key = jax.random.PRNGKey(0)
    k_x, k_p, k_x2, k_x3 = jax.random.split(key, 4)

    # Config 1: single time chunk, batch padded 4 -> 8 sublanes, f32 matmuls.
    B, S, I, H = 4, 8, 16, 32
    x = jax.random.normal(k_x, (B, S, I), jnp.float32)
    params = init_params(k_p, I, H)

    hidden_seq, (h_t, c_t) = naive_custom_lstm_forward(x, params)
    jax.block_until_ready((hidden_seq, h_t, c_t))

    ref_seq, (ref_h, ref_c) = reference_forward(x, params)
    assert hidden_seq.shape == (B, S, H)
    assert h_t.shape == (B, H) and c_t.shape == (B, H)
    assert jnp.allclose(hidden_seq, ref_seq, atol=1e-5, rtol=1e-5)
    assert jnp.allclose(h_t, ref_h, atol=1e-5, rtol=1e-5)
    assert jnp.allclose(c_t, ref_c, atol=1e-5, rtol=1e-5)

    # Config 2: multi-chunk time grid with a partial (masked) last chunk,
    # exercising the VMEM-resident h/c carry across grid steps.
    B2, S2 = 2, 12
    x2 = jax.random.normal(k_x2, (B2, S2, I), jnp.float32)
    seq2, (h2, c2) = naive_custom_lstm_forward(x2, params, chunk=8)
    jax.block_until_ready((seq2, h2, c2))
    rseq2, (rh2, rc2) = reference_forward(x2, params)
    assert seq2.shape == (B2, S2, H)
    assert jnp.allclose(seq2, rseq2, atol=1e-5, rtol=1e-5)
    assert jnp.allclose(h2, rh2, atol=1e-5, rtol=1e-5)
    assert jnp.allclose(c2, rc2, atol=1e-5, rtol=1e-5)

    # Config 3: bfloat16 matmul path (single-pass MXU, halved weight VMEM) and
    # multiple batch blocks.  Looser tolerance: the h carry is re-quantized to
    # bf16 at every recurrent matmul, so error compounds over the sequence.
    B3, S3 = 16, 16
    x3 = jax.random.normal(k_x3, (B3, S3, I), jnp.float32)
    seq3, (h3, c3) = naive_custom_lstm_forward(
        x3, params, chunk=8, batch_block=8, matmul_dtype=jnp.bfloat16)
    jax.block_until_ready((seq3, h3, c3))
    rseq3, (rh3, rc3) = reference_forward(x3, params)
    assert seq3.shape == (B3, S3, H)
    assert float(jnp.max(jnp.abs(seq3 - rseq3))) < 0.1
    assert float(jnp.max(jnp.abs(h3 - rh3))) < 0.1
    assert float(jnp.max(jnp.abs(c3 - rc3))) < 0.1

    print("KERNEL_OK")
</pallas_src>

<mosaic_0001>
module attributes {stable_mosaic.version = 11 : i64} {
  func.func @kernel(%arg0: i32, %arg1: i32, %arg2: memref<8x8x16xf32, #tpu.memory_space<vmem>>, %arg3: memref<16x512xf32, #tpu.memory_space<vmem>>, %arg4: memref<128x512xf32, #tpu.memory_space<vmem>>, %arg5: memref<1x512xf32, #tpu.memory_space<vmem>>, %arg6: memref<8x8x128xf32, #tpu.memory_space<vmem>>, %arg7: memref<8x128xf32, #tpu.memory_space<vmem>>, %arg8: memref<8x128xf32, #tpu.memory_space<vmem>>, %arg9: memref<8x8x512xf32, #tpu.memory_space<vmem>>, %arg10: memref<8x8x128xf32, #tpu.memory_space<vmem>>) attributes {dimension_semantics = [#tpu.dimension_semantics<parallel>, #tpu.dimension_semantics<arbitrary>], iteration_bounds = array<i64: 1, 1>, scalar_prefetch = 0 : i64, scratch_operands = 2 : i64, tpu.core_type = #tpu.core_type<tc>, window_params = [{transform_indices = @transform_0, window_bounds = array<i64: 8, 8, 16>}, {pipeline_mode = #tpu.pipeline_mode<synchronous>, transform_indices = @transform_1, window_bounds = array<i64: 16, 512>}, {pipeline_mode = #tpu.pipeline_mode<synchronous>, transform_indices = @transform_2, window_bounds = array<i64: 128, 512>}, {pipeline_mode = #tpu.pipeline_mode<synchronous>, transform_indices = @transform_3, window_bounds = array<i64: 1, 512>}, {transform_indices = @transform_4, window_bounds = array<i64: 8, 8, 128>}, {transform_indices = @transform_5, window_bounds = array<i64: 8, 128>}, {transform_indices = @transform_6, window_bounds = array<i64: 8, 128>}]} {
    %c0_i32 = arith.constant 0 : i32
    %0 = arith.cmpi eq, %arg1, %c0_i32 : i32
    %1 = arith.extui %0 : i1 to i32
    %c0_i32_0 = arith.constant 0 : i32
    %2 = arith.cmpi ne, %1, %c0_i32_0 : i32
    scf.if %2 {
      %cst_75 = arith.constant 0.000000e+00 : f32
      %221 = vector.broadcast %cst_75 : f32 to vector<8x128xf32>
      %c0_76 = arith.constant 0 : index
      %c0_77 = arith.constant 0 : index
      %222 = vector.load %arg7[%c0_76, %c0_77] : memref<8x128xf32, #tpu.memory_space<vmem>>, vector<8x128xf32>
      tpu.vector_store %arg7[%c0_76, %c0_77], %221 {strides = array<i32>} : memref<8x128xf32, #tpu.memory_space<vmem>>, vector<8x128xf32>,
      %cst_78 = arith.constant 0.000000e+00 : f32
      %223 = vector.broadcast %cst_78 : f32 to vector<8x128xf32>
      %c0_79 = arith.constant 0 : index
      %c0_80 = arith.constant 0 : index
      %224 = vector.load %arg8[%c0_79, %c0_80] : memref<8x128xf32, #tpu.memory_space<vmem>>, vector<8x128xf32>
      tpu.vector_store %arg8[%c0_79, %c0_80], %223 {strides = array<i32>} : memref<8x128xf32, #tpu.memory_space<vmem>>, vector<8x128xf32>,
    } else {
    }
    %c0 = arith.constant 0 : index
    %c0_1 = arith.constant 0 : index
    %c0_2 = arith.constant 0 : index
    %3 = vector.load %arg2[%c0, %c0_1, %c0_2] : memref<8x8x16xf32, #tpu.memory_space<vmem>>, vector<8x8x16xf32>
    %4 = tpu.transpose %3, [1, 0, 2] : vector<8x8x16xf32> -> vector<8x8x16xf32>
    %5 = vector.shape_cast %4 : vector<8x8x16xf32> to vector<64x16xf32>
    %c0_3 = arith.constant 0 : index
    %c0_4 = arith.constant 0 : index
    %6 = vector.load %arg3[%c0_3, %c0_4] : memref<16x512xf32, #tpu.memory_space<vmem>>, vector<16x512xf32>
    %cst = arith.constant dense<0.000000e+00> : vector<64x512xf32>
    %7 = tpu.matmul %5, %6, %cst {dimension_numbers = #tpu.dot_dimension_numbers<[1], [0], [0], [1], [0, 0, 1, 1], [], []>} : vector<64x16xf32>, vector<16x512xf32>, vector<64x512xf32> -> vector<64x512xf32>
    %c0_5 = arith.constant 0 : index
    %c0_6 = arith.constant 0 : index
    %8 = vector.load %arg5[%c0_5, %c0_6] : memref<1x512xf32, #tpu.memory_space<vmem>>, vector<1x512xf32>
    %9 = vector.broadcast %8 : vector<1x512xf32> to vector<64x512xf32>
    %10 = arith.addf %7, %9 : vector<64x512xf32>
    %11 = vector.shape_cast %10 : vector<64x512xf32> to vector<8x8x512xf32>
    %c0_7 = arith.constant 0 : index
    %c0_8 = arith.constant 0 : index
    %c0_9 = arith.constant 0 : index
    %12 = vector.load %arg9[%c0_7, %c0_8, %c0_9] : memref<8x8x512xf32, #tpu.memory_space<vmem>>, vector<8x8x512xf32>
    tpu.vector_store %arg9[%c0_7, %c0_8, %c0_9], %11 {strides = array<i32>} : memref<8x8x512xf32, #tpu.memory_space<vmem>>, vector<8x8x512xf32>,
    %c0_10 = arith.constant 0 : index
    %c0_11 = arith.constant 0 : index
    %13 = vector.load %arg4[%c0_10, %c0_11] : memref<128x512xf32, #tpu.memory_space<vmem>>, vector<128x512xf32>
    %c0_12 = arith.constant 0 : index
    %c0_13 = arith.constant 0 : index
    %14 = vector.load %arg7[%c0_12, %c0_13] : memref<8x128xf32, #tpu.memory_space<vmem>>, vector<8x128xf32>
    %c0_14 = arith.constant 0 : index
    %c0_15 = arith.constant 0 : index
    %15 = vector.load %arg8[%c0_14, %c0_15] : memref<8x128xf32, #tpu.memory_space<vmem>>, vector<8x128xf32>
    %c0_i32_16 = arith.constant 0 : i32
    %16 = arith.index_cast %c0_i32_16 : i32 to index
    %c0_17 = arith.constant 0 : index
    %c0_18 = arith.constant 0 : index
    %17 = vector.load %arg9[%16, %c0_17, %c0_18] : memref<8x8x512xf32, #tpu.memory_space<vmem>>, vector<1x8x512xf32>
    %18 = vector.shape_cast %17 : vector<1x8x512xf32> to vector<8x512xf32>
    %cst_19 = arith.constant dense<0.000000e+00> : vector<8x512xf32>
    %19 = tpu.matmul %14, %13, %cst_19 {dimension_numbers = #tpu.dot_dimension_numbers<[1], [0], [0], [1], [0, 0, 1, 1], [], []>} : vector<8x128xf32>, vector<128x512xf32>, vector<8x512xf32> -> vector<8x512xf32>
    %20 = arith.addf %18, %19 : vector<8x512xf32>
    %21 = vector.extract_strided_slice %20 {offsets = [0, 0], sizes = [8, 384], strides = [1, 1]} : vector<8x512xf32> to vector<8x384xf32>
    %22 = arith.negf %21 : vector<8x384xf32>
    %23 = math.exp %22 : vector<8x384xf32>
    %cst_20 = arith.constant 1.000000e+00 : f32
    %24 = vector.broadcast %cst_20 : f32 to vector<8x384xf32>
    %25 = arith.addf %24, %23 : vector<8x384xf32>
    %26 = arith.divf %24, %25 : vector<8x384xf32>
    %27 = vector.extract_strided_slice %26 {offsets = [0, 0], sizes = [8, 128], strides = [1, 1]} : vector<8x384xf32> to vector<8x128xf32>
    %28 = vector.extract_strided_slice %26 {offsets = [0, 128], sizes = [8, 128], strides = [1, 1]} : vector<8x384xf32> to vector<8x128xf32>
    %29 = vector.extract_strided_slice %26 {offsets = [0, 256], sizes = [8, 128], strides = [1, 1]} : vector<8x384xf32> to vector<8x128xf32>
    %30 = vector.extract_strided_slice %20 {offsets = [0, 384], sizes = [8, 128], strides = [1, 1]} : vector<8x512xf32> to vector<8x128xf32>
    %31 = math.tanh %30 : vector<8x128xf32>
    %32 = arith.mulf %28, %29 : vector<8x128xf32>
    %33 = arith.mulf %27, %31 : vector<8x128xf32>
    %34 = arith.addf %32, %33 : vector<8x128xf32>
    %35 = math.tanh %34 : vector<8x128xf32>
    %36 = arith.mulf %29, %35 : vector<8x128xf32>
    %37 = arith.index_cast %c0_i32_16 : i32 to index
    %c0_21 = arith.constant 0 : index
    %c0_22 = arith.constant 0 : index
    %38 = vector.load %arg10[%37, %c0_21, %c0_22] : memref<8x8x128xf32, #tpu.memory_space<vmem>>, vector<1x8x128xf32>
    %39 = vector.shape_cast %38 : vector<1x8x128xf32> to vector<8x128xf32>
    %40 = vector.shape_cast %36 : vector<8x128xf32> to vector<1x8x128xf32>
    tpu.vector_store %arg10[%37, %c0_21, %c0_22], %40 {strides = array<i32>} : memref<8x8x128xf32, #tpu.memory_space<vmem>>, vector<1x8x128xf32>,
    %c1_i32 = arith.constant 1 : i32
    %41 = arith.index_cast %c1_i32 : i32 to index
    %c0_23 = arith.constant 0 : index
    %c0_24 = arith.constant 0 : index
    %42 = vector.load %arg9[%41, %c0_23, %c0_24] : memref<8x8x512xf32, #tpu.memory_space<vmem>>, vector<1x8x512xf32>
    %43 = vector.shape_cast %42 : vector<1x8x512xf32> to vector<8x512xf32>
    %cst_25 = arith.constant dense<0.000000e+00> : vector<8x512xf32>
    %44 = tpu.matmul %36, %13, %cst_25 {dimension_numbers = #tpu.dot_dimension_numbers<[1], [0], [0], [1], [0, 0, 1, 1], [], []>} : vector<8x128xf32>, vector<128x512xf32>, vector<8x512xf32> -> vector<8x512xf32>
    %45 = arith.addf %43, %44 : vector<8x512xf32>
    %46 = vector.extract_strided_slice %45 {offsets = [0, 0], sizes = [8, 384], strides = [1, 1]} : vector<8x512xf32> to vector<8x384xf32>
    %47 = arith.negf %46 : vector<8x384xf32>
    %48 = math.exp %47 : vector<8x384xf32>
    %cst_26 = arith.constant 1.000000e+00 : f32
    %49 = vector.broadcast %cst_26 : f32 to vector<8x384xf32>
    %50 = arith.addf %49, %48 : vector<8x384xf32>
    %51 = arith.divf %49, %50 : vector<8x384xf32>
    %52 = vector.extract_strided_slice %51 {offsets = [0, 0], sizes = [8, 128], strides = [1, 1]} : vector<8x384xf32> to vector<8x128xf32>
    %53 = vector.extract_strided_slice %51 {offsets = [0, 128], sizes = [8, 128], strides = [1, 1]} : vector<8x384xf32> to vector<8x128xf32>
    %54 = vector.extract_strided_slice %51 {offsets = [0, 256], sizes = [8, 128], strides = [1, 1]} : vector<8x384xf32> to vector<8x128xf32>
    %55 = vector.extract_strided_slice %45 {offsets = [0, 384], sizes = [8, 128], strides = [1, 1]} : vector<8x512xf32> to vector<8x128xf32>
    %56 = math.tanh %55 : vector<8x128xf32>
    %57 = arith.mulf %53, %54 : vector<8x128xf32>
    %58 = arith.mulf %52, %56 : vector<8x128xf32>
    %59 = arith.addf %57, %58 : vector<8x128xf32>
    %60 = math.tanh %59 : vector<8x128xf32>
    %61 = arith.mulf %54, %60 : vector<8x128xf32>
    %62 = arith.index_cast %c1_i32 : i32 to index
    %c0_27 = arith.constant 0 : index
    %c0_28 = arith.constant 0 : index
    %63 = vector.load %arg10[%62, %c0_27, %c0_28] : memref<8x8x128xf32, #tpu.memory_space<vmem>>, vector<1x8x128xf32>
    %64 = vector.shape_cast %63 : vector<1x8x128xf32> to vector<8x128xf32>
    %65 = vector.shape_cast %61 : vector<8x128xf32> to vector<1x8x128xf32>
    tpu.vector_store %arg10[%62, %c0_27, %c0_28], %65 {strides = array<i32>} : memref<8x8x128xf32, #tpu.memory_space<vmem>>, vector<1x8x128xf32>,
    %c2_i32 = arith.constant 2 : i32
    %66 = arith.index_cast %c2_i32 : i32 to index
    %c0_29 = arith.constant 0 : index
    %c0_30 = arith.constant 0 : index
    %67 = vector.load %arg9[%66, %c0_29, %c0_30] : memref<8x8x512xf32, #tpu.memory_space<vmem>>, vector<1x8x512xf32>
    %68 = vector.shape_cast %67 : vector<1x8x512xf32> to vector<8x512xf32>
    %cst_31 = arith.constant dense<0.000000e+00> : vector<8x512xf32>
    %69 = tpu.matmul %61, %13, %cst_31 {dimension_numbers = #tpu.dot_dimension_numbers<[1], [0], [0], [1], [0, 0, 1, 1], [], []>} : vector<8x128xf32>, vector<128x512xf32>, vector<8x512xf32> -> vector<8x512xf32>
    %70 = arith.addf %68, %69 : vector<8x512xf32>
    %71 = vector.extract_strided_slice %70 {offsets = [0, 0], sizes = [8, 384], strides = [1, 1]} : vector<8x512xf32> to vector<8x384xf32>
    %72 = arith.negf %71 : vector<8x384xf32>
    %73 = math.exp %72 : vector<8x384xf32>
    %cst_32 = arith.constant 1.000000e+00 : f32
    %74 = vector.broadcast %cst_32 : f32 to vector<8x384xf32>
    %75 = arith.addf %74, %73 : vector<8x384xf32>
    %76 = arith.divf %74, %75 : vector<8x384xf32>
    %77 = vector.extract_strided_slice %76 {offsets = [0, 0], sizes = [8, 128], strides = [1, 1]} : vector<8x384xf32> to vector<8x128xf32>
    %78 = vector.extract_strided_slice %76 {offsets = [0, 128], sizes = [8, 128], strides = [1, 1]} : vector<8x384xf32> to vector<8x128xf32>
    %79 = vector.extract_strided_slice %76 {offsets = [0, 256], sizes = [8, 128], strides = [1, 1]} : vector<8x384xf32> to vector<8x128xf32>
    %80 = vector.extract_strided_slice %70 {offsets = [0, 384], sizes = [8, 128], strides = [1, 1]} : vector<8x512xf32> to vector<8x128xf32>
    %81 = math.tanh %80 : vector<8x128xf32>
    %82 = arith.mulf %78, %79 : vector<8x128xf32>
    %83 = arith.mulf %77, %81 : vector<8x128xf32>
    %84 = arith.addf %82, %83 : vector<8x128xf32>
    %85 = math.tanh %84 : vector<8x128xf32>
    %86 = arith.mulf %79, %85 : vector<8x128xf32>
    %87 = arith.index_cast %c2_i32 : i32 to index
    %c0_33 = arith.constant 0 : index
    %c0_34 = arith.constant 0 : index
    %88 = vector.load %arg10[%87, %c0_33, %c0_34] : memref<8x8x128xf32, #tpu.memory_space<vmem>>, vector<1x8x128xf32>
    %89 = vector.shape_cast %88 : vector<1x8x128xf32> to vector<8x128xf32>
    %90 = vector.shape_cast %86 : vector<8x128xf32> to vector<1x8x128xf32>
    tpu.vector_store %arg10[%87, %c0_33, %c0_34], %90 {strides = array<i32>} : memref<8x8x128xf32, #tpu.memory_space<vmem>>, vector<1x8x128xf32>,
    %c3_i32 = arith.constant 3 : i32
    %91 = arith.index_cast %c3_i32 : i32 to index
    %c0_35 = arith.constant 0 : index
    %c0_36 = arith.constant 0 : index
    %92 = vector.load %arg9[%91, %c0_35, %c0_36] : memref<8x8x512xf32, #tpu.memory_space<vmem>>, vector<1x8x512xf32>
    %93 = vector.shape_cast %92 : vector<1x8x512xf32> to vector<8x512xf32>
    %cst_37 = arith.constant dense<0.000000e+00> : vector<8x512xf32>
    %94 = tpu.matmul %86, %13, %cst_37 {dimension_numbers = #tpu.dot_dimension_numbers<[1], [0], [0], [1], [0, 0, 1, 1], [], []>} : vector<8x128xf32>, vector<128x512xf32>, vector<8x512xf32> -> vector<8x512xf32>
    %95 = arith.addf %93, %94 : vector<8x512xf32>
    %96 = vector.extract_strided_slice %95 {offsets = [0, 0], sizes = [8, 384], strides = [1, 1]} : vector<8x512xf32> to vector<8x384xf32>
    %97 = arith.negf %96 : vector<8x384xf32>
    %98 = math.exp %97 : vector<8x384xf32>
    %cst_38 = arith.constant 1.000000e+00 : f32
    %99 = vector.broadcast %cst_38 : f32 to vector<8x384xf32>
    %100 = arith.addf %99, %98 : vector<8x384xf32>
    %101 = arith.divf %99, %100 : vector<8x384xf32>
    %102 = vector.extract_strided_slice %101 {offsets = [0, 0], sizes = [8, 128], strides = [1, 1]} : vector<8x384xf32> to vector<8x128xf32>
    %103 = vector.extract_strided_slice %101 {offsets = [0, 128], sizes = [8, 128], strides = [1, 1]} : vector<8x384xf32> to vector<8x128xf32>
    %104 = vector.extract_strided_slice %101 {offsets = [0, 256], sizes = [8, 128], strides = [1, 1]} : vector<8x384xf32> to vector<8x128xf32>
    %105 = vector.extract_strided_slice %95 {offsets = [0, 384], sizes = [8, 128], strides = [1, 1]} : vector<8x512xf32> to vector<8x128xf32>
    %106 = math.tanh %105 : vector<8x128xf32>
    %107 = arith.mulf %103, %104 : vector<8x128xf32>
    %108 = arith.mulf %102, %106 : vector<8x128xf32>
    %109 = arith.addf %107, %108 : vector<8x128xf32>
    %110 = math.tanh %109 : vector<8x128xf32>
    %111 = arith.mulf %104, %110 : vector<8x128xf32>
    %112 = arith.index_cast %c3_i32 : i32 to index
    %c0_39 = arith.constant 0 : index
    %c0_40 = arith.constant 0 : index
    %113 = vector.load %arg10[%112, %c0_39, %c0_40] : memref<8x8x128xf32, #tpu.memory_space<vmem>>, vector<1x8x128xf32>
    %114 = vector.shape_cast %113 : vector<1x8x128xf32> to vector<8x128xf32>
    %115 = vector.shape_cast %111 : vector<8x128xf32> to vector<1x8x128xf32>
    tpu.vector_store %arg10[%112, %c0_39, %c0_40], %115 {strides = array<i32>} : memref<8x8x128xf32, #tpu.memory_space<vmem>>, vector<1x8x128xf32>,
    %c4_i32 = arith.constant 4 : i32
    %116 = arith.index_cast %c4_i32 : i32 to index
    %c0_41 = arith.constant 0 : index
    %c0_42 = arith.constant 0 : index
    %117 = vector.load %arg9[%116, %c0_41, %c0_42] : memref<8x8x512xf32, #tpu.memory_space<vmem>>, vector<1x8x512xf32>
    %118 = vector.shape_cast %117 : vector<1x8x512xf32> to vector<8x512xf32>
    %cst_43 = arith.constant dense<0.000000e+00> : vector<8x512xf32>
    %119 = tpu.matmul %111, %13, %cst_43 {dimension_numbers = #tpu.dot_dimension_numbers<[1], [0], [0], [1], [0, 0, 1, 1], [], []>} : vector<8x128xf32>, vector<128x512xf32>, vector<8x512xf32> -> vector<8x512xf32>
    %120 = arith.addf %118, %119 : vector<8x512xf32>
    %121 = vector.extract_strided_slice %120 {offsets = [0, 0], sizes = [8, 384], strides = [1, 1]} : vector<8x512xf32> to vector<8x384xf32>
    %122 = arith.negf %121 : vector<8x384xf32>
    %123 = math.exp %122 : vector<8x384xf32>
    %cst_44 = arith.constant 1.000000e+00 : f32
    %124 = vector.broadcast %cst_44 : f32 to vector<8x384xf32>
    %125 = arith.addf %124, %123 : vector<8x384xf32>
    %126 = arith.divf %124, %125 : vector<8x384xf32>
    %127 = vector.extract_strided_slice %126 {offsets = [0, 0], sizes = [8, 128], strides = [1, 1]} : vector<8x384xf32> to vector<8x128xf32>
    %128 = vector.extract_strided_slice %126 {offsets = [0, 128], sizes = [8, 128], strides = [1, 1]} : vector<8x384xf32> to vector<8x128xf32>
    %129 = vector.extract_strided_slice %126 {offsets = [0, 256], sizes = [8, 128], strides = [1, 1]} : vector<8x384xf32> to vector<8x128xf32>
    %130 = vector.extract_strided_slice %120 {offsets = [0, 384], sizes = [8, 128], strides = [1, 1]} : vector<8x512xf32> to vector<8x128xf32>
    %131 = math.tanh %130 : vector<8x128xf32>
    %132 = arith.mulf %128, %129 : vector<8x128xf32>
    %133 = arith.mulf %127, %131 : vector<8x128xf32>
    %134 = arith.addf %132, %133 : vector<8x128xf32>
    %135 = math.tanh %134 : vector<8x128xf32>
    %136 = arith.mulf %129, %135 : vector<8x128xf32>
    %137 = arith.index_cast %c4_i32 : i32 to index
    %c0_45 = arith.constant 0 : index
    %c0_46 = arith.constant 0 : index
    %138 = vector.load %arg10[%137, %c0_45, %c0_46] : memref<8x8x128xf32, #tpu.memory_space<vmem>>, vector<1x8x128xf32>
    %139 = vector.shape_cast %138 : vector<1x8x128xf32> to vector<8x128xf32>
    %140 = vector.shape_cast %136 : vector<8x128xf32> to vector<1x8x128xf32>
    tpu.vector_store %arg10[%137, %c0_45, %c0_46], %140 {strides = array<i32>} : memref<8x8x128xf32, #tpu.memory_space<vmem>>, vector<1x8x128xf32>,
    %c5_i32 = arith.constant 5 : i32
    %141 = arith.index_cast %c5_i32 : i32 to index
    %c0_47 = arith.constant 0 : index
    %c0_48 = arith.constant 0 : index
    %142 = vector.load %arg9[%141, %c0_47, %c0_48] : memref<8x8x512xf32, #tpu.memory_space<vmem>>, vector<1x8x512xf32>
    %143 = vector.shape_cast %142 : vector<1x8x512xf32> to vector<8x512xf32>
    %cst_49 = arith.constant dense<0.000000e+00> : vector<8x512xf32>
    %144 = tpu.matmul %136, %13, %cst_49 {dimension_numbers = #tpu.dot_dimension_numbers<[1], [0], [0], [1], [0, 0, 1, 1], [], []>} : vector<8x128xf32>, vector<128x512xf32>, vector<8x512xf32> -> vector<8x512xf32>
    %145 = arith.addf %143, %144 : vector<8x512xf32>
    %146 = vector.extract_strided_slice %145 {offsets = [0, 0], sizes = [8, 384], strides = [1, 1]} : vector<8x512xf32> to vector<8x384xf32>
    %147 = arith.negf %146 : vector<8x384xf32>
    %148 = math.exp %147 : vector<8x384xf32>
    %cst_50 = arith.constant 1.000000e+00 : f32
    %149 = vector.broadcast %cst_50 : f32 to vector<8x384xf32>
    %150 = arith.addf %149, %148 : vector<8x384xf32>
    %151 = arith.divf %149, %150 : vector<8x384xf32>
    %152 = vector.extract_strided_slice %151 {offsets = [0, 0], sizes = [8, 128], strides = [1, 1]} : vector<8x384xf32> to vector<8x128xf32>
    %153 = vector.extract_strided_slice %151 {offsets = [0, 128], sizes = [8, 128], strides = [1, 1]} : vector<8x384xf32> to vector<8x128xf32>
    %154 = vector.extract_strided_slice %151 {offsets = [0, 256], sizes = [8, 128], strides = [1, 1]} : vector<8x384xf32> to vector<8x128xf32>
    %155 = vector.extract_strided_slice %145 {offsets = [0, 384], sizes = [8, 128], strides = [1, 1]} : vector<8x512xf32> to vector<8x128xf32>
    %156 = math.tanh %155 : vector<8x128xf32>
    %157 = arith.mulf %153, %154 : vector<8x128xf32>
    %158 = arith.mulf %152, %156 : vector<8x128xf32>
    %159 = arith.addf %157, %158 : vector<8x128xf32>
    %160 = math.tanh %159 : vector<8x128xf32>
    %161 = arith.mulf %154, %160 : vector<8x128xf32>
    %162 = arith.index_cast %c5_i32 : i32 to index
    %c0_51 = arith.constant 0 : index
    %c0_52 = arith.constant 0 : index
    %163 = vector.load %arg10[%162, %c0_51, %c0_52] : memref<8x8x128xf32, #tpu.memory_space<vmem>>, vector<1x8x128xf32>
    %164 = vector.shape_cast %163 : vector<1x8x128xf32> to vector<8x128xf32>
    %165 = vector.shape_cast %161 : vector<8x128xf32> to vector<1x8x128xf32>
    tpu.vector_store %arg10[%162, %c0_51, %c0_52], %165 {strides = array<i32>} : memref<8x8x128xf32, #tpu.memory_space<vmem>>, vector<1x8x128xf32>,
    %c6_i32 = arith.constant 6 : i32
    %166 = arith.index_cast %c6_i32 : i32 to index
    %c0_53 = arith.constant 0 : index
    %c0_54 = arith.constant 0 : index
    %167 = vector.load %arg9[%166, %c0_53, %c0_54] : memref<8x8x512xf32, #tpu.memory_space<vmem>>, vector<1x8x512xf32>
    %168 = vector.shape_cast %167 : vector<1x8x512xf32> to vector<8x512xf32>
    %cst_55 = arith.constant dense<0.000000e+00> : vector<8x512xf32>
    %169 = tpu.matmul %161, %13, %cst_55 {dimension_numbers = #tpu.dot_dimension_numbers<[1], [0], [0], [1], [0, 0, 1, 1], [], []>} : vector<8x128xf32>, vector<128x512xf32>, vector<8x512xf32> -> vector<8x512xf32>
    %170 = arith.addf %168, %169 : vector<8x512xf32>
    %171 = vector.extract_strided_slice %170 {offsets = [0, 0], sizes = [8, 384], strides = [1, 1]} : vector<8x512xf32> to vector<8x384xf32>
    %172 = arith.negf %171 : vector<8x384xf32>
    %173 = math.exp %172 : vector<8x384xf32>
    %cst_56 = arith.constant 1.000000e+00 : f32
    %174 = vector.broadcast %cst_56 : f32 to vector<8x384xf32>
    %175 = arith.addf %174, %173 : vector<8x384xf32>
    %176 = arith.divf %174, %175 : vector<8x384xf32>
    %177 = vector.extract_strided_slice %176 {offsets = [0, 0], sizes = [8, 128], strides = [1, 1]} : vector<8x384xf32> to vector<8x128xf32>
    %178 = vector.extract_strided_slice %176 {offsets = [0, 128], sizes = [8, 128], strides = [1, 1]} : vector<8x384xf32> to vector<8x128xf32>
    %179 = vector.extract_strided_slice %176 {offsets = [0, 256], sizes = [8, 128], strides = [1, 1]} : vector<8x384xf32> to vector<8x128xf32>
    %180 = vector.extract_strided_slice %170 {offsets = [0, 384], sizes = [8, 128], strides = [1, 1]} : vector<8x512xf32> to vector<8x128xf32>
    %181 = math.tanh %180 : vector<8x128xf32>
    %182 = arith.mulf %178, %179 : vector<8x128xf32>
    %183 = arith.mulf %177, %181 : vector<8x128xf32>
    %184 = arith.addf %182, %183 : vector<8x128xf32>
    %185 = math.tanh %184 : vector<8x128xf32>
    %186 = arith.mulf %179, %185 : vector<8x128xf32>
    %187 = arith.index_cast %c6_i32 : i32 to index
    %c0_57 = arith.constant 0 : index
    %c0_58 = arith.constant 0 : index
    %188 = vector.load %arg10[%187, %c0_57, %c0_58] : memref<8x8x128xf32, #tpu.memory_space<vmem>>, vector<1x8x128xf32>
    %189 = vector.shape_cast %188 : vector<1x8x128xf32> to vector<8x128xf32>
    %190 = vector.shape_cast %186 : vector<8x128xf32> to vector<1x8x128xf32>
    tpu.vector_store %arg10[%187, %c0_57, %c0_58], %190 {strides = array<i32>} : memref<8x8x128xf32, #tpu.memory_space<vmem>>, vector<1x8x128xf32>,
    %c7_i32 = arith.constant 7 : i32
    %191 = arith.index_cast %c7_i32 : i32 to index
    %c0_59 = arith.constant 0 : index
    %c0_60 = arith.constant 0 : index
    %192 = vector.load %arg9[%191, %c0_59, %c0_60] : memref<8x8x512xf32, #tpu.memory_space<vmem>>, vector<1x8x512xf32>
    %193 = vector.shape_cast %192 : vector<1x8x512xf32> to vector<8x512xf32>
    %cst_61 = arith.constant dense<0.000000e+00> : vector<8x512xf32>
    %194 = tpu.matmul %186, %13, %cst_61 {dimension_numbers = #tpu.dot_dimension_numbers<[1], [0], [0], [1], [0, 0, 1, 1], [], []>} : vector<8x128xf32>, vector<128x512xf32>, vector<8x512xf32> -> vector<8x512xf32>
    %195 = arith.addf %193, %194 : vector<8x512xf32>
    %196 = vector.extract_strided_slice %195 {offsets = [0, 0], sizes = [8, 384], strides = [1, 1]} : vector<8x512xf32> to vector<8x384xf32>
    %197 = arith.negf %196 : vector<8x384xf32>
    %198 = math.exp %197 : vector<8x384xf32>
    %cst_62 = arith.constant 1.000000e+00 : f32
    %199 = vector.broadcast %cst_62 : f32 to vector<8x384xf32>
    %200 = arith.addf %199, %198 : vector<8x384xf32>
    %201 = arith.divf %199, %200 : vector<8x384xf32>
    %202 = vector.extract_strided_slice %201 {offsets = [0, 0], sizes = [8, 128], strides = [1, 1]} : vector<8x384xf32> to vector<8x128xf32>
    %203 = vector.extract_strided_slice %201 {offsets = [0, 128], sizes = [8, 128], strides = [1, 1]} : vector<8x384xf32> to vector<8x128xf32>
    %204 = vector.extract_strided_slice %201 {offsets = [0, 256], sizes = [8, 128], strides = [1, 1]} : vector<8x384xf32> to vector<8x128xf32>
    %205 = vector.extract_strided_slice %195 {offsets = [0, 384], sizes = [8, 128], strides = [1, 1]} : vector<8x512xf32> to vector<8x128xf32>
    %206 = math.tanh %205 : vector<8x128xf32>
    %207 = arith.mulf %203, %204 : vector<8x128xf32>
    %208 = arith.mulf %202, %206 : vector<8x128xf32>
    %209 = arith.addf %207, %208 : vector<8x128xf32>
    %210 = math.tanh %209 : vector<8x128xf32>
    %211 = arith.mulf %204, %210 : vector<8x128xf32>
    %212 = arith.index_cast %c7_i32 : i32 to index
    %c0_63 = arith.constant 0 : index
    %c0_64 = arith.constant 0 : index
    %213 = vector.load %arg10[%212, %c0_63, %c0_64] : memref<8x8x128xf32, #tpu.memory_space<vmem>>, vector<1x8x128xf32>
    %214 = vector.shape_cast %213 : vector<1x8x128xf32> to vector<8x128xf32>
    %215 = vector.shape_cast %211 : vector<8x128xf32> to vector<1x8x128xf32>
    tpu.vector_store %arg10[%212, %c0_63, %c0_64], %215 {strides = array<i32>} : memref<8x8x128xf32, #tpu.memory_space<vmem>>, vector<1x8x128xf32>,
    %c8_i32 = arith.constant 8 : i32
    %c0_65 = arith.constant 0 : index
    %c0_66 = arith.constant 0 : index
    %216 = vector.load %arg7[%c0_65, %c0_66] : memref<8x128xf32, #tpu.memory_space<vmem>>, vector<8x128xf32>
    tpu.vector_store %arg7[%c0_65, %c0_66], %211 {strides = array<i32>} : memref<8x128xf32, #tpu.memory_space<vmem>>, vector<8x128xf32>,
    %c0_67 = arith.constant 0 : index
    %c0_68 = arith.constant 0 : index
    %217 = vector.load %arg8[%c0_67, %c0_68] : memref<8x128xf32, #tpu.memory_space<vmem>>, vector<8x128xf32>
    tpu.vector_store %arg8[%c0_67, %c0_68], %209 {strides = array<i32>} : memref<8x128xf32, #tpu.memory_space<vmem>>, vector<8x128xf32>,
    %c0_69 = arith.constant 0 : index
    %c0_70 = arith.constant 0 : index
    %c0_71 = arith.constant 0 : index
    %218 = vector.load %arg10[%c0_69, %c0_70, %c0_71] : memref<8x8x128xf32, #tpu.memory_space<vmem>>, vector<8x8x128xf32>
    %219 = tpu.transpose %218, [1, 0, 2] : vector<8x8x128xf32> -> vector<8x8x128xf32>
    %c0_72 = arith.constant 0 : index
    %c0_73 = arith.constant 0 : index
    %c0_74 = arith.constant 0 : index
    %220 = vector.load %arg6[%c0_72, %c0_73, %c0_74] : memref<8x8x128xf32, #tpu.memory_space<vmem>>, vector<8x8x128xf32>
    tpu.vector_store %arg6[%c0_72, %c0_73, %c0_74], %219 {strides = array<i32>} : memref<8x8x128xf32, #tpu.memory_space<vmem>>, vector<8x8x128xf32>,
    return
  }
  func.func @transform_0(%arg0: i32, %arg1: i32) -> (i32, i32, i32) {
    %c0_i32 = arith.constant 0 : i32
    %c0_i32_0 = arith.constant 0 : i32
    return %arg0, %arg1, %c0_i32 : i32, i32, i32
  }
  func.func @transform_1(%arg0: i32, %arg1: i32) -> (i32, i32) {
    %c0_i32 = arith.constant 0 : i32
    %c0_i32_0 = arith.constant 0 : i32
    %c0_i32_1 = arith.constant 0 : i32
    return %c0_i32, %c0_i32_0 : i32, i32
  }
  func.func @transform_2(%arg0: i32, %arg1: i32) -> (i32, i32) {
    %c0_i32 = arith.constant 0 : i32
    %c0_i32_0 = arith.constant 0 : i32
    %c0_i32_1 = arith.constant 0 : i32
    return %c0_i32, %c0_i32_0 : i32, i32
  }
  func.func @transform_3(%arg0: i32, %arg1: i32) -> (i32, i32) {
    %c0_i32 = arith.constant 0 : i32
    %c0_i32_0 = arith.constant 0 : i32
    %c0_i32_1 = arith.constant 0 : i32
    return %c0_i32, %c0_i32_0 : i32, i32
  }
  func.func @transform_4(%arg0: i32, %arg1: i32) -> (i32, i32, i32) {
    %c0_i32 = arith.constant 0 : i32
    %c0_i32_0 = arith.constant 0 : i32
    return %arg0, %arg1, %c0_i32 : i32, i32, i32
  }
  func.func @transform_5(%arg0: i32, %arg1: i32) -> (i32, i32) {
    %c0_i32 = arith.constant 0 : i32
    %c0_i32_0 = arith.constant 0 : i32
    return %arg0, %c0_i32 : i32, i32
  }
  func.func @transform_6(%arg0: i32, %arg1: i32) -> (i32, i32) {
    %c0_i32 = arith.constant 0 : i32
    %c0_i32_0 = arith.constant 0 : i32
    return %arg0, %c0_i32 : i32, i32
  }
}

module attributes {stable_mosaic.version = 11 : i64} {
  func.func @kernel(%arg0: i32, %arg1: i32, %arg2: memref<8x8x16xf32, #tpu.memory_space<vmem>>, %arg3: memref<16x512xf32, #tpu.memory_space<vmem>>, %arg4: memref<128x512xf32, #tpu.memory_space<vmem>>, %arg5: memref<1x512xf32, #tpu.memory_space<vmem>>, %arg6: memref<8x8x128xf32, #tpu.memory_space<vmem>>, %arg7: memref<8x128xf32, #tpu.memory_space<vmem>>, %arg8: memref<8x128xf32, #tpu.memory_space<vmem>>, %arg9: memref<8x8x512xf32, #tpu.memory_space<vmem>>, %arg10: memref<8x8x128xf32, #tpu.memory_space<vmem>>) attributes {dimension_semantics = [#tpu.dimension_semantics<parallel>, #tpu.dimension_semantics<arbitrary>], iteration_bounds = array<i64: 1, 1>, scalar_prefetch = 0 : i64, scratch_operands = 2 : i64, tpu.core_type = #tpu.core_type<tc>, window_params = [{transform_indices = @transform_0, window_bounds = array<i64: 8, 8, 16>}, {pipeline_mode = #tpu.pipeline_mode<synchronous>, transform_indices = @transform_1, window_bounds = array<i64: 16, 512>}, {pipeline_mode = #tpu.pipeline_mode<synchronous>, transform_indices = @transform_2, window_bounds = array<i64: 128, 512>}, {pipeline_mode = #tpu.pipeline_mode<synchronous>, transform_indices = @transform_3, window_bounds = array<i64: 1, 512>}, {transform_indices = @transform_4, window_bounds = array<i64: 8, 8, 128>}, {transform_indices = @transform_5, window_bounds = array<i64: 8, 128>}, {transform_indices = @transform_6, window_bounds = array<i64: 8, 128>}]} {
    %c0_i32 = arith.constant 0 : i32
    %0 = arith.cmpi eq, %arg1, %c0_i32 : i32
    %1 = arith.extui %0 : i1 to i32
    %c0_i32_0 = arith.constant 0 : i32
    %2 = arith.cmpi ne, %1, %c0_i32_0 : i32
    scf.if %2 {
      %cst_75 = arith.constant 0.000000e+00 : f32
      %221 = vector.broadcast %cst_75 : f32 to vector<8x128xf32>
      %c0_76 = arith.constant 0 : index
      %c0_77 = arith.constant 0 : index
      %222 = vector.load %arg7[%c0_76, %c0_77] : memref<8x128xf32, #tpu.memory_space<vmem>>, vector<8x128xf32>
      tpu.vector_store %arg7[%c0_76, %c0_77], %221 {strides = array<i32>} : memref<8x128xf32, #tpu.memory_space<vmem>>, vector<8x128xf32>,
      %cst_78 = arith.constant 0.000000e+00 : f32
      %223 = vector.broadcast %cst_78 : f32 to vector<8x128xf32>
      %c0_79 = arith.constant 0 : index
      %c0_80 = arith.constant 0 : index
      %224 = vector.load %arg8[%c0_79, %c0_80] : memref<8x128xf32, #tpu.memory_space<vmem>>, vector<8x128xf32>
      tpu.vector_store %arg8[%c0_79, %c0_80], %223 {strides = array<i32>} : memref<8x128xf32, #tpu.memory_space<vmem>>, vector<8x128xf32>,
    } else {
    }
    %c0 = arith.constant 0 : index
    %c0_1 = arith.constant 0 : index
    %c0_2 = arith.constant 0 : index
    %3 = vector.load %arg2[%c0, %c0_1, %c0_2] : memref<8x8x16xf32, #tpu.memory_space<vmem>>, vector<8x8x16xf32>
    %4 = tpu.transpose %3, [1, 0, 2] : vector<8x8x16xf32> -> vector<8x8x16xf32>
    %5 = vector.shape_cast %4 : vector<8x8x16xf32> to vector<64x16xf32>
    %c0_3 = arith.constant 0 : index
    %c0_4 = arith.constant 0 : index
    %6 = vector.load %arg3[%c0_3, %c0_4] : memref<16x512xf32, #tpu.memory_space<vmem>>, vector<16x512xf32>
    %cst = arith.constant dense<0.000000e+00> : vector<64x512xf32>
    %7 = tpu.matmul %5, %6, %cst {dimension_numbers = #tpu.dot_dimension_numbers<[1], [0], [0], [1], [0, 0, 1, 1], [], []>} : vector<64x16xf32>, vector<16x512xf32>, vector<64x512xf32> -> vector<64x512xf32>
    %c0_5 = arith.constant 0 : index
    %c0_6 = arith.constant 0 : index
    %8 = vector.load %arg5[%c0_5, %c0_6] : memref<1x512xf32, #tpu.memory_space<vmem>>, vector<1x512xf32>
    %9 = vector.broadcast %8 : vector<1x512xf32> to vector<64x512xf32>
    %10 = arith.addf %7, %9 : vector<64x512xf32>
    %11 = vector.shape_cast %10 : vector<64x512xf32> to vector<8x8x512xf32>
    %c0_7 = arith.constant 0 : index
    %c0_8 = arith.constant 0 : index
    %c0_9 = arith.constant 0 : index
    %12 = vector.load %arg9[%c0_7, %c0_8, %c0_9] : memref<8x8x512xf32, #tpu.memory_space<vmem>>, vector<8x8x512xf32>
    tpu.vector_store %arg9[%c0_7, %c0_8, %c0_9], %11 {strides = array<i32>} : memref<8x8x512xf32, #tpu.memory_space<vmem>>, vector<8x8x512xf32>,
    %c0_10 = arith.constant 0 : index
    %c0_11 = arith.constant 0 : index
    %13 = vector.load %arg4[%c0_10, %c0_11] : memref<128x512xf32, #tpu.memory_space<vmem>>, vector<128x512xf32>
    %c0_12 = arith.constant 0 : index
    %c0_13 = arith.constant 0 : index
    %14 = vector.load %arg7[%c0_12, %c0_13] : memref<8x128xf32, #tpu.memory_space<vmem>>, vector<8x128xf32>
    %c0_14 = arith.constant 0 : index
    %c0_15 = arith.constant 0 : index
    %15 = vector.load %arg8[%c0_14, %c0_15] : memref<8x128xf32, #tpu.memory_space<vmem>>, vector<8x128xf32>
    %c0_i32_16 = arith.constant 0 : i32
    %16 = arith.index_cast %c0_i32_16 : i32 to index
    %c0_17 = arith.constant 0 : index
    %c0_18 = arith.constant 0 : index
    %17 = vector.load %arg9[%16, %c0_17, %c0_18] : memref<8x8x512xf32, #tpu.memory_space<vmem>>, vector<1x8x512xf32>
    %18 = vector.shape_cast %17 : vector<1x8x512xf32> to vector<8x512xf32>
    %cst_19 = arith.constant dense<0.000000e+00> : vector<8x512xf32>
    %19 = tpu.matmul %14, %13, %cst_19 {dimension_numbers = #tpu.dot_dimension_numbers<[1], [0], [0], [1], [0, 0, 1, 1], [], []>} : vector<8x128xf32>, vector<128x512xf32>, vector<8x512xf32> -> vector<8x512xf32>
    %20 = arith.addf %18, %19 : vector<8x512xf32>
    %21 = vector.extract_strided_slice %20 {offsets = [0, 0], sizes = [8, 384], strides = [1, 1]} : vector<8x512xf32> to vector<8x384xf32>
    %22 = arith.negf %21 : vector<8x384xf32>
    %23 = math.exp %22 : vector<8x384xf32>
    %cst_20 = arith.constant 1.000000e+00 : f32
    %24 = vector.broadcast %cst_20 : f32 to vector<8x384xf32>
    %25 = arith.addf %24, %23 : vector<8x384xf32>
    %26 = arith.divf %24, %25 : vector<8x384xf32>
    %27 = vector.extract_strided_slice %26 {offsets = [0, 0], sizes = [8, 128], strides = [1, 1]} : vector<8x384xf32> to vector<8x128xf32>
    %28 = vector.extract_strided_slice %26 {offsets = [0, 128], sizes = [8, 128], strides = [1, 1]} : vector<8x384xf32> to vector<8x128xf32>
    %29 = vector.extract_strided_slice %26 {offsets = [0, 256], sizes = [8, 128], strides = [1, 1]} : vector<8x384xf32> to vector<8x128xf32>
    %30 = vector.extract_strided_slice %20 {offsets = [0, 384], sizes = [8, 128], strides = [1, 1]} : vector<8x512xf32> to vector<8x128xf32>
    %31 = math.tanh %30 : vector<8x128xf32>
    %32 = arith.mulf %28, %29 : vector<8x128xf32>
    %33 = arith.mulf %27, %31 : vector<8x128xf32>
    %34 = arith.addf %32, %33 : vector<8x128xf32>
    %35 = math.tanh %34 : vector<8x128xf32>
    %36 = arith.mulf %29, %35 : vector<8x128xf32>
    %37 = arith.index_cast %c0_i32_16 : i32 to index
    %c0_21 = arith.constant 0 : index
    %c0_22 = arith.constant 0 : index
    %38 = vector.load %arg10[%37, %c0_21, %c0_22] : memref<8x8x128xf32, #tpu.memory_space<vmem>>, vector<1x8x128xf32>
    %39 = vector.shape_cast %38 : vector<1x8x128xf32> to vector<8x128xf32>
    %40 = vector.shape_cast %36 : vector<8x128xf32> to vector<1x8x128xf32>
    tpu.vector_store %arg10[%37, %c0_21, %c0_22], %40 {strides = array<i32>} : memref<8x8x128xf32, #tpu.memory_space<vmem>>, vector<1x8x128xf32>,
    %c1_i32 = arith.constant 1 : i32
    %41 = arith.index_cast %c1_i32 : i32 to index
    %c0_23 = arith.constant 0 : index
    %c0_24 = arith.constant 0 : index
    %42 = vector.load %arg9[%41, %c0_23, %c0_24] : memref<8x8x512xf32, #tpu.memory_space<vmem>>, vector<1x8x512xf32>
    %43 = vector.shape_cast %42 : vector<1x8x512xf32> to vector<8x512xf32>
    %cst_25 = arith.constant dense<0.000000e+00> : vector<8x512xf32>
    %44 = tpu.matmul %36, %13, %cst_25 {dimension_numbers = #tpu.dot_dimension_numbers<[1], [0], [0], [1], [0, 0, 1, 1], [], []>} : vector<8x128xf32>, vector<128x512xf32>, vector<8x512xf32> -> vector<8x512xf32>
    %45 = arith.addf %43, %44 : vector<8x512xf32>
    %46 = vector.extract_strided_slice %45 {offsets = [0, 0], sizes = [8, 384], strides = [1, 1]} : vector<8x512xf32> to vector<8x384xf32>
    %47 = arith.negf %46 : vector<8x384xf32>
    %48 = math.exp %47 : vector<8x384xf32>
    %cst_26 = arith.constant 1.000000e+00 : f32
    %49 = vector.broadcast %cst_26 : f32 to vector<8x384xf32>
    %50 = arith.addf %49, %48 : vector<8x384xf32>
    %51 = arith.divf %49, %50 : vector<8x384xf32>
    %52 = vector.extract_strided_slice %51 {offsets = [0, 0], sizes = [8, 128], strides = [1, 1]} : vector<8x384xf32> to vector<8x128xf32>
    %53 = vector.extract_strided_slice %51 {offsets = [0, 128], sizes = [8, 128], strides = [1, 1]} : vector<8x384xf32> to vector<8x128xf32>
    %54 = vector.extract_strided_slice %51 {offsets = [0, 256], sizes = [8, 128], strides = [1, 1]} : vector<8x384xf32> to vector<8x128xf32>
    %55 = vector.extract_strided_slice %45 {offsets = [0, 384], sizes = [8, 128], strides = [1, 1]} : vector<8x512xf32> to vector<8x128xf32>
    %56 = math.tanh %55 : vector<8x128xf32>
    %57 = arith.mulf %53, %54 : vector<8x128xf32>
    %58 = arith.mulf %52, %56 : vector<8x128xf32>
    %59 = arith.addf %57, %58 : vector<8x128xf32>
    %60 = math.tanh %59 : vector<8x128xf32>
    %61 = arith.mulf %54, %60 : vector<8x128xf32>
    %62 = arith.index_cast %c1_i32 : i32 to index
    %c0_27 = arith.constant 0 : index
    %c0_28 = arith.constant 0 : index
    %63 = vector.load %arg10[%62, %c0_27, %c0_28] : memref<8x8x128xf32, #tpu.memory_space<vmem>>, vector<1x8x128xf32>
    %64 = vector.shape_cast %63 : vector<1x8x128xf32> to vector<8x128xf32>
    %65 = vector.shape_cast %61 : vector<8x128xf32> to vector<1x8x128xf32>
    tpu.vector_store %arg10[%62, %c0_27, %c0_28], %65 {strides = array<i32>} : memref<8x8x128xf32, #tpu.memory_space<vmem>>, vector<1x8x128xf32>,
    %c2_i32 = arith.constant 2 : i32
    %66 = arith.index_cast %c2_i32 : i32 to index
    %c0_29 = arith.constant 0 : index
    %c0_30 = arith.constant 0 : index
    %67 = vector.load %arg9[%66, %c0_29, %c0_30] : memref<8x8x512xf32, #tpu.memory_space<vmem>>, vector<1x8x512xf32>
    %68 = vector.shape_cast %67 : vector<1x8x512xf32> to vector<8x512xf32>
    %cst_31 = arith.constant dense<0.000000e+00> : vector<8x512xf32>
    %69 = tpu.matmul %61, %13, %cst_31 {dimension_numbers = #tpu.dot_dimension_numbers<[1], [0], [0], [1], [0, 0, 1, 1], [], []>} : vector<8x128xf32>, vector<128x512xf32>, vector<8x512xf32> -> vector<8x512xf32>
    %70 = arith.addf %68, %69 : vector<8x512xf32>
    %71 = vector.extract_strided_slice %70 {offsets = [0, 0], sizes = [8, 384], strides = [1, 1]} : vector<8x512xf32> to vector<8x384xf32>
    %72 = arith.negf %71 : vector<8x384xf32>
    %73 = math.exp %72 : vector<8x384xf32>
    %cst_32 = arith.constant 1.000000e+00 : f32
    %74 = vector.broadcast %cst_32 : f32 to vector<8x384xf32>
    %75 = arith.addf %74, %73 : vector<8x384xf32>
    %76 = arith.divf %74, %75 : vector<8x384xf32>
    %77 = vector.extract_strided_slice %76 {offsets = [0, 0], sizes = [8, 128], strides = [1, 1]} : vector<8x384xf32> to vector<8x128xf32>
    %78 = vector.extract_strided_slice %76 {offsets = [0, 128], sizes = [8, 128], strides = [1, 1]} : vector<8x384xf32> to vector<8x128xf32>
    %79 = vector.extract_strided_slice %76 {offsets = [0, 256], sizes = [8, 128], strides = [1, 1]} : vector<8x384xf32> to vector<8x128xf32>
    %80 = vector.extract_strided_slice %70 {offsets = [0, 384], sizes = [8, 128], strides = [1, 1]} : vector<8x512xf32> to vector<8x128xf32>
    %81 = math.tanh %80 : vector<8x128xf32>
    %82 = arith.mulf %78, %79 : vector<8x128xf32>
    %83 = arith.mulf %77, %81 : vector<8x128xf32>
    %84 = arith.addf %82, %83 : vector<8x128xf32>
    %85 = math.tanh %84 : vector<8x128xf32>
    %86 = arith.mulf %79, %85 : vector<8x128xf32>
    %87 = arith.index_cast %c2_i32 : i32 to index
    %c0_33 = arith.constant 0 : index
    %c0_34 = arith.constant 0 : index
    %88 = vector.load %arg10[%87, %c0_33, %c0_34] : memref<8x8x128xf32, #tpu.memory_space<vmem>>, vector<1x8x128xf32>
    %89 = vector.shape_cast %88 : vector<1x8x128xf32> to vector<8x128xf32>
    %90 = vector.shape_cast %86 : vector<8x128xf32> to vector<1x8x128xf32>
    tpu.vector_store %arg10[%87, %c0_33, %c0_34], %90 {strides = array<i32>} : memref<8x8x128xf32, #tpu.memory_space<vmem>>, vector<1x8x128xf32>,
    %c3_i32 = arith.constant 3 : i32
    %91 = arith.index_cast %c3_i32 : i32 to index
    %c0_35 = arith.constant 0 : index
    %c0_36 = arith.constant 0 : index
    %92 = vector.load %arg9[%91, %c0_35, %c0_36] : memref<8x8x512xf32, #tpu.memory_space<vmem>>, vector<1x8x512xf32>
    %93 = vector.shape_cast %92 : vector<1x8x512xf32> to vector<8x512xf32>
    %cst_37 = arith.constant dense<0.000000e+00> : vector<8x512xf32>
    %94 = tpu.matmul %86, %13, %cst_37 {dimension_numbers = #tpu.dot_dimension_numbers<[1], [0], [0], [1], [0, 0, 1, 1], [], []>} : vector<8x128xf32>, vector<128x512xf32>, vector<8x512xf32> -> vector<8x512xf32>
    %95 = arith.addf %93, %94 : vector<8x512xf32>
    %96 = vector.extract_strided_slice %95 {offsets = [0, 0], sizes = [8, 384], strides = [1, 1]} : vector<8x512xf32> to vector<8x384xf32>
    %97 = arith.negf %96 : vector<8x384xf32>
    %98 = math.exp %97 : vector<8x384xf32>
    %cst_38 = arith.constant 1.000000e+00 : f32
    %99 = vector.broadcast %cst_38 : f32 to vector<8x384xf32>
    %100 = arith.addf %99, %98 : vector<8x384xf32>
    %101 = arith.divf %99, %100 : vector<8x384xf32>
    %102 = vector.extract_strided_slice %101 {offsets = [0, 0], sizes = [8, 128], strides = [1, 1]} : vector<8x384xf32> to vector<8x128xf32>
    %103 = vector.extract_strided_slice %101 {offsets = [0, 128], sizes = [8, 128], strides = [1, 1]} : vector<8x384xf32> to vector<8x128xf32>
    %104 = vector.extract_strided_slice %101 {offsets = [0, 256], sizes = [8, 128], strides = [1, 1]} : vector<8x384xf32> to vector<8x128xf32>
    %105 = vector.extract_strided_slice %95 {offsets = [0, 384], sizes = [8, 128], strides = [1, 1]} : vector<8x512xf32> to vector<8x128xf32>
    %106 = math.tanh %105 : vector<8x128xf32>
    %107 = arith.mulf %103, %104 : vector<8x128xf32>
    %108 = arith.mulf %102, %106 : vector<8x128xf32>
    %109 = arith.addf %107, %108 : vector<8x128xf32>
    %110 = math.tanh %109 : vector<8x128xf32>
    %111 = arith.mulf %104, %110 : vector<8x128xf32>
    %112 = arith.index_cast %c3_i32 : i32 to index
    %c0_39 = arith.constant 0 : index
    %c0_40 = arith.constant 0 : index
    %113 = vector.load %arg10[%112, %c0_39, %c0_40] : memref<8x8x128xf32, #tpu.memory_space<vmem>>, vector<1x8x128xf32>
    %114 = vector.shape_cast %113 : vector<1x8x128xf32> to vector<8x128xf32>
    %115 = vector.shape_cast %111 : vector<8x128xf32> to vector<1x8x128xf32>
    tpu.vector_store %arg10[%112, %c0_39, %c0_40], %115 {strides = array<i32>} : memref<8x8x128xf32, #tpu.memory_space<vmem>>, vector<1x8x128xf32>,
    %c4_i32 = arith.constant 4 : i32
    %116 = arith.index_cast %c4_i32 : i32 to index
    %c0_41 = arith.constant 0 : index
    %c0_42 = arith.constant 0 : index
    %117 = vector.load %arg9[%116, %c0_41, %c0_42] : memref<8x8x512xf32, #tpu.memory_space<vmem>>, vector<1x8x512xf32>
    %118 = vector.shape_cast %117 : vector<1x8x512xf32> to vector<8x512xf32>
    %cst_43 = arith.constant dense<0.000000e+00> : vector<8x512xf32>
    %119 = tpu.matmul %111, %13, %cst_43 {dimension_numbers = #tpu.dot_dimension_numbers<[1], [0], [0], [1], [0, 0, 1, 1], [], []>} : vector<8x128xf32>, vector<128x512xf32>, vector<8x512xf32> -> vector<8x512xf32>
    %120 = arith.addf %118, %119 : vector<8x512xf32>
    %121 = vector.extract_strided_slice %120 {offsets = [0, 0], sizes = [8, 384], strides = [1, 1]} : vector<8x512xf32> to vector<8x384xf32>
    %122 = arith.negf %121 : vector<8x384xf32>
    %123 = math.exp %122 : vector<8x384xf32>
    %cst_44 = arith.constant 1.000000e+00 : f32
    %124 = vector.broadcast %cst_44 : f32 to vector<8x384xf32>
    %125 = arith.addf %124, %123 : vector<8x384xf32>
    %126 = arith.divf %124, %125 : vector<8x384xf32>
    %127 = vector.extract_strided_slice %126 {offsets = [0, 0], sizes = [8, 128], strides = [1, 1]} : vector<8x384xf32> to vector<8x128xf32>
    %128 = vector.extract_strided_slice %126 {offsets = [0, 128], sizes = [8, 128], strides = [1, 1]} : vector<8x384xf32> to vector<8x128xf32>
    %129 = vector.extract_strided_slice %126 {offsets = [0, 256], sizes = [8, 128], strides = [1, 1]} : vector<8x384xf32> to vector<8x128xf32>
    %130 = vector.extract_strided_slice %120 {offsets = [0, 384], sizes = [8, 128], strides = [1, 1]} : vector<8x512xf32> to vector<8x128xf32>
    %131 = math.tanh %130 : vector<8x128xf32>
    %132 = arith.mulf %128, %129 : vector<8x128xf32>
    %133 = arith.mulf %127, %131 : vector<8x128xf32>
    %134 = arith.addf %132, %133 : vector<8x128xf32>
    %135 = math.tanh %134 : vector<8x128xf32>
    %136 = arith.mulf %129, %135 : vector<8x128xf32>
    %137 = arith.index_cast %c4_i32 : i32 to index
    %c0_45 = arith.constant 0 : index
    %c0_46 = arith.constant 0 : index
    %138 = vector.load %arg10[%137, %c0_45, %c0_46] : memref<8x8x128xf32, #tpu.memory_space<vmem>>, vector<1x8x128xf32>
    %139 = vector.shape_cast %138 : vector<1x8x128xf32> to vector<8x128xf32>
    %140 = vector.shape_cast %136 : vector<8x128xf32> to vector<1x8x128xf32>
    tpu.vector_store %arg10[%137, %c0_45, %c0_46], %140 {strides = array<i32>} : memref<8x8x128xf32, #tpu.memory_space<vmem>>, vector<1x8x128xf32>,
    %c5_i32 = arith.constant 5 : i32
    %141 = arith.index_cast %c5_i32 : i32 to index
    %c0_47 = arith.constant 0 : index
    %c0_48 = arith.constant 0 : index
    %142 = vector.load %arg9[%141, %c0_47, %c0_48] : memref<8x8x512xf32, #tpu.memory_space<vmem>>, vector<1x8x512xf32>
    %143 = vector.shape_cast %142 : vector<1x8x512xf32> to vector<8x512xf32>
    %cst_49 = arith.constant dense<0.000000e+00> : vector<8x512xf32>
    %144 = tpu.matmul %136, %13, %cst_49 {dimension_numbers = #tpu.dot_dimension_numbers<[1], [0], [0], [1], [0, 0, 1, 1], [], []>} : vector<8x128xf32>, vector<128x512xf32>, vector<8x512xf32> -> vector<8x512xf32>
    %145 = arith.addf %143, %144 : vector<8x512xf32>
    %146 = vector.extract_strided_slice %145 {offsets = [0, 0], sizes = [8, 384], strides = [1, 1]} : vector<8x512xf32> to vector<8x384xf32>
    %147 = arith.negf %146 : vector<8x384xf32>
    %148 = math.exp %147 : vector<8x384xf32>
    %cst_50 = arith.constant 1.000000e+00 : f32
    %149 = vector.broadcast %cst_50 : f32 to vector<8x384xf32>
    %150 = arith.addf %149, %148 : vector<8x384xf32>
    %151 = arith.divf %149, %150 : vector<8x384xf32>
    %152 = vector.extract_strided_slice %151 {offsets = [0, 0], sizes = [8, 128], strides = [1, 1]} : vector<8x384xf32> to vector<8x128xf32>
    %153 = vector.extract_strided_slice %151 {offsets = [0, 128], sizes = [8, 128], strides = [1, 1]} : vector<8x384xf32> to vector<8x128xf32>
    %154 = vector.extract_strided_slice %151 {offsets = [0, 256], sizes = [8, 128], strides = [1, 1]} : vector<8x384xf32> to vector<8x128xf32>
    %155 = vector.extract_strided_slice %145 {offsets = [0, 384], sizes = [8, 128], strides = [1, 1]} : vector<8x512xf32> to vector<8x128xf32>
    %156 = math.tanh %155 : vector<8x128xf32>
    %157 = arith.mulf %153, %154 : vector<8x128xf32>
    %158 = arith.mulf %152, %156 : vector<8x128xf32>
    %159 = arith.addf %157, %158 : vector<8x128xf32>
    %160 = math.tanh %159 : vector<8x128xf32>
    %161 = arith.mulf %154, %160 : vector<8x128xf32>
    %162 = arith.index_cast %c5_i32 : i32 to index
    %c0_51 = arith.constant 0 : index
    %c0_52 = arith.constant 0 : index
    %163 = vector.load %arg10[%162, %c0_51, %c0_52] : memref<8x8x128xf32, #tpu.memory_space<vmem>>, vector<1x8x128xf32>
    %164 = vector.shape_cast %163 : vector<1x8x128xf32> to vector<8x128xf32>
    %165 = vector.shape_cast %161 : vector<8x128xf32> to vector<1x8x128xf32>
    tpu.vector_store %arg10[%162, %c0_51, %c0_52], %165 {strides = array<i32>} : memref<8x8x128xf32, #tpu.memory_space<vmem>>, vector<1x8x128xf32>,
    %c6_i32 = arith.constant 6 : i32
    %166 = arith.index_cast %c6_i32 : i32 to index
    %c0_53 = arith.constant 0 : index
    %c0_54 = arith.constant 0 : index
    %167 = vector.load %arg9[%166, %c0_53, %c0_54] : memref<8x8x512xf32, #tpu.memory_space<vmem>>, vector<1x8x512xf32>
    %168 = vector.shape_cast %167 : vector<1x8x512xf32> to vector<8x512xf32>
    %cst_55 = arith.constant dense<0.000000e+00> : vector<8x512xf32>
    %169 = tpu.matmul %161, %13, %cst_55 {dimension_numbers = #tpu.dot_dimension_numbers<[1], [0], [0], [1], [0, 0, 1, 1], [], []>} : vector<8x128xf32>, vector<128x512xf32>, vector<8x512xf32> -> vector<8x512xf32>
    %170 = arith.addf %168, %169 : vector<8x512xf32>
    %171 = vector.extract_strided_slice %170 {offsets = [0, 0], sizes = [8, 384], strides = [1, 1]} : vector<8x512xf32> to vector<8x384xf32>
    %172 = arith.negf %171 : vector<8x384xf32>
    %173 = math.exp %172 : vector<8x384xf32>
    %cst_56 = arith.constant 1.000000e+00 : f32
    %174 = vector.broadcast %cst_56 : f32 to vector<8x384xf32>
    %175 = arith.addf %174, %173 : vector<8x384xf32>
    %176 = arith.divf %174, %175 : vector<8x384xf32>
    %177 = vector.extract_strided_slice %176 {offsets = [0, 0], sizes = [8, 128], strides = [1, 1]} : vector<8x384xf32> to vector<8x128xf32>
    %178 = vector.extract_strided_slice %176 {offsets = [0, 128], sizes = [8, 128], strides = [1, 1]} : vector<8x384xf32> to vector<8x128xf32>
    %179 = vector.extract_strided_slice %176 {offsets = [0, 256], sizes = [8, 128], strides = [1, 1]} : vector<8x384xf32> to vector<8x128xf32>
    %180 = vector.extract_strided_slice %170 {offsets = [0, 384], sizes = [8, 128], strides = [1, 1]} : vector<8x512xf32> to vector<8x128xf32>
    %181 = math.tanh %180 : vector<8x128xf32>
    %182 = arith.mulf %178, %179 : vector<8x128xf32>
    %183 = arith.mulf %177, %181 : vector<8x128xf32>
    %184 = arith.addf %182, %183 : vector<8x128xf32>
    %185 = math.tanh %184 : vector<8x128xf32>
    %186 = arith.mulf %179, %185 : vector<8x128xf32>
    %187 = arith.index_cast %c6_i32 : i32 to index
    %c0_57 = arith.constant 0 : index
    %c0_58 = arith.constant 0 : index
    %188 = vector.load %arg10[%187, %c0_57, %c0_58] : memref<8x8x128xf32, #tpu.memory_space<vmem>>, vector<1x8x128xf32>
    %189 = vector.shape_cast %188 : vector<1x8x128xf32> to vector<8x128xf32>
    %190 = vector.shape_cast %186 : vector<8x128xf32> to vector<1x8x128xf32>
    tpu.vector_store %arg10[%187, %c0_57, %c0_58], %190 {strides = array<i32>} : memref<8x8x128xf32, #tpu.memory_space<vmem>>, vector<1x8x128xf32>,
    %c7_i32 = arith.constant 7 : i32
    %191 = arith.index_cast %c7_i32 : i32 to index
    %c0_59 = arith.constant 0 : index
    %c0_60 = arith.constant 0 : index
    %192 = vector.load %arg9[%191, %c0_59, %c0_60] : memref<8x8x512xf32, #tpu.memory_space<vmem>>, vector<1x8x512xf32>
    %193 = vector.shape_cast %192 : vector<1x8x512xf32> to vector<8x512xf32>
    %cst_61 = arith.constant dense<0.000000e+00> : vector<8x512xf32>
    %194 = tpu.matmul %186, %13, %cst_61 {dimension_numbers = #tpu.dot_dimension_numbers<[1], [0], [0], [1], [0, 0, 1, 1], [], []>} : vector<8x128xf32>, vector<128x512xf32>, vector<8x512xf32> -> vector<8x512xf32>
    %195 = arith.addf %193, %194 : vector<8x512xf32>
    %196 = vector.extract_strided_slice %195 {offsets = [0, 0], sizes = [8, 384], strides = [1, 1]} : vector<8x512xf32> to vector<8x384xf32>
    %197 = arith.negf %196 : vector<8x384xf32>
    %198 = math.exp %197 : vector<8x384xf32>
    %cst_62 = arith.constant 1.000000e+00 : f32
    %199 = vector.broadcast %cst_62 : f32 to vector<8x384xf32>
    %200 = arith.addf %199, %198 : vector<8x384xf32>
    %201 = arith.divf %199, %200 : vector<8x384xf32>
    %202 = vector.extract_strided_slice %201 {offsets = [0, 0], sizes = [8, 128], strides = [1, 1]} : vector<8x384xf32> to vector<8x128xf32>
    %203 = vector.extract_strided_slice %201 {offsets = [0, 128], sizes = [8, 128], strides = [1, 1]} : vector<8x384xf32> to vector<8x128xf32>
    %204 = vector.extract_strided_slice %201 {offsets = [0, 256], sizes = [8, 128], strides = [1, 1]} : vector<8x384xf32> to vector<8x128xf32>
    %205 = vector.extract_strided_slice %195 {offsets = [0, 384], sizes = [8, 128], strides = [1, 1]} : vector<8x512xf32> to vector<8x128xf32>
    %206 = math.tanh %205 : vector<8x128xf32>
    %207 = arith.mulf %203, %204 : vector<8x128xf32>
    %208 = arith.mulf %202, %206 : vector<8x128xf32>
    %209 = arith.addf %207, %208 : vector<8x128xf32>
    %210 = math.tanh %209 : vector<8x128xf32>
    %211 = arith.mulf %204, %210 : vector<8x128xf32>
    %212 = arith.index_cast %c7_i32 : i32 to index
    %c0_63 = arith.constant 0 : index
    %c0_64 = arith.constant 0 : index
    %213 = vector.load %arg10[%212, %c0_63, %c0_64] : memref<8x8x128xf32, #tpu.memory_space<vmem>>, vector<1x8x128xf32>
    %214 = vector.shape_cast %213 : vector<1x8x128xf32> to vector<8x128xf32>
    %215 = vector.shape_cast %211 : vector<8x128xf32> to vector<1x8x128xf32>
    tpu.vector_store %arg10[%212, %c0_63, %c0_64], %215 {strides = array<i32>} : memref<8x8x128xf32, #tpu.memory_space<vmem>>, vector<1x8x128xf32>,
    %c8_i32 = arith.constant 8 : i32
    %c0_65 = arith.constant 0 : index
    %c0_66 = arith.constant 0 : index
    %216 = vector.load %arg7[%c0_65, %c0_66] : memref<8x128xf32, #tpu.memory_space<vmem>>, vector<8x128xf32>
    tpu.vector_store %arg7[%c0_65, %c0_66], %211 {strides = array<i32>} : memref<8x128xf32, #tpu.memory_space<vmem>>, vector<8x128xf32>,
    %c0_67 = arith.constant 0 : index
    %c0_68 = arith.constant 0 : index
    %217 = vector.load %arg8[%c0_67, %c0_68] : memref<8x128xf32, #tpu.memory_space<vmem>>, vector<8x128xf32>
    tpu.vector_store %arg8[%c0_67, %c0_68], %209 {strides = array<i32>} : memref<8x128xf32, #tpu.memory_space<vmem>>, vector<8x128xf32>,
    %c0_69 = arith.constant 0 : index
    %c0_70 = arith.constant 0 : index
    %c0_71 = arith.constant 0 : index
    %218 = vector.load %arg10[%c0_69, %c0_70, %c0_71] : memref<8x8x128xf32, #tpu.memory_space<vmem>>, vector<8x8x128xf32>
    %219 = tpu.transpose %218, [1, 0, 2] : vector<8x8x128xf32> -> vector<8x8x128xf32>
    %c0_72 = arith.constant 0 : index
    %c0_73 = arith.constant 0 : index
    %c0_74 = arith.constant 0 : index
    %220 = vector.load %arg6[%c0_72, %c0_73, %c0_74] : memref<8x8x128xf32, #tpu.memory_space<vmem>>, vector<8x8x128xf32>
    tpu.vector_store %arg6[%c0_72, %c0_73, %c0_74], %219 {strides = array<i32>} : memref<8x8x128xf32, #tpu.memory_space<vmem>>, vector<8x8x128xf32>,
    return
  }
  func.func @transform_0(%arg0: i32, %arg1: i32) -> (i32, i32, i32) {
    %c0_i32 = arith.constant 0 : i32
    %c0_i32_0 = arith.constant 0 : i32
    return %arg0, %arg1, %c0_i32 : i32, i32, i32
  }
  func.func @transform_1(%arg0: i32, %arg1: i32) -> (i32, i32) {
    %c0_i32 = arith.constant 0 : i32
    %c0_i32_0 = arith.constant 0 : i32
    %c0_i32_1 = arith.constant 0 : i32
    return %c0_i32, %c0_i32_0 : i32, i32
  }
  func.func @transform_2(%arg0: i32, %arg1: i32) -> (i32, i32) {
    %c0_i32 = arith.constant 0 : i32
    %c0_i32_0 = arith.constant 0 : i32
    %c0_i32_1 = arith.constant 0 : i32
    return %c0_i32, %c0_i32_0 : i32, i32
  }
  func.func @transform_3(%arg0: i32, %arg1: i32) -> (i32, i32) {
    %c0_i32 = arith.constant 0 : i32
    %c0_i32_0 = arith.constant 0 : i32
    %c0_i32_1 = arith.constant 0 : i32
    return %c0_i32, %c0_i32_0 : i32, i32
  }
  func.func @transform_4(%arg0: i32, %arg1: i32) -> (i32, i32, i32) {
    %c0_i32 = arith.constant 0 : i32
    %c0_i32_0 = arith.constant 0 : i32
    return %arg0, %arg1, %c0_i32 : i32, i32, i32
  }
  func.func @transform_5(%arg0: i32, %arg1: i32) -> (i32, i32) {
    %c0_i32 = arith.constant 0 : i32
    %c0_i32_0 = arith.constant 0 : i32
    return %arg0, %c0_i32 : i32, i32
  }
  func.func @transform_6(%arg0: i32, %arg1: i32) -> (i32, i32) {
    %c0_i32 = arith.constant 0 : i32
    %c0_i32_0 = arith.constant 0 : i32
    return %arg0, %c0_i32 : i32, i32
  }
}

</mosaic_0001>

<bundles_post_ra>
// kernel: tpu_custom_call.1
= control target key start
LH: loop header
LB: loop body
LE: loop exit
PB: predicated region body
PF: predicated region fallthrough
CT: control target
= control target key end

     0   :  { %12 = vsyncpa [#allocation5], 0  ;;  %s3797_s0 = inlined_call_operand.hbm [shape: f32[8,8,16], index: 0, kind: input, shape index: {}]   ;;  %s3798_s1 = inlined_call_operand.hbm [shape: f32[16,512], index: 1, kind: input, shape index: {}]   ;;  %s3799_s2 = inlined_call_operand.hbm [shape: f32[128,512], index: 2, kind: input, shape index: {}]   ;;  %s3800_s3 = inlined_call_operand.vmem [shape: f32[1,512], index: 3, kind: input, shape index: {}]   ;;  %s3801_s4 = inlined_call_operand.hbm [shape: f32[8,8,128], index: 4, kind: output, shape index: {0}]   ;;  %s3802_s5 = inlined_call_operand.hbm [shape: f32[8,128], index: 5, kind: output, shape index: {1}]   ;;  %s3803_s6 = inlined_call_operand.hbm [shape: f32[8,128], index: 6, kind: output, shape index: {2}]  }
   0x1   :  { %13 = vsyncpa [#allocation8], 0 }
   0x2   :  { %14 = vsyncpa [#allocation6], 0 }
   0x3   :  { %15 = vsyncpa [#allocation12], 0  ;;  %s3121_s21 = smov [#allocation7]   ;;  %s2981_s25 = scalar_lea.hbm %s3798_s1, 1024 }
   0x4   :  { %s33_s22 = sshll.u32 %s3121_s21, 4  ;;  %p2982_p0 = scmp.ne.s32.totalorder %s3798_s1, %s2981_s25  ;;  %s34_s22 = int_to_ptr.vmem [resolvable:$true] %s33_s22 }
   0x5   :  { %p2985_p1 = scmp.lt.u32.totalorder %s2981_s25, %s3798_s1 }
   0x7   :  { %p2987_p2 = pnand %p2985_p1, %p2982_p0 }
   0x9   :  { %2990 = shalt.err (!%p2987_p2)
}
   0xa   :  { %s2991_s30 = scalar_lea.vmem %s34_s22, 1024  ;;  %p2996_p4 = scmp.lt.s32.totalorder %s34_s22, %s34_s22 }
   0xb   :  { %p2992_p3 = scmp.ne.s32.totalorder %s34_s22, %s2991_s30  ;;  %p2997_p5 = scmp.lt.s32.totalorder %s2991_s30, %s2991_s30 }
   0xd   :  { %p2998_p6 = por %p2997_p5, %p2996_p4 }
   0xf   :  { %p2999_p7 = pnand %p2998_p6, %p2992_p3 }
  0x11   :  { %3002 = shalt.err (!%p2999_p7)
}
  0x12   :  { %s3122_s7 = smov 512   ;;  %s3123_s8 = smov 32  }
  0x13   :  { %39 = dma.hbm_to_vmem [thread:$0]  %s3798_s1, 1024, %s34_s22, [#allocation8], %s3122_s7, %s3122_s7, %s3123_s8  }
  0x14   :  { %s3124_s11 = smov [#allocation4]   ;;  %s3003_s15 = scalar_lea.hbm %s3797_s0, 1024 }
  0x15   :  { %s21_s12 = sshll.u32 %s3124_s11, 4  ;;  %p3004_p8 = scmp.ne.s32.totalorder %s3797_s0, %s3003_s15  ;;  %s22_s12 = int_to_ptr.vmem [resolvable:$true] %s21_s12 }
  0x16   :  { %p3007_p9 = scmp.lt.u32.totalorder %s3003_s15, %s3797_s0 }
  0x18   :  { %p3009_p10 = pnand %p3007_p9, %p3004_p8 }
  0x1a   :  { %3012 = shalt.err (!%p3009_p10)
}
  0x1b   :  { %s3013_s20 = scalar_lea.vmem %s22_s12, 1024  ;;  %p3018_p12 = scmp.lt.s32.totalorder %s22_s12, %s22_s12 }
  0x1c   :  { %p3014_p11 = scmp.ne.s32.totalorder %s22_s12, %s3013_s20  ;;  %p3019_p13 = scmp.lt.s32.totalorder %s3013_s20, %s3013_s20 }
  0x1e   :  { %p3020_p0 = por %p3019_p13, %p3018_p12 }
  0x20   :  { %p3021_p1 = pnand %p3020_p0, %p3014_p11 }
  0x22   :  { %3024 = shalt.err (!%p3021_p1)
}
  0x23   :  { %s3125_s1 = smov 128   ;;  %s3126_s21 = smov 8  }
  0x24   :  { %27 = dma.hbm_to_vmem [thread:$0]  %s3797_s0, 1024, %s22_s12, [#allocation5], %s3125_s1, %s3125_s1, %s3126_s21  }
  0x25   :  { %s3127_s24 = smov [#allocation9]   ;;  %s3025_s28 = scalar_lea.hbm %s3799_s2, 8192 }
  0x26   :  { %s45_s25 = sshll.u32 %s3127_s24, 4  ;;  %p3026_p2 = scmp.ne.s32.totalorder %s3799_s2, %s3025_s28  ;;  %s46_s25 = int_to_ptr.vmem [resolvable:$true] %s45_s25 }
  0x27   :  { %p3029_p3 = scmp.lt.u32.totalorder %s3025_s28, %s3799_s2 }
  0x29   :  { %p3031_p4 = pnand %p3029_p3, %p3026_p2 }
  0x2b   :  { %3034 = shalt.err (!%p3031_p4)
}
  0x2c   :  { %s3035_s11 = scalar_lea.vmem %s46_s25, 8192  ;;  %p3040_p6 = scmp.lt.s32.totalorder %s46_s25, %s46_s25 }
  0x2d   :  { %p3036_p5 = scmp.ne.s32.totalorder %s46_s25, %s3035_s11  ;;  %p3041_p7 = scmp.lt.s32.totalorder %s3035_s11, %s3035_s11 }
  0x2f   :  { %p3042_p8 = por %p3041_p7, %p3040_p6 }
  0x31   :  { %p3043_p9 = pnand %p3042_p8, %p3036_p5 }
  0x33   :  { %3046 = shalt.err (!%p3043_p9)
}
  0x34   :  { %51 = dma.hbm_to_vmem [thread:$0]  %s3799_s2, 8192, %s46_s25, [#allocation8], %s3122_s7, %s3122_s7, %s3123_s8  }
  0x35   :  { %3113 = dma.done.wait [#allocation5], 1024  }
  0x36   :  { %3114 = vsyncadd [#allocation5], 4294966272 }
  0x37   :  { %3115 = dma.done.wait [#allocation8], 9216  }
  0x38   :  { %3116 = vsyncadd [#allocation8], 4294958080  ;;  %v3128_v0 = vmov 0.0   ;;  %v3129_v1 = vmov 1983009808   ;;  %v82_v3 = vlaneseq  ;;  %v214_v4 = vld [vmem:[#allocation7 + $0x8] sm:$0xff] }
  0x39   :  { %332 = vmatprep.mubr.f32.mxu0 %v3128_v0  ;;  %445 = vmatprep.mubr.f32.mxu1 %v3128_v0  ;;  %v80_v2 = vunpack.c.l.s4 %v3129_v1  ;;  %v218_v5 = vld [vmem:[#allocation7 + $0x28] sm:$0xff]  ;;  %v213_v6 = vld [vmem:[#allocation7] sm:$0xff]  ;;  %v3130_v9 = vmov 1934713408   ;;  %v216_v13 = vld [vmem:[#allocation7 + $0x18] sm:$0xff]  ;;  %vm243_vm0 = vcmask 130048  }
  0x3a   :  { %v3216_v8 = vshrl.u32 %v82_v3, 7  ;;  %v144_v10 = vunpack.c.l.s4 %v3130_v9  ;;  %v2244_v11 = vpack.c.bf16 %v218_v5, %v214_v4  ;;  %v217_v12 = vld [vmem:[#allocation7 + $0x20] sm:$0xff]  ;;  %v220_v14 = vld [vmem:[#allocation7 + $0x38] sm:$0xff]  ;;  %v215_v17 = vld [vmem:[#allocation7 + $0x10] sm:$0xff]  ;;  %s3132_s13 = smov [#allocation13]  }
  0x3b   :  { %v81_v7 = vunpack.c.0.s8 %v80_v2  ;;  %v2246_v15 = vpack.c.bf16 %v217_v12, %v213_v6  ;;  %v2248_v16 = vpack.c.bf16 %v220_v14, %v216_v13  ;;  %v219_v18 = vld [vmem:[#allocation7 + $0x30] sm:$0xff]  ;;  %v527_v19 = vld [vmem:[#allocation9 + $0x8] sm:$0xff]  ;;  %v529_v33 = vld [vmem:[#allocation9 + $0x18] sm:$0xff]  ;;  %s2187_s14 = sshll.u32 %s3132_s13, 4  ;;  %s3725_s14 = int_to_ptr.vmem [resolvable:$true] %s2187_s14 }
  0x3c   :  { %2245 = vmatprep.subr.bf16.mxu0 %v2244_v11  ;;  %v2250_v20 = vpack.c.bf16 %v219_v18, %v215_v17  ;;  %v531_v21 = vld [vmem:[#allocation9 + $0x28] sm:$0xff]  ;;  %v145_v24 = vunpack.c.0.s8 %v144_v10  ;;  %v2841_v25 = vld [vmem:[#allocation4] ss:$16 sps:$4 sm:$0xff]   ;;  %v533_v34 = vld [vmem:[#allocation9 + $0x38] sm:$0xff] }
  0x3d   :  { %2247 = vmatpush1.bf16.msra.mxu0 %v2246_v15  ;;  %2249 = vmatprep.subr.bf16.mxu1 %v2248_v16  ;;  %v3218_v22 = vpack.c.bf16 %v531_v21, %v527_v19  ;;  %v3221_v23 = vsub.s32 %v81_v7, %v3216_v8  ;;  %v2843_v26 = vld [vmem:[#allocation4 + $0x8] ss:$16 sps:$4 sm:$0xff]   ;;  %v2845_v27 = vld [vmem:[#allocation4 + $0x20] ss:$16 sps:$4 sm:$0xff]   ;;  %v3231_v36 = vpack.c.bf16 %v533_v34, %v529_v33  ;;  %v2849_v9 = vld [vmem:[#allocation4 + $0x4] ss:$16 sps:$4 sm:$0xff]  }
  0x3e   :  { %2251 = vmatpush1.bf16.msra.mxu1 %v2250_v20  ;;  %v2847_v28 = vld [vmem:[#allocation4 + $0x28] ss:$16 sps:$4 sm:$0xff]   ;;  %v3228_v32 = vsub.s32 %v145_v24, %v3216_v8  ;;  %v526_v38 = vld [vmem:[#allocation9] sm:$0xff]  ;;  %v528_v41 = vld [vmem:[#allocation9 + $0x10] sm:$0xff] }
  0x3f   :  { %2253 = vmatprep.subr.bf16.mxu0 %v3218_v22  ;;  %v85_v29 = vrot.slane %v2841_v25, %v3221_v23  ;;  %v101_v30 = vrot.slane %v2843_v26, %v3221_v23  ;;  %v117_v31 = vrot.slane %v2845_v27, %v3221_v23  ;;  %v133_v35 = vrot.slane %v2847_v28, %v3221_v23  ;;  %v530_v40 = vld [vmem:[#allocation9 + $0x20] sm:$0xff]  ;;  %v532_v42 = vld [vmem:[#allocation9 + $0x30] sm:$0xff]  ;;  %v535_v44 = vld [vmem:[#allocation9 + $0x48] sm:$0xff] }
  0x40   :  { %2285 = vmatprep.subr.bf16.mxu1 %v3231_v36  ;;  %v539_v46 = vld [vmem:[#allocation9 + $0x68] sm:$0xff]  ;;  %v537_v47 = vld [vmem:[#allocation9 + $0x58] sm:$0xff]  ;;  %v3236_v51 = vpack.c.bf16 %v530_v40, %v526_v38  ;;  %v3238_v52 = vpack.c.bf16 %v532_v42, %v528_v41  ;;  %v534_v53 = vld [vmem:[#allocation9 + $0x40] sm:$0xff]  ;;  %v3263_v18 = vrot.slane %v2849_v9, %v3221_v23 }
  0x41   :  { %v141_v37 = vcombine.low %v85_v29, %v101_v30  ;;  %v173_v39 = vcombine.low %v117_v31, %v133_v35  ;;  %v541_v48 = vld [vmem:[#allocation9 + $0x78] sm:$0xff]  ;;  %v142_v49 = vcombine.high %v85_v29, %v101_v30  ;;  %v174_v50 = vcombine.high %v117_v31, %v133_v35  ;;  %v538_v54 = vld [vmem:[#allocation9 + $0x60] sm:$0xff]  ;;  %v536_v56 = vld [vmem:[#allocation9 + $0x50] sm:$0xff] }
  0x42   :  { %v540_v57 = vld [vmem:[#allocation9 + $0x70] sm:$0xff]  ;;  %v543_v58 = vld [vmem:[#allocation9 + $0x88] sm:$0xff]  ;;  %v3240_v59 = vpack.c.bf16 %v539_v46, %v535_v44  ;;  %v3242_v60 = vpack.c.bf16 %v541_v48, %v537_v47  ;;  %v545_v62 = vld [vmem:[#allocation9 + $0x98] sm:$0xff]  ;;  %v3250_v6 = vpack.c.bf16 %v538_v54, %v534_v53 }
  0x43   :  { %v149_v43 = vrot.slane %v141_v37, %v3228_v32  ;;  %v181_v45 = vrot.slane %v173_v39, %v3228_v32  ;;  %v547_v61 = vld [vmem:[#allocation9 + $0xa8] sm:$0xff]  ;;  %v549_v63 = vld [vmem:[#allocation9 + $0xb8] sm:$0xff]  ;;  %v156_v2 = vrot.slane %v142_v49, %v3228_v32  ;;  %v188_v3 = vrot.slane %v174_v50, %v3228_v32  ;;  %v542_v4 = vld [vmem:[#allocation9 + $0x80] sm:$0xff] }
  0x44   :  { %v546_v5 = vld [vmem:[#allocation9 + $0xa0] sm:$0xff]  ;;  %v3252_v7 = vpack.c.bf16 %v540_v57, %v536_v56  ;;  %v2850_v10 = vld [vmem:[#allocation4 + $0xc] ss:$16 sps:$4 sm:$0xff]   ;;  %v3256_v12 = vpack.c.bf16 %v547_v61, %v543_v58  ;;  %v3258_v13 = vpack.c.bf16 %v549_v63, %v545_v62  ;;  %v544_v14 = vld [vmem:[#allocation9 + $0x90] sm:$0xff] }
  0x45   :  { %v205_v55 = vcombine.low %v149_v43, %v181_v45  ;;  %v206_v1 = vcombine.high %v149_v43, %v181_v45  ;;  %v2851_v11 = vld [vmem:[#allocation4 + $0x24] ss:$16 sps:$4 sm:$0xff]   ;;  %v2852_v16 = vld [vmem:[#allocation4 + $0x2c] ss:$16 sps:$4 sm:$0xff]   ;;  %v3266_v19 = vrot.slane %v2850_v10, %v3221_v23  ;;  %v207_v21 = vcombine.low %v156_v2, %v188_v3 }
  0x46   :  { %v548_v15 = vld [vmem:[#allocation9 + $0xb0] sm:$0xff]  ;;  %v551_v17 = vld [vmem:[#allocation9 + $0xc8] sm:$0xff]  ;;  %v3269_v20 = vrot.slane %v2851_v11, %v3221_v23  ;;  %v553_v25 = vld [vmem:[#allocation9 + $0xd8] sm:$0xff]  ;;  %v3274_v27 = vrot.slane %v2852_v16, %v3221_v23  ;;  %v3278_v28 = vpack.c.bf16 %v546_v5, %v542_v4  ;;  %v208_v41 = vcombine.high %v156_v2, %v188_v3 }
  0x47   :  { %2204 = vmatmul.mubr.msk.f32.vlgmr.msra.gmra.mrb[0].mxu0 %vm243_vm0, %v205_v55  ;;  %2212 = vmatmul.mubr.msk.f32.vlgmr.msra.gmra.mrb[0].mxu1 %vm243_vm0, %v205_v55  ;;  %v555_v24 = vld [vmem:[#allocation9 + $0xe8] sm:$0xff]  ;;  %v557_v26 = vld [vmem:[#allocation9 + $0xf8] sm:$0xff]  ;;  %v3280_v29 = vpack.c.bf16 %v548_v15, %v544_v14  ;;  %v550_v30 = vld [vmem:[#allocation9 + $0xc0] sm:$0xff]  ;;  %v157_v31 = vcombine.low %v3263_v18, %v3266_v19 }
  0x48   :  { %2255 = vmatpush1.bf16.msra.mxu0 %v3236_v51  ;;  %2287 = vmatpush1.bf16.msra.mxu1 %v3238_v52  ;;  %v554_v33 = vld [vmem:[#allocation9 + $0xe0] sm:$0xff]  ;;  %v552_v34 = vld [vmem:[#allocation9 + $0xd0] sm:$0xff]  ;;  %v189_v37 = vcombine.low %v3269_v20, %v3274_v27  ;;  %v3290_v38 = vpack.c.bf16 %v555_v24, %v551_v17  ;;  %v3292_v39 = vpack.c.bf16 %v557_v26, %v553_v25  ;;  %v559_v40 = vld [vmem:[#allocation9 + $0x108] sm:$0xff] }
  0x49   :  { %338 = vmatprep.mubr.f32.mxu0 %v3128_v0  ;;  %451 = vmatprep.mubr.f32.mxu1 %v3128_v0  ;;  %v556_v35 = vld [vmem:[#allocation9 + $0xf0] sm:$0xff]  ;;  %v563_v42 = vld [vmem:[#allocation9 + $0x128] sm:$0xff]  ;;  %v165_v43 = vrot.slane %v157_v31, %v3228_v32  ;;  %v561_v45 = vld [vmem:[#allocation9 + $0x118] sm:$0xff]  ;;  %v3300_v47 = vpack.c.bf16 %v554_v33, %v550_v30  ;;  %v190_v2 = vcombine.high %v3269_v20, %v3274_v27 }
  0x4a   :  { %2257 = vmatprep.subr.bf16.mxu0 %v3240_v59  ;;  %2289 = vmatprep.subr.bf16.mxu1 %v3242_v60  ;;  %v197_v44 = vrot.slane %v189_v37, %v3228_v32  ;;  %v565_v46 = vld [vmem:[#allocation9 + $0x138] sm:$0xff]  ;;  %v3302_v48 = vpack.c.bf16 %v556_v35, %v552_v34  ;;  %v558_v49 = vld [vmem:[#allocation9 + $0x100] sm:$0xff]  ;;  %v560_v53 = vld [vmem:[#allocation9 + $0x110] sm:$0xff]  ;;  %v3308_v55 = vpack.c.bf16 %v563_v42, %v559_v40 }
  0x4b   :  { %2205 = vmatmul.mubr.msk.f32.gmra.mrb[2].mxu0 %vm243_vm0, %v206_v1  ;;  %2213 = vmatmul.mubr.msk.f32.gmra.mrb[2].mxu1 %vm243_vm0, %v206_v1  ;;  %v562_v50 = vld [vmem:[#allocation9 + $0x120] sm:$0xff]  ;;  %v564_v54 = vld [vmem:[#allocation9 + $0x130] sm:$0xff]  ;;  %v3310_v56 = vpack.c.bf16 %v565_v46, %v561_v45  ;;  %v567_v57 = vld [vmem:[#allocation9 + $0x148] sm:$0xff]  ;;  %v158_v1 = vcombine.high %v3263_v18, %v3266_v19  ;;  %v204_v20 = vrot.slane %v190_v2, %v3228_v32 }
  0x4c   :  { %2259 = vmatpush1.bf16.msra.mxu0 %v3250_v6  ;;  %2291 = vmatpush1.bf16.msra.mxu1 %v3252_v7  ;;  %v209_v58 = vcombine.low %v165_v43, %v197_v44  ;;  %v571_v61 = vld [vmem:[#allocation9 + $0x168] sm:$0xff]  ;;  %v569_v62 = vld [vmem:[#allocation9 + $0x158] sm:$0xff]  ;;  %v3320_v3 = vpack.c.bf16 %v562_v50, %v558_v49  ;;  %v3322_v4 = vpack.c.bf16 %v564_v54, %v560_v53  ;;  %v566_v5 = vld [vmem:[#allocation9 + $0x140] sm:$0xff] }
  0x4d   :  { %344 = vmatprep.mubr.f32.mxu0 %v3128_v0  ;;  %457 = vmatprep.mubr.f32.mxu1 %v3128_v0  ;;  %v573_v63 = vld [vmem:[#allocation9 + $0x178] sm:$0xff]  ;;  %v570_v9 = vld [vmem:[#allocation9 + $0x160] sm:$0xff]  ;;  %v568_v10 = vld [vmem:[#allocation9 + $0x150] sm:$0xff]  ;;  %v3328_v14 = vpack.c.bf16 %v571_v61, %v567_v57  ;;  %v210_v17 = vcombine.high %v165_v43, %v197_v44  ;;  %v172_v19 = vrot.slane %v158_v1, %v3228_v32  ;;  %v233_v1 = vsub.s32 2, %v3216_v8 }
  0x4e   :  { %2261 = vmatprep.subr.bf16.mxu0 %v3256_v12  ;;  %2293 = vmatprep.subr.bf16.mxu1 %v3258_v13  ;;  %v572_v11 = vld [vmem:[#allocation9 + $0x170] sm:$0xff]  ;;  %v3330_v15 = vpack.c.bf16 %v573_v63, %v569_v62  ;;  %v575_v16 = vld [vmem:[#allocation9 + $0x188] sm:$0xff]  ;;  %v581_v24 = vld [vmem:[#allocation9 + $0x1b8] sm:$0xff]  ;;  %v3338_v25 = vpack.c.bf16 %v570_v9, %v566_v5  ;;  %v225_v63 = vsub.s32 0, %v3216_v8  ;;  %v229_v5 = vsub.s32 1, %v3216_v8 }
  0x4f   :  { %2206 = vmatmul.mubr.msk.f32.gmra.mrb[4].mxu0 %vm243_vm0, %v207_v21  ;;  %2214 = vmatmul.mubr.msk.f32.gmra.mrb[4].mxu1 %vm243_vm0, %v207_v21  ;;  %v579_v18 = vld [vmem:[#allocation9 + $0x1a8] sm:$0xff]  ;;  %v577_v21 = vld [vmem:[#allocation9 + $0x198] sm:$0xff]  ;;  %v3340_v26 = vpack.c.bf16 %v572_v11, %v568_v10  ;;  %v574_v27 = vld [vmem:[#allocation9 + $0x180] sm:$0xff]  ;;  %v211_v40 = vcombine.low %v172_v19, %v204_v20 }
  0x50   :  { %2263 = vmatpush1.bf16.msra.mxu0 %v3278_v28  ;;  %2295 = vmatpush1.bf16.msra.mxu1 %v3280_v29  ;;  %v578_v30 = vld [vmem:[#allocation9 + $0x1a0] sm:$0xff]  ;;  %v576_v31 = vld [vmem:[#allocation9 + $0x190] sm:$0xff]  ;;  %v3346_v34 = vpack.c.bf16 %v579_v18, %v575_v16  ;;  %v3348_v35 = vpack.c.bf16 %v581_v24, %v577_v21  ;;  %v583_v37 = vld [vmem:[#allocation9 + $0x1c8] sm:$0xff] }
  0x51   :  { %350 = vmatprep.mubr.f32.mxu0 %v3128_v0  ;;  %463 = vmatprep.mubr.f32.mxu1 %v3128_v0  ;;  %v580_v33 = vld [vmem:[#allocation9 + $0x1b0] sm:$0xff]  ;;  %v585_v42 = vld [vmem:[#allocation9 + $0x1d8] sm:$0xff]  ;;  %v3354_v44 = vpack.c.bf16 %v578_v30, %v574_v27  ;;  %v582_v46 = vld [vmem:[#allocation9 + $0x1c0] sm:$0xff] }
  0x52   :  { %2265 = vmatprep.subr.bf16.mxu0 %v3290_v38  ;;  %2297 = vmatprep.subr.bf16.mxu1 %v3292_v39  ;;  %v589_v43 = vld [vmem:[#allocation9 + $0x1f8] sm:$0xff]  ;;  %v3356_v45 = vpack.c.bf16 %v580_v33, %v576_v31  ;;  %v586_v49 = vld [vmem:[#allocation9 + $0x1e0] sm:$0xff]  ;;  %v584_v50 = vld [vmem:[#allocation9 + $0x1d0] sm:$0xff]  ;;  %v237_v33 = vsub.s32 3, %v3216_v8 }
  0x53   :  { %2207 = vmatmul.mubr.msk.f32.gmra.mrb[6].mxu0 %vm243_vm0, %v208_v41  ;;  %2215 = vmatmul.mubr.msk.f32.gmra.mrb[6].mxu1 %vm243_vm0, %v208_v41  ;;  %v587_v41 = vld [vmem:[#allocation9 + $0x1e8] sm:$0xff]  ;;  %v588_v53 = vld [vmem:[#allocation9 + $0x1f0] sm:$0xff]  ;;  %v3364_v57 = vpack.c.bf16 %v589_v43, %v585_v42  ;;  %v3370_v61 = vpack.c.bf16 %v586_v49, %v582_v46  ;;  %v221_v2 = vld [vmem:[%s3800_s3] sm:$0xf]  ;;  %s3131_s3 = smov [#allocation11]  }
  0x54   :  { %2267 = vmatpush1.bf16.msra.mxu0 %v3300_v47  ;;  %2299 = vmatpush1.bf16.msra.mxu1 %v3302_v48  ;;  %v3362_v54 = vpack.c.bf16 %v587_v41, %v583_v37  ;;  %v3372_v62 = vpack.c.bf16 %v588_v53, %v584_v50  ;;  %v3428_v9 = vrot.slane %v221_v2, %v225_v63  ;;  %s2177_s8 = sshll.u32 %s3131_s3, 4  ;;  %s2178_s8 = int_to_ptr.vmem [resolvable:$true] %s2177_s8 }
  0x55   :  { %356 = vmatprep.mubr.f32.mxu0 %v3128_v0  ;;  %469 = vmatprep.mubr.f32.mxu1 %v3128_v0  ;;  %v3430_v10 = vrot.slane %v221_v2, %v233_v1  ;;  %v3432_v11 = vrot.slane %v221_v2, %v229_v5  ;;  %v3438_v37 = vrot.slane %v221_v2, %v237_v33  ;;  %s3047_s15 = scalar_lea.vmem %s2178_s8, 128  ;;  %p3052_p11 = scmp.lt.s32.totalorder %s2178_s8, %s2178_s8 }
  0x56   :  { %2269 = vmatprep.subr.bf16.mxu0 %v3308_v55  ;;  %2301 = vmatprep.subr.bf16.mxu1 %v3310_v56  ;;  %p3048_p10 = scmp.ne.s32.totalorder %s2178_s8, %s3047_s15  ;;  %p3053_p12 = scmp.lt.s32.totalorder %s3047_s15, %s3047_s15 }
  0x57   :  { %2208 = vmatmul.mubr.msk.f32.gmra.mrb[8].mxu0 %vm243_vm0, %v209_v58  ;;  %2216 = vmatmul.mubr.msk.f32.gmra.mrb[8].mxu1 %vm243_vm0, %v209_v58  ;;  %v212_v58 = vcombine.high %v172_v19, %v204_v20 }
  0x58   :  { %2271 = vmatpush1.bf16.msra.mxu0 %v3320_v3  ;;  %2303 = vmatpush1.bf16.msra.mxu1 %v3322_v4  ;;  %p3054_p13 = por %p3053_p12, %p3052_p11 }
  0x59   :  { %362 = vmatprep.mubr.f32.mxu0 %v3128_v0  ;;  %475 = vmatprep.mubr.f32.mxu1 %v3128_v0 }
  0x5a   :  { %2273 = vmatprep.subr.bf16.mxu0 %v3328_v14  ;;  %2305 = vmatprep.subr.bf16.mxu1 %v3330_v15  ;;  %p3055_p0 = pnand %p3054_p13, %p3048_p10 }
  0x5b   :  { %2209 = vmatmul.mubr.msk.f32.gmra.mrb[10].mxu0 %vm243_vm0, %v210_v17  ;;  %2217 = vmatmul.mubr.msk.f32.gmra.mrb[10].mxu1 %vm243_vm0, %v210_v17 }
  0x5c   :  { %2275 = vmatpush1.bf16.msra.mxu0 %v3338_v25  ;;  %2307 = vmatpush1.bf16.msra.mxu1 %v3340_v26 }
  0x5d   :  { %368 = vmatprep.mubr.f32.mxu0 %v3128_v0  ;;  %481 = vmatprep.mubr.f32.mxu1 %v3128_v0 }
  0x5e   :  { %2277 = vmatprep.subr.bf16.mxu0 %v3346_v34  ;;  %2309 = vmatprep.subr.bf16.mxu1 %v3348_v35 }
  0x5f   :  { %2210 = vmatmul.mubr.msk.f32.gmra.mrb[12].mxu0 %vm243_vm0, %v211_v40  ;;  %2218 = vmatmul.mubr.msk.f32.gmra.mrb[12].mxu1 %vm243_vm0, %v211_v40 }
  0x60   :  { %2279 = vmatpush1.bf16.msra.mxu0 %v3354_v44  ;;  %2311 = vmatpush1.bf16.msra.mxu1 %v3356_v45 }
  0x61   :  { %374 = vmatprep.mubr.f32.mxu0 %v3128_v0  ;;  %487 = vmatprep.mubr.f32.mxu1 %v3128_v0 }
  0x62   :  { %2281 = vmatprep.subr.bf16.mxu0 %v3362_v54  ;;  %2313 = vmatprep.subr.bf16.mxu1 %v3364_v57 }
  0x63   :  { %2211 = vmatmul.mubr.msk.f32.gmra.mrb[14].mxu0 %vm243_vm0, %v212_v58  ;;  %2219 = vmatmul.mubr.msk.f32.gmra.mrb[14].mxu1 %vm243_vm0, %v212_v58 }
  0x64   :  { %2283 = vmatpush1.bf16.msra.mxu0 %v3370_v61  ;;  %2315 = vmatpush1.bf16.msra.mxu1 %v3372_v62 }
  0x65   :  { %659 = vmatprep.mubr.f32.mxu0 %v3128_v0  ;;  %730 = vmatprep.mubr.f32.mxu1 %v3128_v0 }
  0x66   :  { %2317 = vmatprep.subr.bf16.mxu0 %v3218_v22  ;;  %2349 = vmatprep.subr.bf16.mxu1 %v3231_v36 }
  0x67   :  { %660 = vmatmul.mubr.f32.vlgmr.msra.gmra.mrb[0].mxu0 %v3128_v0  ;;  %731 = vmatmul.mubr.f32.vlgmr.msra.gmra.mrb[0].mxu1 %v3128_v0 }
  0x68   :  { %2319 = vmatpush1.bf16.msra.mxu0 %v3236_v51  ;;  %2351 = vmatpush1.bf16.msra.mxu1 %v3238_v52 }
  0x69   :  { %2321 = vmatprep.subr.bf16.mxu0 %v3240_v59  ;;  %2353 = vmatprep.subr.bf16.mxu1 %v3242_v60 }
  0x6a   :  { %835 = vmatprep.mubr.f32.mxu0 %v3128_v0  ;;  %906 = vmatprep.mubr.f32.mxu1 %v3128_v0 }
  0x6c   :  { %2323 = vmatpush1.bf16.msra.mxu0 %v3250_v6  ;;  %2355 = vmatpush1.bf16.msra.mxu1 %v3252_v7 }
  0x6d   :  { %2325 = vmatprep.subr.bf16.mxu0 %v3256_v12  ;;  %2357 = vmatprep.subr.bf16.mxu1 %v3258_v13 }
  0x70   :  { %2327 = vmatpush1.bf16.msra.mxu0 %v3278_v28  ;;  %2359 = vmatpush1.bf16.msra.mxu1 %v3280_v29 }
  0x71   :  { %2329 = vmatprep.subr.bf16.mxu0 %v3290_v38  ;;  %2361 = vmatprep.subr.bf16.mxu1 %v3292_v39 }
  0x74   :  { %2331 = vmatpush1.bf16.msra.mxu0 %v3300_v47  ;;  %2363 = vmatpush1.bf16.msra.mxu1 %v3302_v48 }
  0x75   :  { %2333 = vmatprep.subr.bf16.mxu0 %v3308_v55  ;;  %2365 = vmatprep.subr.bf16.mxu1 %v3310_v56 }
  0x78   :  { %2335 = vmatpush1.bf16.msra.mxu0 %v3320_v3  ;;  %2367 = vmatpush1.bf16.msra.mxu1 %v3322_v4 }
  0x79   :  { %2337 = vmatprep.subr.bf16.mxu0 %v3328_v14  ;;  %2369 = vmatprep.subr.bf16.mxu1 %v3330_v15 }
  0x7c   :  { %2339 = vmatpush1.bf16.msra.mxu0 %v3338_v25  ;;  %2371 = vmatpush1.bf16.msra.mxu1 %v3340_v26 }
  0x7d   :  { %2341 = vmatprep.subr.bf16.mxu0 %v3346_v34  ;;  %2373 = vmatprep.subr.bf16.mxu1 %v3348_v35 }
  0x80   :  { %2343 = vmatpush1.bf16.msra.mxu0 %v3354_v44  ;;  %2375 = vmatpush1.bf16.msra.mxu1 %v3356_v45 }
  0x81   :  { %2345 = vmatprep.subr.bf16.mxu0 %v3362_v54  ;;  %2377 = vmatprep.subr.bf16.mxu1 %v3364_v57 }
  0x84   :  { %2347 = vmatpush1.bf16.msra.mxu0 %v3370_v61  ;;  %2379 = vmatpush1.bf16.msra.mxu1 %v3372_v62 }
  0x85   :  { %2381 = vmatprep.subr.bf16.mxu0 %v3218_v22  ;;  %2413 = vmatprep.subr.bf16.mxu1 %v3231_v36 }
 0x13a   :  { %v661_v16 = vpop.f32.mrb[0].mxu0  ;;  %v732_v17 = vpop.f32.mrb[0].mxu1 }
 0x13b   :  { %v2764_v18 = vadd.f32 %v661_v16, %v3428_v9  ;;  %v2780_v19 = vadd.f32 %v732_v17, %v3430_v10  ;;  %v663_v20 = vpop.f32.mrb[1].mxu0  ;;  %v734_v21 = vpop.f32.mrb[1].mxu1 }
 0x13c   :  { %v2765_v24 = vadd.f32 %v663_v20, %v3432_v11  ;;  %v2781_v40 = vadd.f32 %v734_v21, %v3438_v37 }
 0x13d   :  { %v2220_v27 = vmul.f32 -1.442695, %v2764_v18  ;;  %v2222_v30 = vmul.f32 -1.442695, %v2780_v19 }
 0x13e   :  { %v2221_v31 = vmul.f32 -1.442695, %v2765_v24 }
 0x13f   :  { %2853 = vpow2.f32 %v2220_v27 }
 0x140   :  { %2855 = vpow2.f32 %v2222_v30 }
 0x141   :  { %2857 = vpow2.f32 %v2221_v31 }
 0x142   :  { %2859 = vtanh.f32 %v2781_v40 }
 0x149   :  { %v2854_v41 = vpop.eup %2853 }
 0x14a   :  { %v2856_v42 = vpop.eup %2855  ;;  %v750_v43 = vadd.f32 1.0, %v2854_v41 }
 0x14b   :  { %v2858_v46 = vpop.eup %2857  ;;  %v752_v49 = vadd.f32 1.0, %v2856_v42 }
 0x14c   :  { %2861 = vrcp.f32 %v750_v43  ;;  %v751_v50 = vadd.f32 1.0, %v2858_v46  ;;  %v2860_v53 = vpop.eup %2859 }
 0x14d   :  { %2863 = vrcp.f32 %v752_v49 }
 0x14e   :  { %2865 = vrcp.f32 %v751_v50 }
 0x156   :  { %v2862_v58 = vpop.eup %2861 }
 0x157   :  { %v2864_v63 = vpop.eup %2863  ;;  %v761_v8 = vmul.f32 %v2862_v58, %v2860_v53 }
 0x158   :  { %v2866_v1 = vpop.eup %2865 }
 0x159   :  { %v760_v5 = vmul.f32 %v2866_v1, %v2864_v63 }
 0x15b   :  { %v762_v2 = vadd.f32 %v761_v8, %v760_v5 }
 0x15d   :  { %2867 = vtanh.f32 %v762_v2 }
 0x167   :  { %v2868_v16 = vpop.eup %2867 }
 0x168   :  { %v3441_v17 = vmul.f32 %v2868_v16, %v2864_v63 }
 0x16a   :  { %836 = vmatmul.mubr.f32.vlgmr.msra.gmra.mrb[2].mxu0 %v3441_v17  ;;  %907 = vmatmul.mubr.f32.vlgmr.msra.gmra.mrb[2].mxu1 %v3441_v17 }
 0x16b   :  { %2383 = vmatpush1.bf16.msra.mxu0 %v3236_v51  ;;  %2415 = vmatpush1.bf16.msra.mxu1 %v3238_v52 }
 0x16c   :  { %2385 = vmatprep.subr.bf16.mxu0 %v3240_v59  ;;  %2417 = vmatprep.subr.bf16.mxu1 %v3242_v60 }
 0x16d   :  { %1012 = vmatprep.mubr.f32.mxu0 %v3128_v0  ;;  %1083 = vmatprep.mubr.f32.mxu1 %v3128_v0 }
 0x16f   :  { %2387 = vmatpush1.bf16.msra.mxu0 %v3250_v6  ;;  %2419 = vmatpush1.bf16.msra.mxu1 %v3252_v7 }
 0x170   :  { %2389 = vmatprep.subr.bf16.mxu0 %v3256_v12  ;;  %2421 = vmatprep.subr.bf16.mxu1 %v3258_v13 }
 0x173   :  { %2391 = vmatpush1.bf16.msra.mxu0 %v3278_v28  ;;  %2423 = vmatpush1.bf16.msra.mxu1 %v3280_v29 }
 0x174   :  { %2393 = vmatprep.subr.bf16.mxu0 %v3290_v38  ;;  %2425 = vmatprep.subr.bf16.mxu1 %v3292_v39 }
 0x177   :  { %2395 = vmatpush1.bf16.msra.mxu0 %v3300_v47  ;;  %2427 = vmatpush1.bf16.msra.mxu1 %v3302_v48 }
 0x178   :  { %2397 = vmatprep.subr.bf16.mxu0 %v3308_v55  ;;  %2429 = vmatprep.subr.bf16.mxu1 %v3310_v56 }
 0x17b   :  { %2399 = vmatpush1.bf16.msra.mxu0 %v3320_v3  ;;  %2431 = vmatpush1.bf16.msra.mxu1 %v3322_v4 }
 0x17c   :  { %2401 = vmatprep.subr.bf16.mxu0 %v3328_v14  ;;  %2433 = vmatprep.subr.bf16.mxu1 %v3330_v15 }
 0x17f   :  { %2403 = vmatpush1.bf16.msra.mxu0 %v3338_v25  ;;  %2435 = vmatpush1.bf16.msra.mxu1 %v3340_v26 }
 0x180   :  { %2405 = vmatprep.subr.bf16.mxu0 %v3346_v34  ;;  %2437 = vmatprep.subr.bf16.mxu1 %v3348_v35 }
 0x183   :  { %2407 = vmatpush1.bf16.msra.mxu0 %v3354_v44  ;;  %2439 = vmatpush1.bf16.msra.mxu1 %v3356_v45 }
 0x184   :  { %2409 = vmatprep.subr.bf16.mxu0 %v3362_v54  ;;  %2441 = vmatprep.subr.bf16.mxu1 %v3364_v57 }
 0x187   :  { %2411 = vmatpush1.bf16.msra.mxu0 %v3370_v61  ;;  %2443 = vmatpush1.bf16.msra.mxu1 %v3372_v62 }
 0x188   :  { %2445 = vmatprep.subr.bf16.mxu0 %v3218_v22  ;;  %2477 = vmatprep.subr.bf16.mxu1 %v3231_v36 }
 0x23d   :  { %v837_v18 = vpop.f32.mrb[2].mxu0  ;;  %v908_v19 = vpop.f32.mrb[2].mxu1 }
 0x23e   :  { %v2766_v20 = vadd.f32 %v837_v18, %v3428_v9  ;;  %v2782_v21 = vadd.f32 %v908_v19, %v3430_v10  ;;  %v839_v24 = vpop.f32.mrb[3].mxu0  ;;  %v910_v27 = vpop.f32.mrb[3].mxu1 }
 0x23f   :  { %v2767_v30 = vadd.f32 %v839_v24, %v3432_v11  ;;  %v2783_v41 = vadd.f32 %v910_v27, %v3438_v37 }
 0x240   :  { %v2223_v31 = vmul.f32 -1.442695, %v2766_v20  ;;  %v2225_v33 = vmul.f32 -1.442695, %v2782_v21 }
 0x241   :  { %v2224_v40 = vmul.f32 -1.442695, %v2767_v30 }
 0x242   :  { %2869 = vpow2.f32 %v2223_v31 }
 0x243   :  { %2871 = vpow2.f32 %v2225_v33 }
 0x244   :  { %2873 = vpow2.f32 %v2224_v40 }
 0x245   :  { %2875 = vtanh.f32 %v2783_v41 }
 0x24c   :  { %v2870_v42 = vpop.eup %2869 }
 0x24d   :  { %v2872_v43 = vpop.eup %2871  ;;  %v926_v46 = vadd.f32 1.0, %v2870_v42 }
 0x24e   :  { %v2874_v49 = vpop.eup %2873  ;;  %v928_v50 = vadd.f32 1.0, %v2872_v43 }
 0x24f   :  { %2877 = vrcp.f32 %v926_v46  ;;  %v927_v53 = vadd.f32 1.0, %v2874_v49  ;;  %v2876_v58 = vpop.eup %2875 }
 0x250   :  { %2879 = vrcp.f32 %v928_v50 }
 0x251   :  { %2881 = vrcp.f32 %v927_v53 }
 0x259   :  { %v2878_v63 = vpop.eup %2877 }
 0x25a   :  { %v2880_v8 = vpop.eup %2879  ;;  %v937_v1 = vmul.f32 %v2878_v63, %v2876_v58 }
 0x25b   :  { %v2882_v5 = vpop.eup %2881 }
 0x25c   :  { %v936_v2 = vmul.f32 %v2882_v5, %v2880_v8 }
 0x25e   :  { %v938_v16 = vadd.f32 %v937_v1, %v936_v2 }
 0x260   :  { %2883 = vtanh.f32 %v938_v16 }
 0x26a   :  { %v2884_v18 = vpop.eup %2883 }
 0x26b   :  { %v3483_v19 = vmul.f32 %v2884_v18, %v2880_v8 }
 0x26d   :  { %1013 = vmatmul.mubr.f32.vlgmr.msra.gmra.mrb[4].mxu0 %v3483_v19  ;;  %1084 = vmatmul.mubr.f32.vlgmr.msra.gmra.mrb[4].mxu1 %v3483_v19 }
 0x26e   :  { %2447 = vmatpush1.bf16.msra.mxu0 %v3236_v51  ;;  %2479 = vmatpush1.bf16.msra.mxu1 %v3238_v52 }
 0x26f   :  { %2449 = vmatprep.subr.bf16.mxu0 %v3240_v59  ;;  %2481 = vmatprep.subr.bf16.mxu1 %v3242_v60 }
 0x270   :  { %1189 = vmatprep.mubr.f32.mxu0 %v3128_v0  ;;  %1260 = vmatprep.mubr.f32.mxu1 %v3128_v0 }
 0x272   :  { %2451 = vmatpush1.bf16.msra.mxu0 %v3250_v6  ;;  %2483 = vmatpush1.bf16.msra.mxu1 %v3252_v7 }
 0x273   :  { %2453 = vmatprep.subr.bf16.mxu0 %v3256_v12  ;;  %2485 = vmatprep.subr.bf16.mxu1 %v3258_v13 }
 0x276   :  { %2455 = vmatpush1.bf16.msra.mxu0 %v3278_v28  ;;  %2487 = vmatpush1.bf16.msra.mxu1 %v3280_v29 }
 0x277   :  { %2457 = vmatprep.subr.bf16.mxu0 %v3290_v38  ;;  %2489 = vmatprep.subr.bf16.mxu1 %v3292_v39 }
 0x27a   :  { %2459 = vmatpush1.bf16.msra.mxu0 %v3300_v47  ;;  %2491 = vmatpush1.bf16.msra.mxu1 %v3302_v48 }
 0x27b   :  { %2461 = vmatprep.subr.bf16.mxu0 %v3308_v55  ;;  %2493 = vmatprep.subr.bf16.mxu1 %v3310_v56 }
 0x27e   :  { %2463 = vmatpush1.bf16.msra.mxu0 %v3320_v3  ;;  %2495 = vmatpush1.bf16.msra.mxu1 %v3322_v4 }
 0x27f   :  { %2465 = vmatprep.subr.bf16.mxu0 %v3328_v14  ;;  %2497 = vmatprep.subr.bf16.mxu1 %v3330_v15 }
 0x282   :  { %2467 = vmatpush1.bf16.msra.mxu0 %v3338_v25  ;;  %2499 = vmatpush1.bf16.msra.mxu1 %v3340_v26 }
 0x283   :  { %2469 = vmatprep.subr.bf16.mxu0 %v3346_v34  ;;  %2501 = vmatprep.subr.bf16.mxu1 %v3348_v35 }
 0x286   :  { %2471 = vmatpush1.bf16.msra.mxu0 %v3354_v44  ;;  %2503 = vmatpush1.bf16.msra.mxu1 %v3356_v45 }
 0x287   :  { %2473 = vmatprep.subr.bf16.mxu0 %v3362_v54  ;;  %2505 = vmatprep.subr.bf16.mxu1 %v3364_v57 }
 0x28a   :  { %2475 = vmatpush1.bf16.msra.mxu0 %v3370_v61  ;;  %2507 = vmatpush1.bf16.msra.mxu1 %v3372_v62 }
 0x28b   :  { %2509 = vmatprep.subr.bf16.mxu0 %v3218_v22  ;;  %2541 = vmatprep.subr.bf16.mxu1 %v3231_v36 }
 0x340   :  { %v1014_v20 = vpop.f32.mrb[4].mxu0  ;;  %v1085_v21 = vpop.f32.mrb[4].mxu1 }
 0x341   :  { %v2768_v24 = vadd.f32 %v1014_v20, %v3428_v9  ;;  %v2784_v27 = vadd.f32 %v1085_v21, %v3430_v10  ;;  %v1016_v30 = vpop.f32.mrb[5].mxu0  ;;  %v1087_v31 = vpop.f32.mrb[5].mxu1 }
 0x342   :  { %v2769_v33 = vadd.f32 %v1016_v30, %v3432_v11  ;;  %v2785_v43 = vadd.f32 %v1087_v31, %v3438_v37 }
 0x343   :  { %v2226_v40 = vmul.f32 -1.442695, %v2768_v24  ;;  %v2228_v41 = vmul.f32 -1.442695, %v2784_v27 }
 0x344   :  { %v2227_v42 = vmul.f32 -1.442695, %v2769_v33 }
 0x345   :  { %2885 = vpow2.f32 %v2226_v40 }
 0x346   :  { %2887 = vpow2.f32 %v2228_v41 }
 0x347   :  { %2889 = vpow2.f32 %v2227_v42 }
 0x348   :  { %2891 = vtanh.f32 %v2785_v43 }
 0x34f   :  { %v2886_v46 = vpop.eup %2885 }
 0x350   :  { %v2888_v49 = vpop.eup %2887  ;;  %v1103_v50 = vadd.f32 1.0, %v2886_v46 }
 0x351   :  { %v2890_v53 = vpop.eup %2889  ;;  %v1105_v58 = vadd.f32 1.0, %v2888_v49 }
 0x352   :  { %2893 = vrcp.f32 %v1103_v50  ;;  %v1104_v63 = vadd.f32 1.0, %v2890_v53  ;;  %v2892_v8 = vpop.eup %2891 }
 0x353   :  { %2895 = vrcp.f32 %v1105_v58 }
 0x354   :  { %2897 = vrcp.f32 %v1104_v63 }
 0x35c   :  { %v2894_v1 = vpop.eup %2893 }
 0x35d   :  { %v2896_v5 = vpop.eup %2895  ;;  %v1114_v2 = vmul.f32 %v2894_v1, %v2892_v8 }
 0x35e   :  { %v2898_v16 = vpop.eup %2897 }
 0x35f   :  { %v1113_v18 = vmul.f32 %v2898_v16, %v2896_v5 }
 0x361   :  { %v1115_v20 = vadd.f32 %v1114_v2, %v1113_v18 }
 0x363   :  { %2899 = vtanh.f32 %v1115_v20 }
 0x36d   :  { %v2900_v21 = vpop.eup %2899 }
 0x36e   :  { %v3525_v24 = vmul.f32 %v2900_v21, %v2896_v5 }
 0x370   :  { %1190 = vmatmul.mubr.f32.vlgmr.msra.gmra.mrb[6].mxu0 %v3525_v24  ;;  %1261 = vmatmul.mubr.f32.vlgmr.msra.gmra.mrb[6].mxu1 %v3525_v24 }
 0x371   :  { %2511 = vmatpush1.bf16.msra.mxu0 %v3236_v51  ;;  %2543 = vmatpush1.bf16.msra.mxu1 %v3238_v52 }
 0x372   :  { %2513 = vmatprep.subr.bf16.mxu0 %v3240_v59  ;;  %2545 = vmatprep.subr.bf16.mxu1 %v3242_v60 }
 0x373   :  { %1366 = vmatprep.mubr.f32.mxu0 %v3128_v0  ;;  %1437 = vmatprep.mubr.f32.mxu1 %v3128_v0 }
 0x375   :  { %2515 = vmatpush1.bf16.msra.mxu0 %v3250_v6  ;;  %2547 = vmatpush1.bf16.msra.mxu1 %v3252_v7 }
 0x376   :  { %2517 = vmatprep.subr.bf16.mxu0 %v3256_v12  ;;  %2549 = vmatprep.subr.bf16.mxu1 %v3258_v13 }
 0x379   :  { %2519 = vmatpush1.bf16.msra.mxu0 %v3278_v28  ;;  %2551 = vmatpush1.bf16.msra.mxu1 %v3280_v29 }
 0x37a   :  { %2521 = vmatprep.subr.bf16.mxu0 %v3290_v38  ;;  %2553 = vmatprep.subr.bf16.mxu1 %v3292_v39 }
 0x37d   :  { %2523 = vmatpush1.bf16.msra.mxu0 %v3300_v47  ;;  %2555 = vmatpush1.bf16.msra.mxu1 %v3302_v48 }
 0x37e   :  { %2525 = vmatprep.subr.bf16.mxu0 %v3308_v55  ;;  %2557 = vmatprep.subr.bf16.mxu1 %v3310_v56 }
 0x381   :  { %2527 = vmatpush1.bf16.msra.mxu0 %v3320_v3  ;;  %2559 = vmatpush1.bf16.msra.mxu1 %v3322_v4 }
 0x382   :  { %2529 = vmatprep.subr.bf16.mxu0 %v3328_v14  ;;  %2561 = vmatprep.subr.bf16.mxu1 %v3330_v15 }
 0x385   :  { %2531 = vmatpush1.bf16.msra.mxu0 %v3338_v25  ;;  %2563 = vmatpush1.bf16.msra.mxu1 %v3340_v26 }
 0x386   :  { %2533 = vmatprep.subr.bf16.mxu0 %v3346_v34  ;;  %2565 = vmatprep.subr.bf16.mxu1 %v3348_v35 }
 0x389   :  { %2535 = vmatpush1.bf16.msra.mxu0 %v3354_v44  ;;  %2567 = vmatpush1.bf16.msra.mxu1 %v3356_v45 }
 0x38a   :  { %2537 = vmatprep.subr.bf16.mxu0 %v3362_v54  ;;  %2569 = vmatprep.subr.bf16.mxu1 %v3364_v57 }
 0x38d   :  { %2539 = vmatpush1.bf16.msra.mxu0 %v3370_v61  ;;  %2571 = vmatpush1.bf16.msra.mxu1 %v3372_v62 }
 0x38e   :  { %2573 = vmatprep.subr.bf16.mxu0 %v3218_v22  ;;  %2605 = vmatprep.subr.bf16.mxu1 %v3231_v36 }
 0x443   :  { %v1191_v27 = vpop.f32.mrb[6].mxu0  ;;  %v1262_v30 = vpop.f32.mrb[6].mxu1 }
 0x444   :  { %v2770_v31 = vadd.f32 %v1191_v27, %v3428_v9  ;;  %v2786_v33 = vadd.f32 %v1262_v30, %v3430_v10  ;;  %v1193_v40 = vpop.f32.mrb[7].mxu0  ;;  %v1264_v41 = vpop.f32.mrb[7].mxu1 }
 0x445   :  { %v2771_v42 = vadd.f32 %v1193_v40, %v3432_v11  ;;  %v2787_v50 = vadd.f32 %v1264_v41, %v3438_v37  ;;  %v2016_v40 = vcombine.high %v3441_v17, %v3525_v24 }
 0x446   :  { %v2229_v43 = vmul.f32 -1.442695, %v2770_v31  ;;  %v2231_v46 = vmul.f32 -1.442695, %v2786_v33  ;;  %v2015_v33 = vcombine.low %v3441_v17, %v3525_v24 }
 0x447   :  { %v2230_v49 = vmul.f32 -1.442695, %v2771_v42 }
 0x448   :  { %2901 = vpow2.f32 %v2229_v43 }
 0x449   :  { %2903 = vpow2.f32 %v2231_v46  ;;  %v3574_v46 = vrot.slane %v2015_v33, %v3221_v23 }
 0x44a   :  { %2905 = vpow2.f32 %v2230_v49  ;;  %v3579_v49 = vrot.slane %v2016_v40, %v3221_v23 }
 0x44b   :  { %2907 = vtanh.f32 %v2787_v50 }
 0x452   :  { %v2902_v53 = vpop.eup %2901 }
 0x453   :  { %v2904_v58 = vpop.eup %2903  ;;  %v1280_v63 = vadd.f32 1.0, %v2902_v53 }
 0x454   :  { %v2906_v8 = vpop.eup %2905  ;;  %v1282_v1 = vadd.f32 1.0, %v2904_v58 }
 0x455   :  { %2909 = vrcp.f32 %v1280_v63  ;;  %v1281_v5 = vadd.f32 1.0, %v2906_v8  ;;  %v2908_v2 = vpop.eup %2907 }
 0x456   :  { %2911 = vrcp.f32 %v1282_v1 }
 0x457   :  { %2913 = vrcp.f32 %v1281_v5 }
 0x45f   :  { %v2910_v16 = vpop.eup %2909 }
 0x460   :  { %v2912_v18 = vpop.eup %2911  ;;  %v1291_v20 = vmul.f32 %v2910_v16, %v2908_v2 }
 0x461   :  { %v2914_v21 = vpop.eup %2913 }
 0x462   :  { %v1290_v27 = vmul.f32 %v2914_v21, %v2912_v18 }
 0x464   :  { %v1292_v30 = vadd.f32 %v1291_v20, %v1290_v27 }
 0x466   :  { %2915 = vtanh.f32 %v1292_v30 }
 0x470   :  { %v2916_v31 = vpop.eup %2915 }
 0x471   :  { %v1294_v41 = vmul.f32 %v2916_v31, %v2912_v18 }
 0x473   :  { %1367 = vmatmul.mubr.f32.vlgmr.msra.gmra.mrb[8].mxu0 %v1294_v41  ;;  %v2031_v42 = vcombine.low %v3483_v19, %v1294_v41  ;;  %v2032_v43 = vcombine.high %v3483_v19, %v1294_v41  ;;  %1438 = vmatmul.mubr.f32.vlgmr.msra.gmra.mrb[8].mxu1 %v1294_v41 }
 0x474   :  { %2575 = vmatpush1.bf16.msra.mxu0 %v3236_v51  ;;  %2607 = vmatpush1.bf16.msra.mxu1 %v3238_v52 }
 0x475   :  { %v3582_v50 = vrot.slane %v2031_v42, %v3221_v23  ;;  %v3585_v17 = vrot.slane %v2032_v43, %v3221_v23  ;;  %2577 = vmatprep.subr.bf16.mxu0 %v3240_v59  ;;  %2609 = vmatprep.subr.bf16.mxu1 %v3242_v60 }
 0x476   :  { %1543 = vmatprep.mubr.f32.mxu0 %v3128_v0  ;;  %1614 = vmatprep.mubr.f32.mxu1 %v3128_v0 }
 0x477   :  { %v2079_v19 = vcombine.low %v3574_v46, %v3582_v50  ;;  %v2080_v24 = vcombine.high %v3574_v46, %v3582_v50  ;;  %v2095_v53 = vcombine.low %v3579_v49, %v3585_v17  ;;  %v2096_v58 = vcombine.high %v3579_v49, %v3585_v17 }
 0x478   :  { %2579 = vmatpush1.bf16.msra.mxu0 %v3250_v6  ;;  %2611 = vmatpush1.bf16.msra.mxu1 %v3252_v7 }
 0x479   :  { %2581 = vmatprep.subr.bf16.mxu0 %v3256_v12  ;;  %2613 = vmatprep.subr.bf16.mxu1 %v3258_v13 }
 0x47c   :  { %2583 = vmatpush1.bf16.msra.mxu0 %v3278_v28  ;;  %2615 = vmatpush1.bf16.msra.mxu1 %v3280_v29 }
 0x47d   :  { %2585 = vmatprep.subr.bf16.mxu0 %v3290_v38  ;;  %2617 = vmatprep.subr.bf16.mxu1 %v3292_v39 }
 0x480   :  { %2587 = vmatpush1.bf16.msra.mxu0 %v3300_v47  ;;  %2619 = vmatpush1.bf16.msra.mxu1 %v3302_v48 }
 0x481   :  { %2589 = vmatprep.subr.bf16.mxu0 %v3308_v55  ;;  %2621 = vmatprep.subr.bf16.mxu1 %v3310_v56 }
 0x484   :  { %2591 = vmatpush1.bf16.msra.mxu0 %v3320_v3  ;;  %2623 = vmatpush1.bf16.msra.mxu1 %v3322_v4 }
 0x485   :  { %2593 = vmatprep.subr.bf16.mxu0 %v3328_v14  ;;  %2625 = vmatprep.subr.bf16.mxu1 %v3330_v15 }
 0x488   :  { %2595 = vmatpush1.bf16.msra.mxu0 %v3338_v25  ;;  %2627 = vmatpush1.bf16.msra.mxu1 %v3340_v26 }
 0x489   :  { %2597 = vmatprep.subr.bf16.mxu0 %v3346_v34  ;;  %2629 = vmatprep.subr.bf16.mxu1 %v3348_v35 }
 0x48c   :  { %2599 = vmatpush1.bf16.msra.mxu0 %v3354_v44  ;;  %2631 = vmatpush1.bf16.msra.mxu1 %v3356_v45 }
 0x48d   :  { %2601 = vmatprep.subr.bf16.mxu0 %v3362_v54  ;;  %2633 = vmatprep.subr.bf16.mxu1 %v3364_v57 }
 0x490   :  { %2603 = vmatpush1.bf16.msra.mxu0 %v3370_v61  ;;  %2635 = vmatpush1.bf16.msra.mxu1 %v3372_v62 }
 0x491   :  { %2637 = vmatprep.subr.bf16.mxu0 %v3218_v22  ;;  %2669 = vmatprep.subr.bf16.mxu1 %v3231_v36 }
 0x546   :  { %v1368_v63 = vpop.f32.mrb[8].mxu0  ;;  %v1439_v8 = vpop.f32.mrb[8].mxu1 }
 0x547   :  { %v2772_v1 = vadd.f32 %v1368_v63, %v3428_v9  ;;  %v2788_v5 = vadd.f32 %v1439_v8, %v3430_v10  ;;  %v1370_v2 = vpop.f32.mrb[9].mxu0  ;;  %v1441_v16 = vpop.f32.mrb[9].mxu1 }
 0x548   :  { %v2773_v18 = vadd.f32 %v1370_v2, %v3432_v11  ;;  %v2789_v30 = vadd.f32 %v1441_v16, %v3438_v37 }
 0x549   :  { %v2232_v20 = vmul.f32 -1.442695, %v2772_v1  ;;  %v2234_v21 = vmul.f32 -1.442695, %v2788_v5 }
 0x54a   :  { %v2233_v27 = vmul.f32 -1.442695, %v2773_v18 }
 0x54b   :  { %2917 = vpow2.f32 %v2232_v20 }
 0x54c   :  { %2919 = vpow2.f32 %v2234_v21 }
 0x54d   :  { %2921 = vpow2.f32 %v2233_v27 }
 0x54e   :  { %2923 = vtanh.f32 %v2789_v30 }
 0x555   :  { %v2918_v31 = vpop.eup %2917 }
 0x556   :  { %v2920_v33 = vpop.eup %2919  ;;  %v1457_v40 = vadd.f32 1.0, %v2918_v31 }
 0x557   :  { %v2922_v41 = vpop.eup %2921  ;;  %v1459_v42 = vadd.f32 1.0, %v2920_v33 }
 0x558   :  { %2925 = vrcp.f32 %v1457_v40  ;;  %v1458_v43 = vadd.f32 1.0, %v2922_v41  ;;  %v2924_v63 = vpop.eup %2923 }
 0x559   :  { %2927 = vrcp.f32 %v1459_v42 }
 0x55a   :  { %2929 = vrcp.f32 %v1458_v43 }
 0x562   :  { %v2926_v8 = vpop.eup %2925 }
 0x563   :  { %v2928_v1 = vpop.eup %2927  ;;  %v1468_v5 = vmul.f32 %v2926_v8, %v2924_v63 }
 0x564   :  { %v2930_v2 = vpop.eup %2929 }
 0x565   :  { %v1467_v18 = vmul.f32 %v2930_v2, %v2928_v1 }
 0x567   :  { %v1469_v20 = vadd.f32 %v1468_v5, %v1467_v18 }
 0x569   :  { %2931 = vtanh.f32 %v1469_v20 }
 0x573   :  { %v2932_v21 = vpop.eup %2931 }
 0x574   :  { %v3631_v16 = vmul.f32 %v2932_v21, %v2928_v1 }
 0x576   :  { %1544 = vmatmul.mubr.f32.vlgmr.msra.gmra.mrb[10].mxu0 %v3631_v16  ;;  %1615 = vmatmul.mubr.f32.vlgmr.msra.gmra.mrb[10].mxu1 %v3631_v16 }
 0x577   :  { %2639 = vmatpush1.bf16.msra.mxu0 %v3236_v51  ;;  %2671 = vmatpush1.bf16.msra.mxu1 %v3238_v52 }
 0x578   :  { %2641 = vmatprep.subr.bf16.mxu0 %v3240_v59  ;;  %2673 = vmatprep.subr.bf16.mxu1 %v3242_v60 }
 0x579   :  { %1720 = vmatprep.mubr.f32.mxu0 %v3128_v0  ;;  %1791 = vmatprep.mubr.f32.mxu1 %v3128_v0 }
 0x57b   :  { %2643 = vmatpush1.bf16.msra.mxu0 %v3250_v6  ;;  %2675 = vmatpush1.bf16.msra.mxu1 %v3252_v7 }
 0x57c   :  { %2645 = vmatprep.subr.bf16.mxu0 %v3256_v12  ;;  %2677 = vmatprep.subr.bf16.mxu1 %v3258_v13 }
 0x57f   :  { %2647 = vmatpush1.bf16.msra.mxu0 %v3278_v28  ;;  %2679 = vmatpush1.bf16.msra.mxu1 %v3280_v29 }
 0x580   :  { %2649 = vmatprep.subr.bf16.mxu0 %v3290_v38  ;;  %2681 = vmatprep.subr.bf16.mxu1 %v3292_v39 }
 0x583   :  { %2651 = vmatpush1.bf16.msra.mxu0 %v3300_v47  ;;  %2683 = vmatpush1.bf16.msra.mxu1 %v3302_v48 }
 0x584   :  { %2653 = vmatprep.subr.bf16.mxu0 %v3308_v55  ;;  %2685 = vmatprep.subr.bf16.mxu1 %v3310_v56 }
 0x587   :  { %2655 = vmatpush1.bf16.msra.mxu0 %v3320_v3  ;;  %2687 = vmatpush1.bf16.msra.mxu1 %v3322_v4 }
 0x588   :  { %2657 = vmatprep.subr.bf16.mxu0 %v3328_v14  ;;  %2689 = vmatprep.subr.bf16.mxu1 %v3330_v15 }
 0x58b   :  { %2659 = vmatpush1.bf16.msra.mxu0 %v3338_v25  ;;  %2691 = vmatpush1.bf16.msra.mxu1 %v3340_v26 }
 0x58c   :  { %2661 = vmatprep.subr.bf16.mxu0 %v3346_v34  ;;  %2693 = vmatprep.subr.bf16.mxu1 %v3348_v35 }
 0x58f   :  { %2663 = vmatpush1.bf16.msra.mxu0 %v3354_v44  ;;  %2695 = vmatpush1.bf16.msra.mxu1 %v3356_v45 }
 0x590   :  { %2665 = vmatprep.subr.bf16.mxu0 %v3362_v54  ;;  %2697 = vmatprep.subr.bf16.mxu1 %v3364_v57 }
 0x593   :  { %2667 = vmatpush1.bf16.msra.mxu0 %v3370_v61  ;;  %2699 = vmatpush1.bf16.msra.mxu1 %v3372_v62 }
 0x594   :  { %2701 = vmatprep.subr.bf16.mxu0 %v3218_v22  ;;  %2733 = vmatprep.subr.bf16.mxu1 %v3231_v36 }
 0x649   :  { %v1545_v27 = vpop.f32.mrb[10].mxu0  ;;  %v1616_v30 = vpop.f32.mrb[10].mxu1 }
 0x64a   :  { %v2774_v31 = vadd.f32 %v1545_v27, %v3428_v9  ;;  %v2790_v33 = vadd.f32 %v1616_v30, %v3430_v10  ;;  %v1547_v40 = vpop.f32.mrb[11].mxu0  ;;  %v1618_v41 = vpop.f32.mrb[11].mxu1 }
 0x64b   :  { %v2775_v42 = vadd.f32 %v1547_v40, %v3432_v11  ;;  %v2791_v22 = vadd.f32 %v1618_v41, %v3438_v37 }
 0x64c   :  { %v2235_v43 = vmul.f32 -1.442695, %v2774_v31  ;;  %v2237_v63 = vmul.f32 -1.442695, %v2790_v33 }
 0x64d   :  { %v2236_v8 = vmul.f32 -1.442695, %v2775_v42 }
 0x64e   :  { %2933 = vpow2.f32 %v2235_v43 }
 0x64f   :  { %2935 = vpow2.f32 %v2237_v63 }
 0x650   :  { %2937 = vpow2.f32 %v2236_v8 }
 0x651   :  { %2939 = vtanh.f32 %v2791_v22 }
 0x658   :  { %v2934_v1 = vpop.eup %2933 }
 0x659   :  { %v2936_v36 = vpop.eup %2935  ;;  %v1634_v5 = vadd.f32 1.0, %v2934_v1 }
 0x65a   :  { %v2938_v2 = vpop.eup %2937  ;;  %v1636_v18 = vadd.f32 1.0, %v2936_v36 }
 0x65b   :  { %2941 = vrcp.f32 %v1634_v5  ;;  %v1635_v20 = vadd.f32 1.0, %v2938_v2  ;;  %v2940_v21 = vpop.eup %2939 }
 0x65c   :  { %2943 = vrcp.f32 %v1636_v18 }
 0x65d   :  { %2945 = vrcp.f32 %v1635_v20 }
 0x665   :  { %v2942_v27 = vpop.eup %2941 }
 0x666   :  { %v2944_v30 = vpop.eup %2943  ;;  %v1645_v31 = vmul.f32 %v2942_v27, %v2940_v21 }
 0x667   :  { %v2946_v33 = vpop.eup %2945 }
 0x668   :  { %v1644_v40 = vmul.f32 %v2946_v33, %v2944_v30 }
 0x66a   :  { %v1646_v42 = vadd.f32 %v1645_v31, %v1644_v40 }
 0x66c   :  { %2947 = vtanh.f32 %v1646_v42 }
 0x676   :  { %v2948_v43 = vpop.eup %2947 }
 0x677   :  { %v3673_v41 = vmul.f32 %v2948_v43, %v2944_v30 }
 0x679   :  { %1721 = vmatmul.mubr.f32.vlgmr.msra.gmra.mrb[12].mxu0 %v3673_v41  ;;  %1792 = vmatmul.mubr.f32.vlgmr.msra.gmra.mrb[12].mxu1 %v3673_v41 }
 0x67a   :  { %2703 = vmatpush1.bf16.msra.mxu0 %v3236_v51  ;;  %2735 = vmatpush1.bf16.msra.mxu1 %v3238_v52 }
 0x67b   :  { %2705 = vmatprep.subr.bf16.mxu0 %v3240_v59  ;;  %2737 = vmatprep.subr.bf16.mxu1 %v3242_v60 }
 0x67c   :  { %1897 = vmatprep.mubr.f32.mxu0 %v3128_v0  ;;  %1968 = vmatprep.mubr.f32.mxu1 %v3128_v0 }
 0x67e   :  { %2707 = vmatpush1.bf16.msra.mxu0 %v3250_v6  ;;  %2739 = vmatpush1.bf16.msra.mxu1 %v3252_v7 }
 0x67f   :  { %2709 = vmatprep.subr.bf16.mxu0 %v3256_v12  ;;  %2741 = vmatprep.subr.bf16.mxu1 %v3258_v13 }
 0x682   :  { %2711 = vmatpush1.bf16.msra.mxu0 %v3278_v28  ;;  %2743 = vmatpush1.bf16.msra.mxu1 %v3280_v29 }
 0x683   :  { %2713 = vmatprep.subr.bf16.mxu0 %v3290_v38  ;;  %2745 = vmatprep.subr.bf16.mxu1 %v3292_v39 }
 0x686   :  { %2715 = vmatpush1.bf16.msra.mxu0 %v3300_v47  ;;  %2747 = vmatpush1.bf16.msra.mxu1 %v3302_v48 }
 0x687   :  { %2717 = vmatprep.subr.bf16.mxu0 %v3308_v55  ;;  %2749 = vmatprep.subr.bf16.mxu1 %v3310_v56 }
 0x68a   :  { %2719 = vmatpush1.bf16.msra.mxu0 %v3320_v3  ;;  %2751 = vmatpush1.bf16.msra.mxu1 %v3322_v4 }
 0x68b   :  { %2721 = vmatprep.subr.bf16.mxu0 %v3328_v14  ;;  %2753 = vmatprep.subr.bf16.mxu1 %v3330_v15 }
 0x68e   :  { %2723 = vmatpush1.bf16.msra.mxu0 %v3338_v25  ;;  %2755 = vmatpush1.bf16.msra.mxu1 %v3340_v26 }
 0x68f   :  { %2725 = vmatprep.subr.bf16.mxu0 %v3346_v34  ;;  %2757 = vmatprep.subr.bf16.mxu1 %v3348_v35 }
 0x692   :  { %2727 = vmatpush1.bf16.msra.mxu0 %v3354_v44  ;;  %2759 = vmatpush1.bf16.msra.mxu1 %v3356_v45 }
 0x693   :  { %2729 = vmatprep.subr.bf16.mxu0 %v3362_v54  ;;  %2761 = vmatprep.subr.bf16.mxu1 %v3364_v57 }
 0x696   :  { %2731 = vmatpush1.bf16.msra.mxu0 %v3370_v61  ;;  %2763 = vmatpush1.bf16.msra.mxu1 %v3372_v62 }
 0x74c   :  { %v1722_v0 = vpop.f32.mrb[12].mxu0  ;;  %v1793_v51 = vpop.f32.mrb[12].mxu1 }
 0x74d   :  { %v2776_v52 = vadd.f32 %v1722_v0, %v3428_v9  ;;  %v2792_v59 = vadd.f32 %v1793_v51, %v3430_v10  ;;  %v1724_v60 = vpop.f32.mrb[13].mxu0  ;;  %v1795_v6 = vpop.f32.mrb[13].mxu1 }
 0x74e   :  { %v2777_v7 = vadd.f32 %v1724_v60, %v3432_v11  ;;  %v2793_v29 = vadd.f32 %v1795_v6, %v3438_v37 }
 0x74f   :  { %v2238_v12 = vmul.f32 -1.442695, %v2776_v52  ;;  %v2240_v13 = vmul.f32 -1.442695, %v2792_v59 }
 0x750   :  { %v2239_v28 = vmul.f32 -1.442695, %v2777_v7 }
 0x751   :  { %2949 = vpow2.f32 %v2238_v12 }
 0x752   :  { %2951 = vpow2.f32 %v2240_v13 }
 0x753   :  { %2953 = vpow2.f32 %v2239_v28 }
 0x754   :  { %2955 = vtanh.f32 %v2793_v29 }
 0x75b   :  { %v2950_v38 = vpop.eup %2949 }
 0x75c   :  { %v2952_v39 = vpop.eup %2951  ;;  %v1811_v47 = vadd.f32 1.0, %v2950_v38 }
 0x75d   :  { %v2954_v48 = vpop.eup %2953  ;;  %v1813_v55 = vadd.f32 1.0, %v2952_v39 }
 0x75e   :  { %2957 = vrcp.f32 %v1811_v47  ;;  %v1812_v56 = vadd.f32 1.0, %v2954_v48  ;;  %v2956_v3 = vpop.eup %2955 }
 0x75f   :  { %2959 = vrcp.f32 %v1813_v55 }
 0x760   :  { %2961 = vrcp.f32 %v1812_v56 }
 0x768   :  { %v2958_v4 = vpop.eup %2957 }
 0x769   :  { %v2960_v14 = vpop.eup %2959  ;;  %v1822_v15 = vmul.f32 %v2958_v4, %v2956_v3 }
 0x76a   :  { %v2962_v25 = vpop.eup %2961 }
 0x76b   :  { %v1821_v26 = vmul.f32 %v2962_v25, %v2960_v14 }
 0x76d   :  { %v1823_v34 = vadd.f32 %v1822_v15, %v1821_v26 }
 0x76f   :  { %2963 = vtanh.f32 %v1823_v34 }
 0x779   :  { %v2964_v35 = vpop.eup %2963 }
 0x77a   :  { %v3713_v44 = vmul.f32 %v2964_v35, %v2960_v14 }
 0x77c   :  { %1898 = vmatmul.mubr.f32.vlgmr.msra.gmra.mrb[14].mxu0 %v3713_v44  ;;  %1969 = vmatmul.mubr.f32.vlgmr.msra.gmra.mrb[14].mxu1 %v3713_v44  ;;  %v2047_v43 = vcombine.low %v3631_v16, %v3713_v44  ;;  %v2048_v0 = vcombine.high %v3631_v16, %v3713_v44 }
 0x84f   :  { %v1899_v45 = vpop.f32.mrb[14].mxu0  ;;  %v1970_v54 = vpop.f32.mrb[14].mxu1 }
 0x850   :  { %v2778_v57 = vadd.f32 %v1899_v45, %v3428_v9  ;;  %v2794_v61 = vadd.f32 %v1970_v54, %v3430_v10  ;;  %v1901_v62 = vpop.f32.mrb[15].mxu0  ;;  %v1972_v63 = vpop.f32.mrb[15].mxu1 }
 0x851   :  { %v2779_v8 = vadd.f32 %v1901_v62, %v3432_v11  ;;  %v2795_v5 = vadd.f32 %v1972_v63, %v3438_v37 }
 0x852   :  { %v2241_v22 = vmul.f32 -1.442695, %v2778_v57  ;;  %v2243_v1 = vmul.f32 -1.442695, %v2794_v61 }
 0x853   :  { %v2242_v36 = vmul.f32 -1.442695, %v2779_v8 }
 0x854   :  { %2965 = vpow2.f32 %v2241_v22 }
 0x855   :  { %2967 = vpow2.f32 %v2243_v1 }
 0x856   :  { %2969 = vpow2.f32 %v2242_v36 }
 0x857   :  { %2971 = vtanh.f32 %v2795_v5 }
 0x85e   :  { %v2966_v2 = vpop.eup %2965 }
 0x85f   :  { %v2968_v18 = vpop.eup %2967  ;;  %v1988_v20 = vadd.f32 1.0, %v2966_v2 }
 0x860   :  { %v2970_v21 = vpop.eup %2969  ;;  %v1990_v27 = vadd.f32 1.0, %v2968_v18 }
 0x861   :  { %2973 = vrcp.f32 %v1988_v20  ;;  %v1989_v9 = vadd.f32 1.0, %v2970_v21  ;;  %v2972_v10 = vpop.eup %2971 }
 0x862   :  { %2975 = vrcp.f32 %v1990_v27 }
 0x863   :  { %2977 = vrcp.f32 %v1989_v9 }
 0x86b   :  { %v2974_v11 = vpop.eup %2973 }
 0x86c   :  { %v2976_v30 = vpop.eup %2975  ;;  %v1999_v31 = vmul.f32 %v2974_v11, %v2972_v10 }
 0x86d   :  { %v2978_v33 = vpop.eup %2977 }
 0x86e   :  { %v1998_v40 = vmul.f32 %v2978_v33, %v2976_v30 }
 0x870   :  { %v2000_v42 = vadd.f32 %v1999_v31, %v1998_v40 }
 0x872   :  { %2979 = vtanh.f32 %v2000_v42  ;;  %2006 = vst [vmem:[#allocation13] sm:$0xff] %v2000_v42 }
 0x87c   :  { %v2980_v37 = vpop.eup %2979 }
 0x87d   :  { %v2002_v51 = vmul.f32 %v2980_v37, %v2976_v30 }
 0x87f   :  { %2005 = vst [vmem:[#allocation11] sm:$0xff] %v2002_v51  ;;  %v2063_v52 = vcombine.low %v3673_v41, %v2002_v51  ;;  %v2064_v59 = vcombine.high %v3673_v41, %v2002_v51 }
 0x880   :  { %3058 = shalt.err (!%p3055_p0)
}
 0x881   :  { %s3059_s18 = scalar_lea.hbm %s3802_s5, 128 }
 0x882   :  { %p3060_p1 = scmp.ne.s32.totalorder %s3802_s5, %s3059_s18  ;;  %p3063_p2 = scmp.lt.u32.totalorder %s3059_s18, %s3802_s5 }
 0x884   :  { %p3065_p3 = pnand %p3063_p2, %p3060_p1 }
 0x886   :  { %3068 = shalt.err (!%p3065_p3)
}
 0x887   :  { %2180 = dma.vmem_to_hbm [thread:$0]  %s2178_s8, 128, %s3802_s5, [#allocation12]   ;;  %v2055_v16 = vrot.slane %v2047_v43, %v3221_v23  ;;  %v2062_v41 = vrot.slane %v2048_v0, %v3221_v23  ;;  %v2071_v60 = vrot.slane %v2063_v52, %v3221_v23  ;;  %v2078_v6 = vrot.slane %v2064_v59, %v3221_v23 }
 0x888   :  { %s3069_s26 = scalar_lea.vmem %s3725_s14, 128  ;;  %p3074_p5 = scmp.lt.s32.totalorder %s3725_s14, %s3725_s14 }
 0x889   :  { %p3070_p4 = scmp.ne.s32.totalorder %s3725_s14, %s3069_s26  ;;  %p3075_p6 = scmp.lt.s32.totalorder %s3069_s26, %s3069_s26 }
 0x88b   :  { %p3076_p7 = por %p3075_p6, %p3074_p5 }
 0x88d   :  { %p3077_p8 = pnand %p3076_p7, %p3070_p4 }
 0x88f   :  { %3080 = shalt.err (!%p3077_p8)
}
 0x890   :  { %s3081_s5 = scalar_lea.hbm %s3803_s6, 128 }
 0x891   :  { %p3082_p9 = scmp.ne.s32.totalorder %s3803_s6, %s3081_s5  ;;  %p3085_p10 = scmp.lt.u32.totalorder %s3081_s5, %s3803_s6 }
 0x893   :  { %p3087_p11 = pnand %p3085_p10, %p3082_p9 }
 0x895   :  { %3090 = shalt.err (!%p3087_p11)
}
 0x896   :  { %2190 = dma.vmem_to_hbm [thread:$0]  %s3725_s14, 128, %s3803_s6, [#allocation12]   ;;  %v2111_v23 = vcombine.low %v2055_v16, %v2071_v60  ;;  %v2112_v7 = vcombine.high %v2055_v16, %v2071_v60  ;;  %v2127_v12 = vcombine.low %v2062_v41, %v2078_v6  ;;  %v2128_v13 = vcombine.high %v2062_v41, %v2078_v6 }
 0x897   :  { %v2087_v28 = vrot.slane %v2079_v19, %v3228_v32  ;;  %v2094_v29 = vrot.slane %v2080_v24, %v3228_v32  ;;  %s3133_s6 = smov [#allocation10]   ;;  %v2103_v19 = vrot.slane %v2095_v53, %v3228_v32  ;;  %v2110_v46 = vrot.slane %v2096_v58, %v3228_v32 }
 0x898   :  { %v2119_v38 = vrot.slane %v2111_v23, %v3228_v32  ;;  %v2126_v39 = vrot.slane %v2112_v7, %v3228_v32  ;;  %v2135_v47 = vrot.slane %v2127_v12, %v3228_v32  ;;  %v2142_v48 = vrot.slane %v2128_v13, %v3228_v32  ;;  %s2164_s12 = sshll.u32 %s3133_s6, 4  ;;  %s2165_s12 = int_to_ptr.vmem [resolvable:$true] %s2164_s12 }
 0x899   :  { %s3091_s2 = scalar_lea.vmem %s2165_s12, 1024  ;;  %p3096_p13 = scmp.lt.s32.totalorder %s2165_s12, %s2165_s12 }
 0x89a   :  { %v2143_v50 = vcombine.low %v2087_v28, %v2119_v38  ;;  %v2144_v24 = vcombine.high %v2087_v28, %v2119_v38  ;;  %v2145_v55 = vcombine.low %v2094_v29, %v2126_v39  ;;  %v2146_v56 = vcombine.high %v2094_v29, %v2126_v39  ;;  %p3092_p12 = scmp.ne.s32.totalorder %s2165_s12, %s3091_s2  ;;  %p3097_p0 = scmp.lt.s32.totalorder %s3091_s2, %s3091_s2 }
 0x89b   :  { %v2147_v3 = vcombine.low %v2103_v19, %v2135_v47  ;;  %v2148_v4 = vcombine.high %v2103_v19, %v2135_v47  ;;  %v2149_v14 = vcombine.low %v2110_v46, %v2142_v48  ;;  %v2150_v15 = vcombine.high %v2110_v46, %v2142_v48 }
 0x89c   :  { %2151 = vst [vmem:[#allocation10] sm:$0xff] %v2143_v50  ;;  %2152 = vst [vmem:[#allocation10 + $0x8] sm:$0xff] %v2144_v24  ;;  %p3098_p1 = por %p3097_p0, %p3096_p13 }
 0x89d   :  { %2153 = vst [vmem:[#allocation10 + $0x10] sm:$0xff] %v2145_v55  ;;  %2154 = vst [vmem:[#allocation10 + $0x18] sm:$0xff] %v2146_v56 }
 0x89e   :  { %2155 = vst [vmem:[#allocation10 + $0x20] sm:$0xff] %v2147_v3  ;;  %2156 = vst [vmem:[#allocation10 + $0x28] sm:$0xff] %v2148_v4  ;;  %p3099_p2 = pnand %p3098_p1, %p3092_p12 }
 0x89f   :  { %2157 = vst [vmem:[#allocation10 + $0x30] sm:$0xff] %v2149_v14  ;;  %2158 = vst [vmem:[#allocation10 + $0x38] sm:$0xff] %v2150_v15 }
 0x8a0   :  { %3102 = shalt.err (!%p3099_p2)
}
 0x8a1   :  { %s3103_s8 = scalar_lea.hbm %s3801_s4, 1024 }
 0x8a2   :  { %p3104_p3 = scmp.ne.s32.totalorder %s3801_s4, %s3103_s8  ;;  %p3107_p4 = scmp.lt.u32.totalorder %s3103_s8, %s3801_s4 }
 0x8a4   :  { %p3109_p5 = pnand %p3107_p4, %p3104_p3 }
 0x8a6   :  { %3112 = shalt.err (!%p3109_p5)
}
 0x8a7   :  { %2170 = dma.vmem_to_hbm [thread:$0]  %s2165_s12, 1024, %s3801_s4, [#allocation6], %s3125_s1, %s3125_s1, %s3126_s21  }
 0x8a8   :  { %3117 = dma.done.wait [#allocation6], 1024  }
 0x8a9   :  { %3118 = vsyncadd [#allocation6], 4294966272 }
 0x8aa   :  { %3119 = dma.done.wait [#allocation12], 256  }
 0x8ab   :  { %3120 = vsyncadd [#allocation12], 4294967040 }
 0x8ac   :  { %2200 = vsyncpa [#allocation5], 1 }
 0x8ad   :  { %2201 = vsyncpa [#allocation8], 1 }
 0x8ae   :  { %2202 = vsyncpa [#allocation6], 1 }
 0x8af   :  { %2203 = vsyncpa [#allocation12], 1 }

// kernel: tpu_custom_call.1
= control target key start
LH: loop header
LB: loop body
LE: loop exit
PB: predicated region body
PF: predicated region fallthrough
CT: control target
= control target key end

     0   :  { %12 = vsyncpa [#allocation5], 0  ;;  %s3797_s0 = inlined_call_operand.hbm [shape: f32[8,8,16], index: 0, kind: input, shape index: {}]   ;;  %s3798_s1 = inlined_call_operand.hbm [shape: f32[16,512], index: 1, kind: input, shape index: {}]   ;;  %s3799_s2 = inlined_call_operand.hbm [shape: f32[128,512], index: 2, kind: input, shape index: {}]   ;;  %s3800_s3 = inlined_call_operand.vmem [shape: f32[1,512], index: 3, kind: input, shape index: {}]   ;;  %s3801_s4 = inlined_call_operand.hbm [shape: f32[8,8,128], index: 4, kind: output, shape index: {0}]   ;;  %s3802_s5 = inlined_call_operand.hbm [shape: f32[8,128], index: 5, kind: output, shape index: {1}]   ;;  %s3803_s6 = inlined_call_operand.hbm [shape: f32[8,128], index: 6, kind: output, shape index: {2}]  }
   0x1   :  { %13 = vsyncpa [#allocation8], 0 }
   0x2   :  { %14 = vsyncpa [#allocation6], 0 }
   0x3   :  { %15 = vsyncpa [#allocation12], 0  ;;  %s3121_s21 = smov [#allocation7]   ;;  %s2981_s25 = scalar_lea.hbm %s3798_s1, 1024 }
   0x4   :  { %s33_s22 = sshll.u32 %s3121_s21, 4  ;;  %p2982_p0 = scmp.ne.s32.totalorder %s3798_s1, %s2981_s25  ;;  %s34_s22 = int_to_ptr.vmem [resolvable:$true] %s33_s22 }
   0x5   :  { %p2985_p1 = scmp.lt.u32.totalorder %s2981_s25, %s3798_s1 }
   0x7   :  { %p2987_p2 = pnand %p2985_p1, %p2982_p0 }
   0x9   :  { %2990 = shalt.err (!%p2987_p2)
}
   0xa   :  { %s2991_s30 = scalar_lea.vmem %s34_s22, 1024  ;;  %p2996_p4 = scmp.lt.s32.totalorder %s34_s22, %s34_s22 }
   0xb   :  { %p2992_p3 = scmp.ne.s32.totalorder %s34_s22, %s2991_s30  ;;  %p2997_p5 = scmp.lt.s32.totalorder %s2991_s30, %s2991_s30 }
   0xd   :  { %p2998_p6 = por %p2997_p5, %p2996_p4 }
   0xf   :  { %p2999_p7 = pnand %p2998_p6, %p2992_p3 }
  0x11   :  { %3002 = shalt.err (!%p2999_p7)
}
  0x12   :  { %s3122_s7 = smov 512   ;;  %s3123_s8 = smov 32  }
  0x13   :  { %39 = dma.hbm_to_vmem [thread:$0]  %s3798_s1, 1024, %s34_s22, [#allocation8], %s3122_s7, %s3122_s7, %s3123_s8  }
  0x14   :  { %s3124_s11 = smov [#allocation4]   ;;  %s3003_s15 = scalar_lea.hbm %s3797_s0, 1024 }
  0x15   :  { %s21_s12 = sshll.u32 %s3124_s11, 4  ;;  %p3004_p8 = scmp.ne.s32.totalorder %s3797_s0, %s3003_s15  ;;  %s22_s12 = int_to_ptr.vmem [resolvable:$true] %s21_s12 }
  0x16   :  { %p3007_p9 = scmp.lt.u32.totalorder %s3003_s15, %s3797_s0 }
  0x18   :  { %p3009_p10 = pnand %p3007_p9, %p3004_p8 }
  0x1a   :  { %3012 = shalt.err (!%p3009_p10)
}
  0x1b   :  { %s3013_s20 = scalar_lea.vmem %s22_s12, 1024  ;;  %p3018_p12 = scmp.lt.s32.totalorder %s22_s12, %s22_s12 }
  0x1c   :  { %p3014_p11 = scmp.ne.s32.totalorder %s22_s12, %s3013_s20  ;;  %p3019_p13 = scmp.lt.s32.totalorder %s3013_s20, %s3013_s20 }
  0x1e   :  { %p3020_p0 = por %p3019_p13, %p3018_p12 }
  0x20   :  { %p3021_p1 = pnand %p3020_p0, %p3014_p11 }
  0x22   :  { %3024 = shalt.err (!%p3021_p1)
}
  0x23   :  { %s3125_s1 = smov 128   ;;  %s3126_s21 = smov 8  }
  0x24   :  { %27 = dma.hbm_to_vmem [thread:$0]  %s3797_s0, 1024, %s22_s12, [#allocation5], %s3125_s1, %s3125_s1, %s3126_s21  }
  0x25   :  { %s3127_s24 = smov [#allocation9]   ;;  %s3025_s28 = scalar_lea.hbm %s3799_s2, 8192 }
  0x26   :  { %s45_s25 = sshll.u32 %s3127_s24, 4  ;;  %p3026_p2 = scmp.ne.s32.totalorder %s3799_s2, %s3025_s28  ;;  %s46_s25 = int_to_ptr.vmem [resolvable:$true] %s45_s25 }
  0x27   :  { %p3029_p3 = scmp.lt.u32.totalorder %s3025_s28, %s3799_s2 }
  0x29   :  { %p3031_p4 = pnand %p3029_p3, %p3026_p2 }
  0x2b   :  { %3034 = shalt.err (!%p3031_p4)
}
  0x2c   :  { %s3035_s11 = scalar_lea.vmem %s46_s25, 8192  ;;  %p3040_p6 = scmp.lt.s32.totalorder %s46_s25, %s46_s25 }
  0x2d   :  { %p3036_p5 = scmp.ne.s32.totalorder %s46_s25, %s3035_s11  ;;  %p3041_p7 = scmp.lt.s32.totalorder %s3035_s11, %s3035_s11 }
  0x2f   :  { %p3042_p8 = por %p3041_p7, %p3040_p6 }
  0x31   :  { %p3043_p9 = pnand %p3042_p8, %p3036_p5 }
  0x33   :  { %3046 = shalt.err (!%p3043_p9)
}
  0x34   :  { %51 = dma.hbm_to_vmem [thread:$0]  %s3799_s2, 8192, %s46_s25, [#allocation8], %s3122_s7, %s3122_s7, %s3123_s8  }
  0x35   :  { %3113 = dma.done.wait [#allocation5], 1024  }
  0x36   :  { %3114 = vsyncadd [#allocation5], 4294966272 }
  0x37   :  { %3115 = dma.done.wait [#allocation8], 9216  }
  0x38   :  { %3116 = vsyncadd [#allocation8], 4294958080  ;;  %v3128_v0 = vmov 0.0   ;;  %v3129_v1 = vmov 1983009808   ;;  %v82_v3 = vlaneseq  ;;  %v214_v4 = vld [vmem:[#allocation7 + $0x8] sm:$0xff] }
  0x39   :  { %332 = vmatprep.mubr.f32.mxu0 %v3128_v0  ;;  %445 = vmatprep.mubr.f32.mxu1 %v3128_v0  ;;  %v80_v2 = vunpack.c.l.s4 %v3129_v1  ;;  %v218_v5 = vld [vmem:[#allocation7 + $0x28] sm:$0xff]  ;;  %v213_v6 = vld [vmem:[#allocation7] sm:$0xff]  ;;  %v3130_v9 = vmov 1934713408   ;;  %v216_v13 = vld [vmem:[#allocation7 + $0x18] sm:$0xff]  ;;  %vm243_vm0 = vcmask 130048  }
  0x3a   :  { %v3216_v8 = vshrl.u32 %v82_v3, 7  ;;  %v144_v10 = vunpack.c.l.s4 %v3130_v9  ;;  %v2244_v11 = vpack.c.bf16 %v218_v5, %v214_v4  ;;  %v217_v12 = vld [vmem:[#allocation7 + $0x20] sm:$0xff]  ;;  %v220_v14 = vld [vmem:[#allocation7 + $0x38] sm:$0xff]  ;;  %v215_v17 = vld [vmem:[#allocation7 + $0x10] sm:$0xff]  ;;  %s3132_s13 = smov [#allocation13]  }
  0x3b   :  { %v81_v7 = vunpack.c.0.s8 %v80_v2  ;;  %v2246_v15 = vpack.c.bf16 %v217_v12, %v213_v6  ;;  %v2248_v16 = vpack.c.bf16 %v220_v14, %v216_v13  ;;  %v219_v18 = vld [vmem:[#allocation7 + $0x30] sm:$0xff]  ;;  %v527_v19 = vld [vmem:[#allocation9 + $0x8] sm:$0xff]  ;;  %v529_v33 = vld [vmem:[#allocation9 + $0x18] sm:$0xff]  ;;  %s2187_s14 = sshll.u32 %s3132_s13, 4  ;;  %s3725_s14 = int_to_ptr.vmem [resolvable:$true] %s2187_s14 }
  0x3c   :  { %2245 = vmatprep.subr.bf16.mxu0 %v2244_v11  ;;  %v2250_v20 = vpack.c.bf16 %v219_v18, %v215_v17  ;;  %v531_v21 = vld [vmem:[#allocation9 + $0x28] sm:$0xff]  ;;  %v145_v24 = vunpack.c.0.s8 %v144_v10  ;;  %v2841_v25 = vld [vmem:[#allocation4] ss:$16 sps:$4 sm:$0xff]   ;;  %v533_v34 = vld [vmem:[#allocation9 + $0x38] sm:$0xff] }
  0x3d   :  { %2247 = vmatpush1.bf16.msra.mxu0 %v2246_v15  ;;  %2249 = vmatprep.subr.bf16.mxu1 %v2248_v16  ;;  %v3218_v22 = vpack.c.bf16 %v531_v21, %v527_v19  ;;  %v3221_v23 = vsub.s32 %v81_v7, %v3216_v8  ;;  %v2843_v26 = vld [vmem:[#allocation4 + $0x8] ss:$16 sps:$4 sm:$0xff]   ;;  %v2845_v27 = vld [vmem:[#allocation4 + $0x20] ss:$16 sps:$4 sm:$0xff]   ;;  %v3231_v36 = vpack.c.bf16 %v533_v34, %v529_v33  ;;  %v2849_v9 = vld [vmem:[#allocation4 + $0x4] ss:$16 sps:$4 sm:$0xff]  }
  0x3e   :  { %2251 = vmatpush1.bf16.msra.mxu1 %v2250_v20  ;;  %v2847_v28 = vld [vmem:[#allocation4 + $0x28] ss:$16 sps:$4 sm:$0xff]   ;;  %v3228_v32 = vsub.s32 %v145_v24, %v3216_v8  ;;  %v526_v38 = vld [vmem:[#allocation9] sm:$0xff]  ;;  %v528_v41 = vld [vmem:[#allocation9 + $0x10] sm:$0xff] }
  0x3f   :  { %2253 = vmatprep.subr.bf16.mxu0 %v3218_v22  ;;  %v85_v29 = vrot.slane %v2841_v25, %v3221_v23  ;;  %v101_v30 = vrot.slane %v2843_v26, %v3221_v23  ;;  %v117_v31 = vrot.slane %v2845_v27, %v3221_v23  ;;  %v133_v35 = vrot.slane %v2847_v28, %v3221_v23  ;;  %v530_v40 = vld [vmem:[#allocation9 + $0x20] sm:$0xff]  ;;  %v532_v42 = vld [vmem:[#allocation9 + $0x30] sm:$0xff]  ;;  %v535_v44 = vld [vmem:[#allocation9 + $0x48] sm:$0xff] }
  0x40   :  { %2285 = vmatprep.subr.bf16.mxu1 %v3231_v36  ;;  %v539_v46 = vld [vmem:[#allocation9 + $0x68] sm:$0xff]  ;;  %v537_v47 = vld [vmem:[#allocation9 + $0x58] sm:$0xff]  ;;  %v3236_v51 = vpack.c.bf16 %v530_v40, %v526_v38  ;;  %v3238_v52 = vpack.c.bf16 %v532_v42, %v528_v41  ;;  %v534_v53 = vld [vmem:[#allocation9 + $0x40] sm:$0xff]  ;;  %v3263_v18 = vrot.slane %v2849_v9, %v3221_v23 }
  0x41   :  { %v141_v37 = vcombine.low %v85_v29, %v101_v30  ;;  %v173_v39 = vcombine.low %v117_v31, %v133_v35  ;;  %v541_v48 = vld [vmem:[#allocation9 + $0x78] sm:$0xff]  ;;  %v142_v49 = vcombine.high %v85_v29, %v101_v30  ;;  %v174_v50 = vcombine.high %v117_v31, %v133_v35  ;;  %v538_v54 = vld [vmem:[#allocation9 + $0x60] sm:$0xff]  ;;  %v536_v56 = vld [vmem:[#allocation9 + $0x50] sm:$0xff] }
  0x42   :  { %v540_v57 = vld [vmem:[#allocation9 + $0x70] sm:$0xff]  ;;  %v543_v58 = vld [vmem:[#allocation9 + $0x88] sm:$0xff]  ;;  %v3240_v59 = vpack.c.bf16 %v539_v46, %v535_v44  ;;  %v3242_v60 = vpack.c.bf16 %v541_v48, %v537_v47  ;;  %v545_v62 = vld [vmem:[#allocation9 + $0x98] sm:$0xff]  ;;  %v3250_v6 = vpack.c.bf16 %v538_v54, %v534_v53 }
  0x43   :  { %v149_v43 = vrot.slane %v141_v37, %v3228_v32  ;;  %v181_v45 = vrot.slane %v173_v39, %v3228_v32  ;;  %v547_v61 = vld [vmem:[#allocation9 + $0xa8] sm:$0xff]  ;;  %v549_v63 = vld [vmem:[#allocation9 + $0xb8] sm:$0xff]  ;;  %v156_v2 = vrot.slane %v142_v49, %v3228_v32  ;;  %v188_v3 = vrot.slane %v174_v50, %v3228_v32  ;;  %v542_v4 = vld [vmem:[#allocation9 + $0x80] sm:$0xff] }
  0x44   :  { %v546_v5 = vld [vmem:[#allocation9 + $0xa0] sm:$0xff]  ;;  %v3252_v7 = vpack.c.bf16 %v540_v57, %v536_v56  ;;  %v2850_v10 = vld [vmem:[#allocation4 + $0xc] ss:$16 sps:$4 sm:$0xff]   ;;  %v3256_v12 = vpack.c.bf16 %v547_v61, %v543_v58  ;;  %v3258_v13 = vpack.c.bf16 %v549_v63, %v545_v62  ;;  %v544_v14 = vld [vmem:[#allocation9 + $0x90] sm:$0xff] }
  0x45   :  { %v205_v55 = vcombine.low %v149_v43, %v181_v45  ;;  %v206_v1 = vcombine.high %v149_v43, %v181_v45  ;;  %v2851_v11 = vld [vmem:[#allocation4 + $0x24] ss:$16 sps:$4 sm:$0xff]   ;;  %v2852_v16 = vld [vmem:[#allocation4 + $0x2c] ss:$16 sps:$4 sm:$0xff]   ;;  %v3266_v19 = vrot.slane %v2850_v10, %v3221_v23  ;;  %v207_v21 = vcombine.low %v156_v2, %v188_v3 }
  0x46   :  { %v548_v15 = vld [vmem:[#allocation9 + $0xb0] sm:$0xff]  ;;  %v551_v17 = vld [vmem:[#allocation9 + $0xc8] sm:$0xff]  ;;  %v3269_v20 = vrot.slane %v2851_v11, %v3221_v23  ;;  %v553_v25 = vld [vmem:[#allocation9 + $0xd8] sm:$0xff]  ;;  %v3274_v27 = vrot.slane %v2852_v16, %v3221_v23  ;;  %v3278_v28 = vpack.c.bf16 %v546_v5, %v542_v4  ;;  %v208_v41 = vcombine.high %v156_v2, %v188_v3 }
  0x47   :  { %2204 = vmatmul.mubr.msk.f32.vlgmr.msra.gmra.mrb[0].mxu0 %vm243_vm0, %v205_v55  ;;  %2212 = vmatmul.mubr.msk.f32.vlgmr.msra.gmra.mrb[0].mxu1 %vm243_vm0, %v205_v55  ;;  %v555_v24 = vld [vmem:[#allocation9 + $0xe8] sm:$0xff]  ;;  %v557_v26 = vld [vmem:[#allocation9 + $0xf8] sm:$0xff]  ;;  %v3280_v29 = vpack.c.bf16 %v548_v15, %v544_v14  ;;  %v550_v30 = vld [vmem:[#allocation9 + $0xc0] sm:$0xff]  ;;  %v157_v31 = vcombine.low %v3263_v18, %v3266_v19 }
  0x48   :  { %2255 = vmatpush1.bf16.msra.mxu0 %v3236_v51  ;;  %2287 = vmatpush1.bf16.msra.mxu1 %v3238_v52  ;;  %v554_v33 = vld [vmem:[#allocation9 + $0xe0] sm:$0xff]  ;;  %v552_v34 = vld [vmem:[#allocation9 + $0xd0] sm:$0xff]  ;;  %v189_v37 = vcombine.low %v3269_v20, %v3274_v27  ;;  %v3290_v38 = vpack.c.bf16 %v555_v24, %v551_v17  ;;  %v3292_v39 = vpack.c.bf16 %v557_v26, %v553_v25  ;;  %v559_v40 = vld [vmem:[#allocation9 + $0x108] sm:$0xff] }
  0x49   :  { %338 = vmatprep.mubr.f32.mxu0 %v3128_v0  ;;  %451 = vmatprep.mubr.f32.mxu1 %v3128_v0  ;;  %v556_v35 = vld [vmem:[#allocation9 + $0xf0] sm:$0xff]  ;;  %v563_v42 = vld [vmem:[#allocation9 + $0x128] sm:$0xff]  ;;  %v165_v43 = vrot.slane %v157_v31, %v3228_v32  ;;  %v561_v45 = vld [vmem:[#allocation9 + $0x118] sm:$0xff]  ;;  %v3300_v47 = vpack.c.bf16 %v554_v33, %v550_v30  ;;  %v190_v2 = vcombine.high %v3269_v20, %v3274_v27 }
  0x4a   :  { %2257 = vmatprep.subr.bf16.mxu0 %v3240_v59  ;;  %2289 = vmatprep.subr.bf16.mxu1 %v3242_v60  ;;  %v197_v44 = vrot.slane %v189_v37, %v3228_v32  ;;  %v565_v46 = vld [vmem:[#allocation9 + $0x138] sm:$0xff]  ;;  %v3302_v48 = vpack.c.bf16 %v556_v35, %v552_v34  ;;  %v558_v49 = vld [vmem:[#allocation9 + $0x100] sm:$0xff]  ;;  %v560_v53 = vld [vmem:[#allocation9 + $0x110] sm:$0xff]  ;;  %v3308_v55 = vpack.c.bf16 %v563_v42, %v559_v40 }
  0x4b   :  { %2205 = vmatmul.mubr.msk.f32.gmra.mrb[2].mxu0 %vm243_vm0, %v206_v1  ;;  %2213 = vmatmul.mubr.msk.f32.gmra.mrb[2].mxu1 %vm243_vm0, %v206_v1  ;;  %v562_v50 = vld [vmem:[#allocation9 + $0x120] sm:$0xff]  ;;  %v564_v54 = vld [vmem:[#allocation9 + $0x130] sm:$0xff]  ;;  %v3310_v56 = vpack.c.bf16 %v565_v46, %v561_v45  ;;  %v567_v57 = vld [vmem:[#allocation9 + $0x148] sm:$0xff]  ;;  %v158_v1 = vcombine.high %v3263_v18, %v3266_v19  ;;  %v204_v20 = vrot.slane %v190_v2, %v3228_v32 }
  0x4c   :  { %2259 = vmatpush1.bf16.msra.mxu0 %v3250_v6  ;;  %2291 = vmatpush1.bf16.msra.mxu1 %v3252_v7  ;;  %v209_v58 = vcombine.low %v165_v43, %v197_v44  ;;  %v571_v61 = vld [vmem:[#allocation9 + $0x168] sm:$0xff]  ;;  %v569_v62 = vld [vmem:[#allocation9 + $0x158] sm:$0xff]  ;;  %v3320_v3 = vpack.c.bf16 %v562_v50, %v558_v49  ;;  %v3322_v4 = vpack.c.bf16 %v564_v54, %v560_v53  ;;  %v566_v5 = vld [vmem:[#allocation9 + $0x140] sm:$0xff] }
  0x4d   :  { %344 = vmatprep.mubr.f32.mxu0 %v3128_v0  ;;  %457 = vmatprep.mubr.f32.mxu1 %v3128_v0  ;;  %v573_v63 = vld [vmem:[#allocation9 + $0x178] sm:$0xff]  ;;  %v570_v9 = vld [vmem:[#allocation9 + $0x160] sm:$0xff]  ;;  %v568_v10 = vld [vmem:[#allocation9 + $0x150] sm:$0xff]  ;;  %v3328_v14 = vpack.c.bf16 %v571_v61, %v567_v57  ;;  %v210_v17 = vcombine.high %v165_v43, %v197_v44  ;;  %v172_v19 = vrot.slane %v158_v1, %v3228_v32  ;;  %v233_v1 = vsub.s32 2, %v3216_v8 }
  0x4e   :  { %2261 = vmatprep.subr.bf16.mxu0 %v3256_v12  ;;  %2293 = vmatprep.subr.bf16.mxu1 %v3258_v13  ;;  %v572_v11 = vld [vmem:[#allocation9 + $0x170] sm:$0xff]  ;;  %v3330_v15 = vpack.c.bf16 %v573_v63, %v569_v62  ;;  %v575_v16 = vld [vmem:[#allocation9 + $0x188] sm:$0xff]  ;;  %v581_v24 = vld [vmem:[#allocation9 + $0x1b8] sm:$0xff]  ;;  %v3338_v25 = vpack.c.bf16 %v570_v9, %v566_v5  ;;  %v225_v63 = vsub.s32 0, %v3216_v8  ;;  %v229_v5 = vsub.s32 1, %v3216_v8 }
  0x4f   :  { %2206 = vmatmul.mubr.msk.f32.gmra.mrb[4].mxu0 %vm243_vm0, %v207_v21  ;;  %2214 = vmatmul.mubr.msk.f32.gmra.mrb[4].mxu1 %vm243_vm0, %v207_v21  ;;  %v579_v18 = vld [vmem:[#allocation9 + $0x1a8] sm:$0xff]  ;;  %v577_v21 = vld [vmem:[#allocation9 + $0x198] sm:$0xff]  ;;  %v3340_v26 = vpack.c.bf16 %v572_v11, %v568_v10  ;;  %v574_v27 = vld [vmem:[#allocation9 + $0x180] sm:$0xff]  ;;  %v211_v40 = vcombine.low %v172_v19, %v204_v20 }
  0x50   :  { %2263 = vmatpush1.bf16.msra.mxu0 %v3278_v28  ;;  %2295 = vmatpush1.bf16.msra.mxu1 %v3280_v29  ;;  %v578_v30 = vld [vmem:[#allocation9 + $0x1a0] sm:$0xff]  ;;  %v576_v31 = vld [vmem:[#allocation9 + $0x190] sm:$0xff]  ;;  %v3346_v34 = vpack.c.bf16 %v579_v18, %v575_v16  ;;  %v3348_v35 = vpack.c.bf16 %v581_v24, %v577_v21  ;;  %v583_v37 = vld [vmem:[#allocation9 + $0x1c8] sm:$0xff] }
  0x51   :  { %350 = vmatprep.mubr.f32.mxu0 %v3128_v0  ;;  %463 = vmatprep.mubr.f32.mxu1 %v3128_v0  ;;  %v580_v33 = vld [vmem:[#allocation9 + $0x1b0] sm:$0xff]  ;;  %v585_v42 = vld [vmem:[#allocation9 + $0x1d8] sm:$0xff]  ;;  %v3354_v44 = vpack.c.bf16 %v578_v30, %v574_v27  ;;  %v582_v46 = vld [vmem:[#allocation9 + $0x1c0] sm:$0xff] }
  0x52   :  { %2265 = vmatprep.subr.bf16.mxu0 %v3290_v38  ;;  %2297 = vmatprep.subr.bf16.mxu1 %v3292_v39  ;;  %v589_v43 = vld [vmem:[#allocation9 + $0x1f8] sm:$0xff]  ;;  %v3356_v45 = vpack.c.bf16 %v580_v33, %v576_v31  ;;  %v586_v49 = vld [vmem:[#allocation9 + $0x1e0] sm:$0xff]  ;;  %v584_v50 = vld [vmem:[#allocation9 + $0x1d0] sm:$0xff]  ;;  %v237_v33 = vsub.s32 3, %v3216_v8 }
  0x53   :  { %2207 = vmatmul.mubr.msk.f32.gmra.mrb[6].mxu0 %vm243_vm0, %v208_v41  ;;  %2215 = vmatmul.mubr.msk.f32.gmra.mrb[6].mxu1 %vm243_vm0, %v208_v41  ;;  %v587_v41 = vld [vmem:[#allocation9 + $0x1e8] sm:$0xff]  ;;  %v588_v53 = vld [vmem:[#allocation9 + $0x1f0] sm:$0xff]  ;;  %v3364_v57 = vpack.c.bf16 %v589_v43, %v585_v42  ;;  %v3370_v61 = vpack.c.bf16 %v586_v49, %v582_v46  ;;  %v221_v2 = vld [vmem:[%s3800_s3] sm:$0xf]  ;;  %s3131_s3 = smov [#allocation11]  }
  0x54   :  { %2267 = vmatpush1.bf16.msra.mxu0 %v3300_v47  ;;  %2299 = vmatpush1.bf16.msra.mxu1 %v3302_v48  ;;  %v3362_v54 = vpack.c.bf16 %v587_v41, %v583_v37  ;;  %v3372_v62 = vpack.c.bf16 %v588_v53, %v584_v50  ;;  %v3428_v9 = vrot.slane %v221_v2, %v225_v63  ;;  %s2177_s8 = sshll.u32 %s3131_s3, 4  ;;  %s2178_s8 = int_to_ptr.vmem [resolvable:$true] %s2177_s8 }
  0x55   :  { %356 = vmatprep.mubr.f32.mxu0 %v3128_v0  ;;  %469 = vmatprep.mubr.f32.mxu1 %v3128_v0  ;;  %v3430_v10 = vrot.slane %v221_v2, %v233_v1  ;;  %v3432_v11 = vrot.slane %v221_v2, %v229_v5  ;;  %v3438_v37 = vrot.slane %v221_v2, %v237_v33  ;;  %s3047_s15 = scalar_lea.vmem %s2178_s8, 128  ;;  %p3052_p11 = scmp.lt.s32.totalorder %s2178_s8, %s2178_s8 }
  0x56   :  { %2269 = vmatprep.subr.bf16.mxu0 %v3308_v55  ;;  %2301 = vmatprep.subr.bf16.mxu1 %v3310_v56  ;;  %p3048_p10 = scmp.ne.s32.totalorder %s2178_s8, %s3047_s15  ;;  %p3053_p12 = scmp.lt.s32.totalorder %s3047_s15, %s3047_s15 }
  0x57   :  { %2208 = vmatmul.mubr.msk.f32.gmra.mrb[8].mxu0 %vm243_vm0, %v209_v58  ;;  %2216 = vmatmul.mubr.msk.f32.gmra.mrb[8].mxu1 %vm243_vm0, %v209_v58  ;;  %v212_v58 = vcombine.high %v172_v19, %v204_v20 }
  0x58   :  { %2271 = vmatpush1.bf16.msra.mxu0 %v3320_v3  ;;  %2303 = vmatpush1.bf16.msra.mxu1 %v3322_v4  ;;  %p3054_p13 = por %p3053_p12, %p3052_p11 }
  0x59   :  { %362 = vmatprep.mubr.f32.mxu0 %v3128_v0  ;;  %475 = vmatprep.mubr.f32.mxu1 %v3128_v0 }
  0x5a   :  { %2273 = vmatprep.subr.bf16.mxu0 %v3328_v14  ;;  %2305 = vmatprep.subr.bf16.mxu1 %v3330_v15  ;;  %p3055_p0 = pnand %p3054_p13, %p3048_p10 }
  0x5b   :  { %2209 = vmatmul.mubr.msk.f32.gmra.mrb[10].mxu0 %vm243_vm0, %v210_v17  ;;  %2217 = vmatmul.mubr.msk.f32.gmra.mrb[10].mxu1 %vm243_vm0, %v210_v17 }
  0x5c   :  { %2275 = vmatpush1.bf16.msra.mxu0 %v3338_v25  ;;  %2307 = vmatpush1.bf16.msra.mxu1 %v3340_v26 }
  0x5d   :  { %368 = vmatprep.mubr.f32.mxu0 %v3128_v0  ;;  %481 = vmatprep.mubr.f32.mxu1 %v3128_v0 }
  0x5e   :  { %2277 = vmatprep.subr.bf16.mxu0 %v3346_v34  ;;  %2309 = vmatprep.subr.bf16.mxu1 %v3348_v35 }
  0x5f   :  { %2210 = vmatmul.mubr.msk.f32.gmra.mrb[12].mxu0 %vm243_vm0, %v211_v40  ;;  %2218 = vmatmul.mubr.msk.f32.gmra.mrb[12].mxu1 %vm243_vm0, %v211_v40 }
  0x60   :  { %2279 = vmatpush1.bf16.msra.mxu0 %v3354_v44  ;;  %2311 = vmatpush1.bf16.msra.mxu1 %v3356_v45 }
  0x61   :  { %374 = vmatprep.mubr.f32.mxu0 %v3128_v0  ;;  %487 = vmatprep.mubr.f32.mxu1 %v3128_v0 }
  0x62   :  { %2281 = vmatprep.subr.bf16.mxu0 %v3362_v54  ;;  %2313 = vmatprep.subr.bf16.mxu1 %v3364_v57 }
  0x63   :  { %2211 = vmatmul.mubr.msk.f32.gmra.mrb[14].mxu0 %vm243_vm0, %v212_v58  ;;  %2219 = vmatmul.mubr.msk.f32.gmra.mrb[14].mxu1 %vm243_vm0, %v212_v58 }
  0x64   :  { %2283 = vmatpush1.bf16.msra.mxu0 %v3370_v61  ;;  %2315 = vmatpush1.bf16.msra.mxu1 %v3372_v62 }
  0x65   :  { %659 = vmatprep.mubr.f32.mxu0 %v3128_v0  ;;  %730 = vmatprep.mubr.f32.mxu1 %v3128_v0 }
  0x66   :  { %2317 = vmatprep.subr.bf16.mxu0 %v3218_v22  ;;  %2349 = vmatprep.subr.bf16.mxu1 %v3231_v36 }
  0x67   :  { %660 = vmatmul.mubr.f32.vlgmr.msra.gmra.mrb[0].mxu0 %v3128_v0  ;;  %731 = vmatmul.mubr.f32.vlgmr.msra.gmra.mrb[0].mxu1 %v3128_v0 }
  0x68   :  { %2319 = vmatpush1.bf16.msra.mxu0 %v3236_v51  ;;  %2351 = vmatpush1.bf16.msra.mxu1 %v3238_v52 }
  0x69   :  { %2321 = vmatprep.subr.bf16.mxu0 %v3240_v59  ;;  %2353 = vmatprep.subr.bf16.mxu1 %v3242_v60 }
  0x6a   :  { %835 = vmatprep.mubr.f32.mxu0 %v3128_v0  ;;  %906 = vmatprep.mubr.f32.mxu1 %v3128_v0 }
  0x6c   :  { %2323 = vmatpush1.bf16.msra.mxu0 %v3250_v6  ;;  %2355 = vmatpush1.bf16.msra.mxu1 %v3252_v7 }
  0x6d   :  { %2325 = vmatprep.subr.bf16.mxu0 %v3256_v12  ;;  %2357 = vmatprep.subr.bf16.mxu1 %v3258_v13 }
  0x70   :  { %2327 = vmatpush1.bf16.msra.mxu0 %v3278_v28  ;;  %2359 = vmatpush1.bf16.msra.mxu1 %v3280_v29 }
  0x71   :  { %2329 = vmatprep.subr.bf16.mxu0 %v3290_v38  ;;  %2361 = vmatprep.subr.bf16.mxu1 %v3292_v39 }
  0x74   :  { %2331 = vmatpush1.bf16.msra.mxu0 %v3300_v47  ;;  %2363 = vmatpush1.bf16.msra.mxu1 %v3302_v48 }
  0x75   :  { %2333 = vmatprep.subr.bf16.mxu0 %v3308_v55  ;;  %2365 = vmatprep.subr.bf16.mxu1 %v3310_v56 }
  0x78   :  { %2335 = vmatpush1.bf16.msra.mxu0 %v3320_v3  ;;  %2367 = vmatpush1.bf16.msra.mxu1 %v3322_v4 }
  0x79   :  { %2337 = vmatprep.subr.bf16.mxu0 %v3328_v14  ;;  %2369 = vmatprep.subr.bf16.mxu1 %v3330_v15 }
  0x7c   :  { %2339 = vmatpush1.bf16.msra.mxu0 %v3338_v25  ;;  %2371 = vmatpush1.bf16.msra.mxu1 %v3340_v26 }
  0x7d   :  { %2341 = vmatprep.subr.bf16.mxu0 %v3346_v34  ;;  %2373 = vmatprep.subr.bf16.mxu1 %v3348_v35 }
  0x80   :  { %2343 = vmatpush1.bf16.msra.mxu0 %v3354_v44  ;;  %2375 = vmatpush1.bf16.msra.mxu1 %v3356_v45 }
  0x81   :  { %2345 = vmatprep.subr.bf16.mxu0 %v3362_v54  ;;  %2377 = vmatprep.subr.bf16.mxu1 %v3364_v57 }
  0x84   :  { %2347 = vmatpush1.bf16.msra.mxu0 %v3370_v61  ;;  %2379 = vmatpush1.bf16.msra.mxu1 %v3372_v62 }
  0x85   :  { %2381 = vmatprep.subr.bf16.mxu0 %v3218_v22  ;;  %2413 = vmatprep.subr.bf16.mxu1 %v3231_v36 }
 0x13a   :  { %v661_v16 = vpop.f32.mrb[0].mxu0  ;;  %v732_v17 = vpop.f32.mrb[0].mxu1 }
 0x13b   :  { %v2764_v18 = vadd.f32 %v661_v16, %v3428_v9  ;;  %v2780_v19 = vadd.f32 %v732_v17, %v3430_v10  ;;  %v663_v20 = vpop.f32.mrb[1].mxu0  ;;  %v734_v21 = vpop.f32.mrb[1].mxu1 }
 0x13c   :  { %v2765_v24 = vadd.f32 %v663_v20, %v3432_v11  ;;  %v2781_v40 = vadd.f32 %v734_v21, %v3438_v37 }
 0x13d   :  { %v2220_v27 = vmul.f32 -1.442695, %v2764_v18  ;;  %v2222_v30 = vmul.f32 -1.442695, %v2780_v19 }
 0x13e   :  { %v2221_v31 = vmul.f32 -1.442695, %v2765_v24 }
 0x13f   :  { %2853 = vpow2.f32 %v2220_v27 }
 0x140   :  { %2855 = vpow2.f32 %v2222_v30 }
 0x141   :  { %2857 = vpow2.f32 %v2221_v31 }
 0x142   :  { %2859 = vtanh.f32 %v2781_v40 }
 0x149   :  { %v2854_v41 = vpop.eup %2853 }
 0x14a   :  { %v2856_v42 = vpop.eup %2855  ;;  %v750_v43 = vadd.f32 1.0, %v2854_v41 }
 0x14b   :  { %v2858_v46 = vpop.eup %2857  ;;  %v752_v49 = vadd.f32 1.0, %v2856_v42 }
 0x14c   :  { %2861 = vrcp.f32 %v750_v43  ;;  %v751_v50 = vadd.f32 1.0, %v2858_v46  ;;  %v2860_v53 = vpop.eup %2859 }
 0x14d   :  { %2863 = vrcp.f32 %v752_v49 }
 0x14e   :  { %2865 = vrcp.f32 %v751_v50 }
 0x156   :  { %v2862_v58 = vpop.eup %2861 }
 0x157   :  { %v2864_v63 = vpop.eup %2863  ;;  %v761_v8 = vmul.f32 %v2862_v58, %v2860_v53 }
 0x158   :  { %v2866_v1 = vpop.eup %2865 }
 0x159   :  { %v760_v5 = vmul.f32 %v2866_v1, %v2864_v63 }
 0x15b   :  { %v762_v2 = vadd.f32 %v761_v8, %v760_v5 }
 0x15d   :  { %2867 = vtanh.f32 %v762_v2 }
 0x167   :  { %v2868_v16 = vpop.eup %2867 }
 0x168   :  { %v3441_v17 = vmul.f32 %v2868_v16, %v2864_v63 }
 0x16a   :  { %836 = vmatmul.mubr.f32.vlgmr.msra.gmra.mrb[2].mxu0 %v3441_v17  ;;  %907 = vmatmul.mubr.f32.vlgmr.msra.gmra.mrb[2].mxu1 %v3441_v17 }
 0x16b   :  { %2383 = vmatpush1.bf16.msra.mxu0 %v3236_v51  ;;  %2415 = vmatpush1.bf16.msra.mxu1 %v3238_v52 }
 0x16c   :  { %2385 = vmatprep.subr.bf16.mxu0 %v3240_v59  ;;  %2417 = vmatprep.subr.bf16.mxu1 %v3242_v60 }
 0x16d   :  { %1012 = vmatprep.mubr.f32.mxu0 %v3128_v0  ;;  %1083 = vmatprep.mubr.f32.mxu1 %v3128_v0 }
 0x16f   :  { %2387 = vmatpush1.bf16.msra.mxu0 %v3250_v6  ;;  %2419 = vmatpush1.bf16.msra.mxu1 %v3252_v7 }
 0x170   :  { %2389 = vmatprep.subr.bf16.mxu0 %v3256_v12  ;;  %2421 = vmatprep.subr.bf16.mxu1 %v3258_v13 }
 0x173   :  { %2391 = vmatpush1.bf16.msra.mxu0 %v3278_v28  ;;  %2423 = vmatpush1.bf16.msra.mxu1 %v3280_v29 }
 0x174   :  { %2393 = vmatprep.subr.bf16.mxu0 %v3290_v38  ;;  %2425 = vmatprep.subr.bf16.mxu1 %v3292_v39 }
 0x177   :  { %2395 = vmatpush1.bf16.msra.mxu0 %v3300_v47  ;;  %2427 = vmatpush1.bf16.msra.mxu1 %v3302_v48 }
 0x178   :  { %2397 = vmatprep.subr.bf16.mxu0 %v3308_v55  ;;  %2429 = vmatprep.subr.bf16.mxu1 %v3310_v56 }
 0x17b   :  { %2399 = vmatpush1.bf16.msra.mxu0 %v3320_v3  ;;  %2431 = vmatpush1.bf16.msra.mxu1 %v3322_v4 }
 0x17c   :  { %2401 = vmatprep.subr.bf16.mxu0 %v3328_v14  ;;  %2433 = vmatprep.subr.bf16.mxu1 %v3330_v15 }
 0x17f   :  { %2403 = vmatpush1.bf16.msra.mxu0 %v3338_v25  ;;  %2435 = vmatpush1.bf16.msra.mxu1 %v3340_v26 }
 0x180   :  { %2405 = vmatprep.subr.bf16.mxu0 %v3346_v34  ;;  %2437 = vmatprep.subr.bf16.mxu1 %v3348_v35 }
 0x183   :  { %2407 = vmatpush1.bf16.msra.mxu0 %v3354_v44  ;;  %2439 = vmatpush1.bf16.msra.mxu1 %v3356_v45 }
 0x184   :  { %2409 = vmatprep.subr.bf16.mxu0 %v3362_v54  ;;  %2441 = vmatprep.subr.bf16.mxu1 %v3364_v57 }
 0x187   :  { %2411 = vmatpush1.bf16.msra.mxu0 %v3370_v61  ;;  %2443 = vmatpush1.bf16.msra.mxu1 %v3372_v62 }
 0x188   :  { %2445 = vmatprep.subr.bf16.mxu0 %v3218_v22  ;;  %2477 = vmatprep.subr.bf16.mxu1 %v3231_v36 }
 0x23d   :  { %v837_v18 = vpop.f32.mrb[2].mxu0  ;;  %v908_v19 = vpop.f32.mrb[2].mxu1 }
 0x23e   :  { %v2766_v20 = vadd.f32 %v837_v18, %v3428_v9  ;;  %v2782_v21 = vadd.f32 %v908_v19, %v3430_v10  ;;  %v839_v24 = vpop.f32.mrb[3].mxu0  ;;  %v910_v27 = vpop.f32.mrb[3].mxu1 }
 0x23f   :  { %v2767_v30 = vadd.f32 %v839_v24, %v3432_v11  ;;  %v2783_v41 = vadd.f32 %v910_v27, %v3438_v37 }
 0x240   :  { %v2223_v31 = vmul.f32 -1.442695, %v2766_v20  ;;  %v2225_v33 = vmul.f32 -1.442695, %v2782_v21 }
 0x241   :  { %v2224_v40 = vmul.f32 -1.442695, %v2767_v30 }
 0x242   :  { %2869 = vpow2.f32 %v2223_v31 }
 0x243   :  { %2871 = vpow2.f32 %v2225_v33 }
 0x244   :  { %2873 = vpow2.f32 %v2224_v40 }
 0x245   :  { %2875 = vtanh.f32 %v2783_v41 }
 0x24c   :  { %v2870_v42 = vpop.eup %2869 }
 0x24d   :  { %v2872_v43 = vpop.eup %2871  ;;  %v926_v46 = vadd.f32 1.0, %v2870_v42 }
 0x24e   :  { %v2874_v49 = vpop.eup %2873  ;;  %v928_v50 = vadd.f32 1.0, %v2872_v43 }
 0x24f   :  { %2877 = vrcp.f32 %v926_v46  ;;  %v927_v53 = vadd.f32 1.0, %v2874_v49  ;;  %v2876_v58 = vpop.eup %2875 }
 0x250   :  { %2879 = vrcp.f32 %v928_v50 }
 0x251   :  { %2881 = vrcp.f32 %v927_v53 }
 0x259   :  { %v2878_v63 = vpop.eup %2877 }
 0x25a   :  { %v2880_v8 = vpop.eup %2879  ;;  %v937_v1 = vmul.f32 %v2878_v63, %v2876_v58 }
 0x25b   :  { %v2882_v5 = vpop.eup %2881 }
 0x25c   :  { %v936_v2 = vmul.f32 %v2882_v5, %v2880_v8 }
 0x25e   :  { %v938_v16 = vadd.f32 %v937_v1, %v936_v2 }
 0x260   :  { %2883 = vtanh.f32 %v938_v16 }
 0x26a   :  { %v2884_v18 = vpop.eup %2883 }
 0x26b   :  { %v3483_v19 = vmul.f32 %v2884_v18, %v2880_v8 }
 0x26d   :  { %1013 = vmatmul.mubr.f32.vlgmr.msra.gmra.mrb[4].mxu0 %v3483_v19  ;;  %1084 = vmatmul.mubr.f32.vlgmr.msra.gmra.mrb[4].mxu1 %v3483_v19 }
 0x26e   :  { %2447 = vmatpush1.bf16.msra.mxu0 %v3236_v51  ;;  %2479 = vmatpush1.bf16.msra.mxu1 %v3238_v52 }
 0x26f   :  { %2449 = vmatprep.subr.bf16.mxu0 %v3240_v59  ;;  %2481 = vmatprep.subr.bf16.mxu1 %v3242_v60 }
 0x270   :  { %1189 = vmatprep.mubr.f32.mxu0 %v3128_v0  ;;  %1260 = vmatprep.mubr.f32.mxu1 %v3128_v0 }
 0x272   :  { %2451 = vmatpush1.bf16.msra.mxu0 %v3250_v6  ;;  %2483 = vmatpush1.bf16.msra.mxu1 %v3252_v7 }
 0x273   :  { %2453 = vmatprep.subr.bf16.mxu0 %v3256_v12  ;;  %2485 = vmatprep.subr.bf16.mxu1 %v3258_v13 }
 0x276   :  { %2455 = vmatpush1.bf16.msra.mxu0 %v3278_v28  ;;  %2487 = vmatpush1.bf16.msra.mxu1 %v3280_v29 }
 0x277   :  { %2457 = vmatprep.subr.bf16.mxu0 %v3290_v38  ;;  %2489 = vmatprep.subr.bf16.mxu1 %v3292_v39 }
 0x27a   :  { %2459 = vmatpush1.bf16.msra.mxu0 %v3300_v47  ;;  %2491 = vmatpush1.bf16.msra.mxu1 %v3302_v48 }
 0x27b   :  { %2461 = vmatprep.subr.bf16.mxu0 %v3308_v55  ;;  %2493 = vmatprep.subr.bf16.mxu1 %v3310_v56 }
 0x27e   :  { %2463 = vmatpush1.bf16.msra.mxu0 %v3320_v3  ;;  %2495 = vmatpush1.bf16.msra.mxu1 %v3322_v4 }
 0x27f   :  { %2465 = vmatprep.subr.bf16.mxu0 %v3328_v14  ;;  %2497 = vmatprep.subr.bf16.mxu1 %v3330_v15 }
 0x282   :  { %2467 = vmatpush1.bf16.msra.mxu0 %v3338_v25  ;;  %2499 = vmatpush1.bf16.msra.mxu1 %v3340_v26 }
 0x283   :  { %2469 = vmatprep.subr.bf16.mxu0 %v3346_v34  ;;  %2501 = vmatprep.subr.bf16.mxu1 %v3348_v35 }
 0x286   :  { %2471 = vmatpush1.bf16.msra.mxu0 %v3354_v44  ;;  %2503 = vmatpush1.bf16.msra.mxu1 %v3356_v45 }
 0x287   :  { %2473 = vmatprep.subr.bf16.mxu0 %v3362_v54  ;;  %2505 = vmatprep.subr.bf16.mxu1 %v3364_v57 }
 0x28a   :  { %2475 = vmatpush1.bf16.msra.mxu0 %v3370_v61  ;;  %2507 = vmatpush1.bf16.msra.mxu1 %v3372_v62 }
 0x28b   :  { %2509 = vmatprep.subr.bf16.mxu0 %v3218_v22  ;;  %2541 = vmatprep.subr.bf16.mxu1 %v3231_v36 }
 0x340   :  { %v1014_v20 = vpop.f32.mrb[4].mxu0  ;;  %v1085_v21 = vpop.f32.mrb[4].mxu1 }
 0x341   :  { %v2768_v24 = vadd.f32 %v1014_v20, %v3428_v9  ;;  %v2784_v27 = vadd.f32 %v1085_v21, %v3430_v10  ;;  %v1016_v30 = vpop.f32.mrb[5].mxu0  ;;  %v1087_v31 = vpop.f32.mrb[5].mxu1 }
 0x342   :  { %v2769_v33 = vadd.f32 %v1016_v30, %v3432_v11  ;;  %v2785_v43 = vadd.f32 %v1087_v31, %v3438_v37 }
 0x343   :  { %v2226_v40 = vmul.f32 -1.442695, %v2768_v24  ;;  %v2228_v41 = vmul.f32 -1.442695, %v2784_v27 }
 0x344   :  { %v2227_v42 = vmul.f32 -1.442695, %v2769_v33 }
 0x345   :  { %2885 = vpow2.f32 %v2226_v40 }
 0x346   :  { %2887 = vpow2.f32 %v2228_v41 }
 0x347   :  { %2889 = vpow2.f32 %v2227_v42 }
 0x348   :  { %2891 = vtanh.f32 %v2785_v43 }
 0x34f   :  { %v2886_v46 = vpop.eup %2885 }
 0x350   :  { %v2888_v49 = vpop.eup %2887  ;;  %v1103_v50 = vadd.f32 1.0, %v2886_v46 }
 0x351   :  { %v2890_v53 = vpop.eup %2889  ;;  %v1105_v58 = vadd.f32 1.0, %v2888_v49 }
 0x352   :  { %2893 = vrcp.f32 %v1103_v50  ;;  %v1104_v63 = vadd.f32 1.0, %v2890_v53  ;;  %v2892_v8 = vpop.eup %2891 }
 0x353   :  { %2895 = vrcp.f32 %v1105_v58 }
 0x354   :  { %2897 = vrcp.f32 %v1104_v63 }
 0x35c   :  { %v2894_v1 = vpop.eup %2893 }
 0x35d   :  { %v2896_v5 = vpop.eup %2895  ;;  %v1114_v2 = vmul.f32 %v2894_v1, %v2892_v8 }
 0x35e   :  { %v2898_v16 = vpop.eup %2897 }
 0x35f   :  { %v1113_v18 = vmul.f32 %v2898_v16, %v2896_v5 }
 0x361   :  { %v1115_v20 = vadd.f32 %v1114_v2, %v1113_v18 }
 0x363   :  { %2899 = vtanh.f32 %v1115_v20 }
 0x36d   :  { %v2900_v21 = vpop.eup %2899 }
 0x36e   :  { %v3525_v24 = vmul.f32 %v2900_v21, %v2896_v5 }
 0x370   :  { %1190 = vmatmul.mubr.f32.vlgmr.msra.gmra.mrb[6].mxu0 %v3525_v24  ;;  %1261 = vmatmul.mubr.f32.vlgmr.msra.gmra.mrb[6].mxu1 %v3525_v24 }
 0x371   :  { %2511 = vmatpush1.bf16.msra.mxu0 %v3236_v51  ;;  %2543 = vmatpush1.bf16.msra.mxu1 %v3238_v52 }
 0x372   :  { %2513 = vmatprep.subr.bf16.mxu0 %v3240_v59  ;;  %2545 = vmatprep.subr.bf16.mxu1 %v3242_v60 }
 0x373   :  { %1366 = vmatprep.mubr.f32.mxu0 %v3128_v0  ;;  %1437 = vmatprep.mubr.f32.mxu1 %v3128_v0 }
 0x375   :  { %2515 = vmatpush1.bf16.msra.mxu0 %v3250_v6  ;;  %2547 = vmatpush1.bf16.msra.mxu1 %v3252_v7 }
 0x376   :  { %2517 = vmatprep.subr.bf16.mxu0 %v3256_v12  ;;  %2549 = vmatprep.subr.bf16.mxu1 %v3258_v13 }
 0x379   :  { %2519 = vmatpush1.bf16.msra.mxu0 %v3278_v28  ;;  %2551 = vmatpush1.bf16.msra.mxu1 %v3280_v29 }
 0x37a   :  { %2521 = vmatprep.subr.bf16.mxu0 %v3290_v38  ;;  %2553 = vmatprep.subr.bf16.mxu1 %v3292_v39 }
 0x37d   :  { %2523 = vmatpush1.bf16.msra.mxu0 %v3300_v47  ;;  %2555 = vmatpush1.bf16.msra.mxu1 %v3302_v48 }
 0x37e   :  { %2525 = vmatprep.subr.bf16.mxu0 %v3308_v55  ;;  %2557 = vmatprep.subr.bf16.mxu1 %v3310_v56 }
 0x381   :  { %2527 = vmatpush1.bf16.msra.mxu0 %v3320_v3  ;;  %2559 = vmatpush1.bf16.msra.mxu1 %v3322_v4 }
 0x382   :  { %2529 = vmatprep.subr.bf16.mxu0 %v3328_v14  ;;  %2561 = vmatprep.subr.bf16.mxu1 %v3330_v15 }
 0x385   :  { %2531 = vmatpush1.bf16.msra.mxu0 %v3338_v25  ;;  %2563 = vmatpush1.bf16.msra.mxu1 %v3340_v26 }
 0x386   :  { %2533 = vmatprep.subr.bf16.mxu0 %v3346_v34  ;;  %2565 = vmatprep.subr.bf16.mxu1 %v3348_v35 }
 0x389   :  { %2535 = vmatpush1.bf16.msra.mxu0 %v3354_v44  ;;  %2567 = vmatpush1.bf16.msra.mxu1 %v3356_v45 }
 0x38a   :  { %2537 = vmatprep.subr.bf16.mxu0 %v3362_v54  ;;  %2569 = vmatprep.subr.bf16.mxu1 %v3364_v57 }
 0x38d   :  { %2539 = vmatpush1.bf16.msra.mxu0 %v3370_v61  ;;  %2571 = vmatpush1.bf16.msra.mxu1 %v3372_v62 }
 0x38e   :  { %2573 = vmatprep.subr.bf16.mxu0 %v3218_v22  ;;  %2605 = vmatprep.subr.bf16.mxu1 %v3231_v36 }
 0x443   :  { %v1191_v27 = vpop.f32.mrb[6].mxu0  ;;  %v1262_v30 = vpop.f32.mrb[6].mxu1 }
 0x444   :  { %v2770_v31 = vadd.f32 %v1191_v27, %v3428_v9  ;;  %v2786_v33 = vadd.f32 %v1262_v30, %v3430_v10  ;;  %v1193_v40 = vpop.f32.mrb[7].mxu0  ;;  %v1264_v41 = vpop.f32.mrb[7].mxu1 }
 0x445   :  { %v2771_v42 = vadd.f32 %v1193_v40, %v3432_v11  ;;  %v2787_v50 = vadd.f32 %v1264_v41, %v3438_v37  ;;  %v2016_v40 = vcombine.high %v3441_v17, %v3525_v24 }
 0x446   :  { %v2229_v43 = vmul.f32 -1.442695, %v2770_v31  ;;  %v2231_v46 = vmul.f32 -1.442695, %v2786_v33  ;;  %v2015_v33 = vcombine.low %v3441_v17, %v3525_v24 }
 0x447   :  { %v2230_v49 = vmul.f32 -1.442695, %v2771_v42 }
 0x448   :  { %2901 = vpow2.f32 %v2229_v43 }
 0x449   :  { %2903 = vpow2.f32 %v2231_v46  ;;  %v3574_v46 = vrot.slane %v2015_v33, %v3221_v23 }
 0x44a   :  { %2905 = vpow2.f32 %v2230_v49  ;;  %v3579_v49 = vrot.slane %v2016_v40, %v3221_v23 }
 0x44b   :  { %2907 = vtanh.f32 %v2787_v50 }
 0x452   :  { %v2902_v53 = vpop.eup %2901 }
 0x453   :  { %v2904_v58 = vpop.eup %2903  ;;  %v1280_v63 = vadd.f32 1.0, %v2902_v53 }
 0x454   :  { %v2906_v8 = vpop.eup %2905  ;;  %v1282_v1 = vadd.f32 1.0, %v2904_v58 }
 0x455   :  { %2909 = vrcp.f32 %v1280_v63  ;;  %v1281_v5 = vadd.f32 1.0, %v2906_v8  ;;  %v2908_v2 = vpop.eup %2907 }
 0x456   :  { %2911 = vrcp.f32 %v1282_v1 }
 0x457   :  { %2913 = vrcp.f32 %v1281_v5 }
 0x45f   :  { %v2910_v16 = vpop.eup %2909 }
 0x460   :  { %v2912_v18 = vpop.eup %2911  ;;  %v1291_v20 = vmul.f32 %v2910_v16, %v2908_v2 }
 0x461   :  { %v2914_v21 = vpop.eup %2913 }
 0x462   :  { %v1290_v27 = vmul.f32 %v2914_v21, %v2912_v18 }
 0x464   :  { %v1292_v30 = vadd.f32 %v1291_v20, %v1290_v27 }
 0x466   :  { %2915 = vtanh.f32 %v1292_v30 }
 0x470   :  { %v2916_v31 = vpop.eup %2915 }
 0x471   :  { %v1294_v41 = vmul.f32 %v2916_v31, %v2912_v18 }
 0x473   :  { %1367 = vmatmul.mubr.f32.vlgmr.msra.gmra.mrb[8].mxu0 %v1294_v41  ;;  %v2031_v42 = vcombine.low %v3483_v19, %v1294_v41  ;;  %v2032_v43 = vcombine.high %v3483_v19, %v1294_v41  ;;  %1438 = vmatmul.mubr.f32.vlgmr.msra.gmra.mrb[8].mxu1 %v1294_v41 }
 0x474   :  { %2575 = vmatpush1.bf16.msra.mxu0 %v3236_v51  ;;  %2607 = vmatpush1.bf16.msra.mxu1 %v3238_v52 }
 0x475   :  { %v3582_v50 = vrot.slane %v2031_v42, %v3221_v23  ;;  %v3585_v17 = vrot.slane %v2032_v43, %v3221_v23  ;;  %2577 = vmatprep.subr.bf16.mxu0 %v3240_v59  ;;  %2609 = vmatprep.subr.bf16.mxu1 %v3242_v60 }
 0x476   :  { %1543 = vmatprep.mubr.f32.mxu0 %v3128_v0  ;;  %1614 = vmatprep.mubr.f32.mxu1 %v3128_v0 }
 0x477   :  { %v2079_v19 = vcombine.low %v3574_v46, %v3582_v50  ;;  %v2080_v24 = vcombine.high %v3574_v46, %v3582_v50  ;;  %v2095_v53 = vcombine.low %v3579_v49, %v3585_v17  ;;  %v2096_v58 = vcombine.high %v3579_v49, %v3585_v17 }
 0x478   :  { %2579 = vmatpush1.bf16.msra.mxu0 %v3250_v6  ;;  %2611 = vmatpush1.bf16.msra.mxu1 %v3252_v7 }
 0x479   :  { %2581 = vmatprep.subr.bf16.mxu0 %v3256_v12  ;;  %2613 = vmatprep.subr.bf16.mxu1 %v3258_v13 }
 0x47c   :  { %2583 = vmatpush1.bf16.msra.mxu0 %v3278_v28  ;;  %2615 = vmatpush1.bf16.msra.mxu1 %v3280_v29 }
 0x47d   :  { %2585 = vmatprep.subr.bf16.mxu0 %v3290_v38  ;;  %2617 = vmatprep.subr.bf16.mxu1 %v3292_v39 }
 0x480   :  { %2587 = vmatpush1.bf16.msra.mxu0 %v3300_v47  ;;  %2619 = vmatpush1.bf16.msra.mxu1 %v3302_v48 }
 0x481   :  { %2589 = vmatprep.subr.bf16.mxu0 %v3308_v55  ;;  %2621 = vmatprep.subr.bf16.mxu1 %v3310_v56 }
 0x484   :  { %2591 = vmatpush1.bf16.msra.mxu0 %v3320_v3  ;;  %2623 = vmatpush1.bf16.msra.mxu1 %v3322_v4 }
 0x485   :  { %2593 = vmatprep.subr.bf16.mxu0 %v3328_v14  ;;  %2625 = vmatprep.subr.bf16.mxu1 %v3330_v15 }
 0x488   :  { %2595 = vmatpush1.bf16.msra.mxu0 %v3338_v25  ;;  %2627 = vmatpush1.bf16.msra.mxu1 %v3340_v26 }
 0x489   :  { %2597 = vmatprep.subr.bf16.mxu0 %v3346_v34  ;;  %2629 = vmatprep.subr.bf16.mxu1 %v3348_v35 }
 0x48c   :  { %2599 = vmatpush1.bf16.msra.mxu0 %v3354_v44  ;;  %2631 = vmatpush1.bf16.msra.mxu1 %v3356_v45 }
 0x48d   :  { %2601 = vmatprep.subr.bf16.mxu0 %v3362_v54  ;;  %2633 = vmatprep.subr.bf16.mxu1 %v3364_v57 }
 0x490   :  { %2603 = vmatpush1.bf16.msra.mxu0 %v3370_v61  ;;  %2635 = vmatpush1.bf16.msra.mxu1 %v3372_v62 }
 0x491   :  { %2637 = vmatprep.subr.bf16.mxu0 %v3218_v22  ;;  %2669 = vmatprep.subr.bf16.mxu1 %v3231_v36 }
 0x546   :  { %v1368_v63 = vpop.f32.mrb[8].mxu0  ;;  %v1439_v8 = vpop.f32.mrb[8].mxu1 }
 0x547   :  { %v2772_v1 = vadd.f32 %v1368_v63, %v3428_v9  ;;  %v2788_v5 = vadd.f32 %v1439_v8, %v3430_v10  ;;  %v1370_v2 = vpop.f32.mrb[9].mxu0  ;;  %v1441_v16 = vpop.f32.mrb[9].mxu1 }
 0x548   :  { %v2773_v18 = vadd.f32 %v1370_v2, %v3432_v11  ;;  %v2789_v30 = vadd.f32 %v1441_v16, %v3438_v37 }
 0x549   :  { %v2232_v20 = vmul.f32 -1.442695, %v2772_v1  ;;  %v2234_v21 = vmul.f32 -1.442695, %v2788_v5 }
 0x54a   :  { %v2233_v27 = vmul.f32 -1.442695, %v2773_v18 }
 0x54b   :  { %2917 = vpow2.f32 %v2232_v20 }
 0x54c   :  { %2919 = vpow2.f32 %v2234_v21 }
 0x54d   :  { %2921 = vpow2.f32 %v2233_v27 }
 0x54e   :  { %2923 = vtanh.f32 %v2789_v30 }
 0x555   :  { %v2918_v31 = vpop.eup %2917 }
 0x556   :  { %v2920_v33 = vpop.eup %2919  ;;  %v1457_v40 = vadd.f32 1.0, %v2918_v31 }
 0x557   :  { %v2922_v41 = vpop.eup %2921  ;;  %v1459_v42 = vadd.f32 1.0, %v2920_v33 }
 0x558   :  { %2925 = vrcp.f32 %v1457_v40  ;;  %v1458_v43 = vadd.f32 1.0, %v2922_v41  ;;  %v2924_v63 = vpop.eup %2923 }
 0x559   :  { %2927 = vrcp.f32 %v1459_v42 }
 0x55a   :  { %2929 = vrcp.f32 %v1458_v43 }
 0x562   :  { %v2926_v8 = vpop.eup %2925 }
 0x563   :  { %v2928_v1 = vpop.eup %2927  ;;  %v1468_v5 = vmul.f32 %v2926_v8, %v2924_v63 }
 0x564   :  { %v2930_v2 = vpop.eup %2929 }
 0x565   :  { %v1467_v18 = vmul.f32 %v2930_v2, %v2928_v1 }
 0x567   :  { %v1469_v20 = vadd.f32 %v1468_v5, %v1467_v18 }
 0x569   :  { %2931 = vtanh.f32 %v1469_v20 }
 0x573   :  { %v2932_v21 = vpop.eup %2931 }
 0x574   :  { %v3631_v16 = vmul.f32 %v2932_v21, %v2928_v1 }
 0x576   :  { %1544 = vmatmul.mubr.f32.vlgmr.msra.gmra.mrb[10].mxu0 %v3631_v16  ;;  %1615 = vmatmul.mubr.f32.vlgmr.msra.gmra.mrb[10].mxu1 %v3631_v16 }
 0x577   :  { %2639 = vmatpush1.bf16.msra.mxu0 %v3236_v51  ;;  %2671 = vmatpush1.bf16.msra.mxu1 %v3238_v52 }
 0x578   :  { %2641 = vmatprep.subr.bf16.mxu0 %v3240_v59  ;;  %2673 = vmatprep.subr.bf16.mxu1 %v3242_v60 }
 0x579   :  { %1720 = vmatprep.mubr.f32.mxu0 %v3128_v0  ;;  %1791 = vmatprep.mubr.f32.mxu1 %v3128_v0 }
 0x57b   :  { %2643 = vmatpush1.bf16.msra.mxu0 %v3250_v6  ;;  %2675 = vmatpush1.bf16.msra.mxu1 %v3252_v7 }
 0x57c   :  { %2645 = vmatprep.subr.bf16.mxu0 %v3256_v12  ;;  %2677 = vmatprep.subr.bf16.mxu1 %v3258_v13 }
 0x57f   :  { %2647 = vmatpush1.bf16.msra.mxu0 %v3278_v28  ;;  %2679 = vmatpush1.bf16.msra.mxu1 %v3280_v29 }
 0x580   :  { %2649 = vmatprep.subr.bf16.mxu0 %v3290_v38  ;;  %2681 = vmatprep.subr.bf16.mxu1 %v3292_v39 }
 0x583   :  { %2651 = vmatpush1.bf16.msra.mxu0 %v3300_v47  ;;  %2683 = vmatpush1.bf16.msra.mxu1 %v3302_v48 }
 0x584   :  { %2653 = vmatprep.subr.bf16.mxu0 %v3308_v55  ;;  %2685 = vmatprep.subr.bf16.mxu1 %v3310_v56 }
 0x587   :  { %2655 = vmatpush1.bf16.msra.mxu0 %v3320_v3  ;;  %2687 = vmatpush1.bf16.msra.mxu1 %v3322_v4 }
 0x588   :  { %2657 = vmatprep.subr.bf16.mxu0 %v3328_v14  ;;  %2689 = vmatprep.subr.bf16.mxu1 %v3330_v15 }
 0x58b   :  { %2659 = vmatpush1.bf16.msra.mxu0 %v3338_v25  ;;  %2691 = vmatpush1.bf16.msra.mxu1 %v3340_v26 }
 0x58c   :  { %2661 = vmatprep.subr.bf16.mxu0 %v3346_v34  ;;  %2693 = vmatprep.subr.bf16.mxu1 %v3348_v35 }
 0x58f   :  { %2663 = vmatpush1.bf16.msra.mxu0 %v3354_v44  ;;  %2695 = vmatpush1.bf16.msra.mxu1 %v3356_v45 }
 0x590   :  { %2665 = vmatprep.subr.bf16.mxu0 %v3362_v54  ;;  %2697 = vmatprep.subr.bf16.mxu1 %v3364_v57 }
 0x593   :  { %2667 = vmatpush1.bf16.msra.mxu0 %v3370_v61  ;;  %2699 = vmatpush1.bf16.msra.mxu1 %v3372_v62 }
 0x594   :  { %2701 = vmatprep.subr.bf16.mxu0 %v3218_v22  ;;  %2733 = vmatprep.subr.bf16.mxu1 %v3231_v36 }
 0x649   :  { %v1545_v27 = vpop.f32.mrb[10].mxu0  ;;  %v1616_v30 = vpop.f32.mrb[10].mxu1 }
 0x64a   :  { %v2774_v31 = vadd.f32 %v1545_v27, %v3428_v9  ;;  %v2790_v33 = vadd.f32 %v1616_v30, %v3430_v10  ;;  %v1547_v40 = vpop.f32.mrb[11].mxu0  ;;  %v1618_v41 = vpop.f32.mrb[11].mxu1 }
 0x64b   :  { %v2775_v42 = vadd.f32 %v1547_v40, %v3432_v11  ;;  %v2791_v22 = vadd.f32 %v1618_v41, %v3438_v37 }
 0x64c   :  { %v2235_v43 = vmul.f32 -1.442695, %v2774_v31  ;;  %v2237_v63 = vmul.f32 -1.442695, %v2790_v33 }
 0x64d   :  { %v2236_v8 = vmul.f32 -1.442695, %v2775_v42 }
 0x64e   :  { %2933 = vpow2.f32 %v2235_v43 }
 0x64f   :  { %2935 = vpow2.f32 %v2237_v63 }
 0x650   :  { %2937 = vpow2.f32 %v2236_v8 }
 0x651   :  { %2939 = vtanh.f32 %v2791_v22 }
 0x658   :  { %v2934_v1 = vpop.eup %2933 }
 0x659   :  { %v2936_v36 = vpop.eup %2935  ;;  %v1634_v5 = vadd.f32 1.0, %v2934_v1 }
 0x65a   :  { %v2938_v2 = vpop.eup %2937  ;;  %v1636_v18 = vadd.f32 1.0, %v2936_v36 }
 0x65b   :  { %2941 = vrcp.f32 %v1634_v5  ;;  %v1635_v20 = vadd.f32 1.0, %v2938_v2  ;;  %v2940_v21 = vpop.eup %2939 }
 0x65c   :  { %2943 = vrcp.f32 %v1636_v18 }
 0x65d   :  { %2945 = vrcp.f32 %v1635_v20 }
 0x665   :  { %v2942_v27 = vpop.eup %2941 }
 0x666   :  { %v2944_v30 = vpop.eup %2943  ;;  %v1645_v31 = vmul.f32 %v2942_v27, %v2940_v21 }
 0x667   :  { %v2946_v33 = vpop.eup %2945 }
 0x668   :  { %v1644_v40 = vmul.f32 %v2946_v33, %v2944_v30 }
 0x66a   :  { %v1646_v42 = vadd.f32 %v1645_v31, %v1644_v40 }
 0x66c   :  { %2947 = vtanh.f32 %v1646_v42 }
 0x676   :  { %v2948_v43 = vpop.eup %2947 }
 0x677   :  { %v3673_v41 = vmul.f32 %v2948_v43, %v2944_v30 }
 0x679   :  { %1721 = vmatmul.mubr.f32.vlgmr.msra.gmra.mrb[12].mxu0 %v3673_v41  ;;  %1792 = vmatmul.mubr.f32.vlgmr.msra.gmra.mrb[12].mxu1 %v3673_v41 }
 0x67a   :  { %2703 = vmatpush1.bf16.msra.mxu0 %v3236_v51  ;;  %2735 = vmatpush1.bf16.msra.mxu1 %v3238_v52 }
 0x67b   :  { %2705 = vmatprep.subr.bf16.mxu0 %v3240_v59  ;;  %2737 = vmatprep.subr.bf16.mxu1 %v3242_v60 }
 0x67c   :  { %1897 = vmatprep.mubr.f32.mxu0 %v3128_v0  ;;  %1968 = vmatprep.mubr.f32.mxu1 %v3128_v0 }
 0x67e   :  { %2707 = vmatpush1.bf16.msra.mxu0 %v3250_v6  ;;  %2739 = vmatpush1.bf16.msra.mxu1 %v3252_v7 }
 0x67f   :  { %2709 = vmatprep.subr.bf16.mxu0 %v3256_v12  ;;  %2741 = vmatprep.subr.bf16.mxu1 %v3258_v13 }
 0x682   :  { %2711 = vmatpush1.bf16.msra.mxu0 %v3278_v28  ;;  %2743 = vmatpush1.bf16.msra.mxu1 %v3280_v29 }
 0x683   :  { %2713 = vmatprep.subr.bf16.mxu0 %v3290_v38  ;;  %2745 = vmatprep.subr.bf16.mxu1 %v3292_v39 }
 0x686   :  { %2715 = vmatpush1.bf16.msra.mxu0 %v3300_v47  ;;  %2747 = vmatpush1.bf16.msra.mxu1 %v3302_v48 }
 0x687   :  { %2717 = vmatprep.subr.bf16.mxu0 %v3308_v55  ;;  %2749 = vmatprep.subr.bf16.mxu1 %v3310_v56 }
 0x68a   :  { %2719 = vmatpush1.bf16.msra.mxu0 %v3320_v3  ;;  %2751 = vmatpush1.bf16.msra.mxu1 %v3322_v4 }
 0x68b   :  { %2721 = vmatprep.subr.bf16.mxu0 %v3328_v14  ;;  %2753 = vmatprep.subr.bf16.mxu1 %v3330_v15 }
 0x68e   :  { %2723 = vmatpush1.bf16.msra.mxu0 %v3338_v25  ;;  %2755 = vmatpush1.bf16.msra.mxu1 %v3340_v26 }
 0x68f   :  { %2725 = vmatprep.subr.bf16.mxu0 %v3346_v34  ;;  %2757 = vmatprep.subr.bf16.mxu1 %v3348_v35 }
 0x692   :  { %2727 = vmatpush1.bf16.msra.mxu0 %v3354_v44  ;;  %2759 = vmatpush1.bf16.msra.mxu1 %v3356_v45 }
 0x693   :  { %2729 = vmatprep.subr.bf16.mxu0 %v3362_v54  ;;  %2761 = vmatprep.subr.bf16.mxu1 %v3364_v57 }
 0x696   :  { %2731 = vmatpush1.bf16.msra.mxu0 %v3370_v61  ;;  %2763 = vmatpush1.bf16.msra.mxu1 %v3372_v62 }
 0x74c   :  { %v1722_v0 = vpop.f32.mrb[12].mxu0  ;;  %v1793_v51 = vpop.f32.mrb[12].mxu1 }
 0x74d   :  { %v2776_v52 = vadd.f32 %v1722_v0, %v3428_v9  ;;  %v2792_v59 = vadd.f32 %v1793_v51, %v3430_v10  ;;  %v1724_v60 = vpop.f32.mrb[13].mxu0  ;;  %v1795_v6 = vpop.f32.mrb[13].mxu1 }
 0x74e   :  { %v2777_v7 = vadd.f32 %v1724_v60, %v3432_v11  ;;  %v2793_v29 = vadd.f32 %v1795_v6, %v3438_v37 }
 0x74f   :  { %v2238_v12 = vmul.f32 -1.442695, %v2776_v52  ;;  %v2240_v13 = vmul.f32 -1.442695, %v2792_v59 }
 0x750   :  { %v2239_v28 = vmul.f32 -1.442695, %v2777_v7 }
 0x751   :  { %2949 = vpow2.f32 %v2238_v12 }
 0x752   :  { %2951 = vpow2.f32 %v2240_v13 }
 0x753   :  { %2953 = vpow2.f32 %v2239_v28 }
 0x754   :  { %2955 = vtanh.f32 %v2793_v29 }
 0x75b   :  { %v2950_v38 = vpop.eup %2949 }
 0x75c   :  { %v2952_v39 = vpop.eup %2951  ;;  %v1811_v47 = vadd.f32 1.0, %v2950_v38 }
 0x75d   :  { %v2954_v48 = vpop.eup %2953  ;;  %v1813_v55 = vadd.f32 1.0, %v2952_v39 }
 0x75e   :  { %2957 = vrcp.f32 %v1811_v47  ;;  %v1812_v56 = vadd.f32 1.0, %v2954_v48  ;;  %v2956_v3 = vpop.eup %2955 }
 0x75f   :  { %2959 = vrcp.f32 %v1813_v55 }
 0x760   :  { %2961 = vrcp.f32 %v1812_v56 }
 0x768   :  { %v2958_v4 = vpop.eup %2957 }
 0x769   :  { %v2960_v14 = vpop.eup %2959  ;;  %v1822_v15 = vmul.f32 %v2958_v4, %v2956_v3 }
 0x76a   :  { %v2962_v25 = vpop.eup %2961 }
 0x76b   :  { %v1821_v26 = vmul.f32 %v2962_v25, %v2960_v14 }
 0x76d   :  { %v1823_v34 = vadd.f32 %v1822_v15, %v1821_v26 }
 0x76f   :  { %2963 = vtanh.f32 %v1823_v34 }
 0x779   :  { %v2964_v35 = vpop.eup %2963 }
 0x77a   :  { %v3713_v44 = vmul.f32 %v2964_v35, %v2960_v14 }
 0x77c   :  { %1898 = vmatmul.mubr.f32.vlgmr.msra.gmra.mrb[14].mxu0 %v3713_v44  ;;  %1969 = vmatmul.mubr.f32.vlgmr.msra.gmra.mrb[14].mxu1 %v3713_v44  ;;  %v2047_v43 = vcombine.low %v3631_v16, %v3713_v44  ;;  %v2048_v0 = vcombine.high %v3631_v16, %v3713_v44 }
 0x84f   :  { %v1899_v45 = vpop.f32.mrb[14].mxu0  ;;  %v1970_v54 = vpop.f32.mrb[14].mxu1 }
 0x850   :  { %v2778_v57 = vadd.f32 %v1899_v45, %v3428_v9  ;;  %v2794_v61 = vadd.f32 %v1970_v54, %v3430_v10  ;;  %v1901_v62 = vpop.f32.mrb[15].mxu0  ;;  %v1972_v63 = vpop.f32.mrb[15].mxu1 }
 0x851   :  { %v2779_v8 = vadd.f32 %v1901_v62, %v3432_v11  ;;  %v2795_v5 = vadd.f32 %v1972_v63, %v3438_v37 }
 0x852   :  { %v2241_v22 = vmul.f32 -1.442695, %v2778_v57  ;;  %v2243_v1 = vmul.f32 -1.442695, %v2794_v61 }
 0x853   :  { %v2242_v36 = vmul.f32 -1.442695, %v2779_v8 }
 0x854   :  { %2965 = vpow2.f32 %v2241_v22 }
 0x855   :  { %2967 = vpow2.f32 %v2243_v1 }
 0x856   :  { %2969 = vpow2.f32 %v2242_v36 }
 0x857   :  { %2971 = vtanh.f32 %v2795_v5 }
 0x85e   :  { %v2966_v2 = vpop.eup %2965 }
 0x85f   :  { %v2968_v18 = vpop.eup %2967  ;;  %v1988_v20 = vadd.f32 1.0, %v2966_v2 }
 0x860   :  { %v2970_v21 = vpop.eup %2969  ;;  %v1990_v27 = vadd.f32 1.0, %v2968_v18 }
 0x861   :  { %2973 = vrcp.f32 %v1988_v20  ;;  %v1989_v9 = vadd.f32 1.0, %v2970_v21  ;;  %v2972_v10 = vpop.eup %2971 }
 0x862   :  { %2975 = vrcp.f32 %v1990_v27 }
 0x863   :  { %2977 = vrcp.f32 %v1989_v9 }
 0x86b   :  { %v2974_v11 = vpop.eup %2973 }
 0x86c   :  { %v2976_v30 = vpop.eup %2975  ;;  %v1999_v31 = vmul.f32 %v2974_v11, %v2972_v10 }
 0x86d   :  { %v2978_v33 = vpop.eup %2977 }
 0x86e   :  { %v1998_v40 = vmul.f32 %v2978_v33, %v2976_v30 }
 0x870   :  { %v2000_v42 = vadd.f32 %v1999_v31, %v1998_v40 }
 0x872   :  { %2979 = vtanh.f32 %v2000_v42  ;;  %2006 = vst [vmem:[#allocation13] sm:$0xff] %v2000_v42 }
 0x87c   :  { %v2980_v37 = vpop.eup %2979 }
 0x87d   :  { %v2002_v51 = vmul.f32 %v2980_v37, %v2976_v30 }
 0x87f   :  { %2005 = vst [vmem:[#allocation11] sm:$0xff] %v2002_v51  ;;  %v2063_v52 = vcombine.low %v3673_v41, %v2002_v51  ;;  %v2064_v59 = vcombine.high %v3673_v41, %v2002_v51 }
 0x880   :  { %3058 = shalt.err (!%p3055_p0)
}
 0x881   :  { %s3059_s18 = scalar_lea.hbm %s3802_s5, 128 }
 0x882   :  { %p3060_p1 = scmp.ne.s32.totalorder %s3802_s5, %s3059_s18  ;;  %p3063_p2 = scmp.lt.u32.totalorder %s3059_s18, %s3802_s5 }
 0x884   :  { %p3065_p3 = pnand %p3063_p2, %p3060_p1 }
 0x886   :  { %3068 = shalt.err (!%p3065_p3)
}
 0x887   :  { %2180 = dma.vmem_to_hbm [thread:$0]  %s2178_s8, 128, %s3802_s5, [#allocation12]   ;;  %v2055_v16 = vrot.slane %v2047_v43, %v3221_v23  ;;  %v2062_v41 = vrot.slane %v2048_v0, %v3221_v23  ;;  %v2071_v60 = vrot.slane %v2063_v52, %v3221_v23  ;;  %v2078_v6 = vrot.slane %v2064_v59, %v3221_v23 }
 0x888   :  { %s3069_s26 = scalar_lea.vmem %s3725_s14, 128  ;;  %p3074_p5 = scmp.lt.s32.totalorder %s3725_s14, %s3725_s14 }
 0x889   :  { %p3070_p4 = scmp.ne.s32.totalorder %s3725_s14, %s3069_s26  ;;  %p3075_p6 = scmp.lt.s32.totalorder %s3069_s26, %s3069_s26 }
 0x88b   :  { %p3076_p7 = por %p3075_p6, %p3074_p5 }
 0x88d   :  { %p3077_p8 = pnand %p3076_p7, %p3070_p4 }
 0x88f   :  { %3080 = shalt.err (!%p3077_p8)
}
 0x890   :  { %s3081_s5 = scalar_lea.hbm %s3803_s6, 128 }
 0x891   :  { %p3082_p9 = scmp.ne.s32.totalorder %s3803_s6, %s3081_s5  ;;  %p3085_p10 = scmp.lt.u32.totalorder %s3081_s5, %s3803_s6 }
 0x893   :  { %p3087_p11 = pnand %p3085_p10, %p3082_p9 }
 0x895   :  { %3090 = shalt.err (!%p3087_p11)
}
 0x896   :  { %2190 = dma.vmem_to_hbm [thread:$0]  %s3725_s14, 128, %s3803_s6, [#allocation12]   ;;  %v2111_v23 = vcombine.low %v2055_v16, %v2071_v60  ;;  %v2112_v7 = vcombine.high %v2055_v16, %v2071_v60  ;;  %v2127_v12 = vcombine.low %v2062_v41, %v2078_v6  ;;  %v2128_v13 = vcombine.high %v2062_v41, %v2078_v6 }
 0x897   :  { %v2087_v28 = vrot.slane %v2079_v19, %v3228_v32  ;;  %v2094_v29 = vrot.slane %v2080_v24, %v3228_v32  ;;  %s3133_s6 = smov [#allocation10]   ;;  %v2103_v19 = vrot.slane %v2095_v53, %v3228_v32  ;;  %v2110_v46 = vrot.slane %v2096_v58, %v3228_v32 }
 0x898   :  { %v2119_v38 = vrot.slane %v2111_v23, %v3228_v32  ;;  %v2126_v39 = vrot.slane %v2112_v7, %v3228_v32  ;;  %v2135_v47 = vrot.slane %v2127_v12, %v3228_v32  ;;  %v2142_v48 = vrot.slane %v2128_v13, %v3228_v32  ;;  %s2164_s12 = sshll.u32 %s3133_s6, 4  ;;  %s2165_s12 = int_to_ptr.vmem [resolvable:$true] %s2164_s12 }
 0x899   :  { %s3091_s2 = scalar_lea.vmem %s2165_s12, 1024  ;;  %p3096_p13 = scmp.lt.s32.totalorder %s2165_s12, %s2165_s12 }
 0x89a   :  { %v2143_v50 = vcombine.low %v2087_v28, %v2119_v38  ;;  %v2144_v24 = vcombine.high %v2087_v28, %v2119_v38  ;;  %v2145_v55 = vcombine.low %v2094_v29, %v2126_v39  ;;  %v2146_v56 = vcombine.high %v2094_v29, %v2126_v39  ;;  %p3092_p12 = scmp.ne.s32.totalorder %s2165_s12, %s3091_s2  ;;  %p3097_p0 = scmp.lt.s32.totalorder %s3091_s2, %s3091_s2 }
 0x89b   :  { %v2147_v3 = vcombine.low %v2103_v19, %v2135_v47  ;;  %v2148_v4 = vcombine.high %v2103_v19, %v2135_v47  ;;  %v2149_v14 = vcombine.low %v2110_v46, %v2142_v48  ;;  %v2150_v15 = vcombine.high %v2110_v46, %v2142_v48 }
 0x89c   :  { %2151 = vst [vmem:[#allocation10] sm:$0xff] %v2143_v50  ;;  %2152 = vst [vmem:[#allocation10 + $0x8] sm:$0xff] %v2144_v24  ;;  %p3098_p1 = por %p3097_p0, %p3096_p13 }
 0x89d   :  { %2153 = vst [vmem:[#allocation10 + $0x10] sm:$0xff] %v2145_v55  ;;  %2154 = vst [vmem:[#allocation10 + $0x18] sm:$0xff] %v2146_v56 }
 0x89e   :  { %2155 = vst [vmem:[#allocation10 + $0x20] sm:$0xff] %v2147_v3  ;;  %2156 = vst [vmem:[#allocation10 + $0x28] sm:$0xff] %v2148_v4  ;;  %p3099_p2 = pnand %p3098_p1, %p3092_p12 }
 0x89f   :  { %2157 = vst [vmem:[#allocation10 + $0x30] sm:$0xff] %v2149_v14  ;;  %2158 = vst [vmem:[#allocation10 + $0x38] sm:$0xff] %v2150_v15 }
 0x8a0   :  { %3102 = shalt.err (!%p3099_p2)
}
 0x8a1   :  { %s3103_s8 = scalar_lea.hbm %s3801_s4, 1024 }
 0x8a2   :  { %p3104_p3 = scmp.ne.s32.totalorder %s3801_s4, %s3103_s8  ;;  %p3107_p4 = scmp.lt.u32.totalorder %s3103_s8, %s3801_s4 }
 0x8a4   :  { %p3109_p5 = pnand %p3107_p4, %p3104_p3 }
 0x8a6   :  { %3112 = shalt.err (!%p3109_p5)
}
 0x8a7   :  { %2170 = dma.vmem_to_hbm [thread:$0]  %s2165_s12, 1024, %s3801_s4, [#allocation6], %s3125_s1, %s3125_s1, %s3126_s21  }
 0x8a8   :  { %3117 = dma.done.wait [#allocation6], 1024  }
 0x8a9   :  { %3118 = vsyncadd [#allocation6], 4294966272 }
 0x8aa   :  { %3119 = dma.done.wait [#allocation12], 256  }
 0x8ab   :  { %3120 = vsyncadd [#allocation12], 4294967040 }
 0x8ac   :  { %2200 = vsyncpa [#allocation5], 1 }
 0x8ad   :  { %2201 = vsyncpa [#allocation8], 1 }
 0x8ae   :  { %2202 = vsyncpa [#allocation6], 1 }
 0x8af   :  { %2203 = vsyncpa [#allocation12], 1 }

</bundles_post_ra>
